<compile_context>
chip_gen: v7x
topology: tpu7x:2x2x1
jax: 0.10.0
libtpu: 0.0.40
codegen_flags: <defaults>
</compile_context>

<pallas_src>
import jax
import jax.numpy as jnp
from jax.experimental import pallas as pl
from jax.experimental.pallas import tpu as pltpu

_VMEM = pl.BlockSpec(memory_space=pltpu.MemorySpace.VMEM)


# --------------------------------- kernel ----------------------------------- #

def _lenet_kernel(xpf_ref, w1_ref, b1_ref, w2_ref, b2_ref,
                  wf1_ref, bf1_ref, wf2_ref, bf2_ref, wf3_ref, bf3_ref,
                  out_ref):
    """Entire LeNet forward.

    xpf : (4, B*256) bf16   row = input 2x2 phase (pr*2+pc),
                            col = b*256 + 16*i + j  (x[b, 2i+pr, 2j+pc])
    w1  : (6, 25)   bf16    conv1 weights, cols ordered (di, dj)
    w2  : (16, 150) bf16    conv2 weights, cols ordered (tap=(di,dj), cin)
    wf1 : (120, 400) bf16   fc1 weights, cols ordered (spatial s, channel o)
    wf2 : (84, 120) bf16 ; wf3 : (10, 84) bf16 ; biases are (*, 1) f32
    out : (10, B)   f32     logits, transposed (batch on lanes)
    """
    B = xpf_ref.shape[1] // 256
    # Lane-flat extents covering every valid pooled position (junk columns in
    # between are computed but never read by the next stage).
    L1 = (B - 1) * 256 + 222      # conv1 pooled index: b*256 + 16*ph1 + pw1
    L2 = (B - 1) * 256 + 137      # conv2 pooled index: b*256 + 32*ph2 + 2*pw2

    xpf = xpf_ref[...]                                           # (4, 256B) bf16

    # ---- conv1 (5x5, 1->6) + bias + ReLU + 2x2/2 maxpool -------------------
    w1 = w1_ref[...]                                             # (6, 25)
    z1 = None
    for qi in (0, 1):                 # pool-window quadrant (row, col)
        for qj in (0, 1):
            rows = []
            for di in range(5):       # 25 conv taps -> im2col rows
                for dj in range(5):
                    s, t = qi + di, qj + dj
                    phase = (s % 2) * 2 + (t % 2)
                    off = (s // 2) * 16 + (t // 2)
                    rows.append(xpf[phase:phase + 1, off:off + L1])
            patches = jnp.concatenate(rows, axis=0)              # (25, L1) bf16
            zq = jnp.dot(w1, patches, preferred_element_type=jnp.float32)
            z1 = zq if z1 is None else jnp.maximum(z1, zq)
    o1 = jnp.maximum(z1 + b1_ref[...], 0.0).astype(jnp.bfloat16)  # (6, L1)

    # ---- conv2 (5x5, 6->16) + bias + ReLU + 2x2/2 maxpool ------------------
    w2 = w2_ref[...]                                             # (16, 150)
    z2 = None
    for qi in (0, 1):
        for qj in (0, 1):
            rows = []
            for di in range(5):
                for dj in range(5):
                    off = (qi + di) * 16 + (qj + dj)             # pure lane shift
                    rows.append(o1[:, off:off + L2])             # (6, L2)
            patches = jnp.concatenate(rows, axis=0)              # (150, L2) bf16
            zq = jnp.dot(w2, patches, preferred_element_type=jnp.float32)
            z2 = zq if z2 is None else jnp.maximum(z2, zq)
    a2 = jnp.maximum(z2 + b2_ref[...], 0.0)                      # (16, L2) f32

    # ---- flatten: gather the 25 valid pooled columns per batch -------------
    # (PyTorch (C,5,5) flatten order is folded into wf1's column permutation.)
    blocks = []
    for s in range(25):
        base = 32 * (s // 5) + 2 * (s % 5)
        cols = [a2[:, b * 256 + base: b * 256 + base + 1] for b in range(B)]
        blocks.append(jnp.concatenate(cols, axis=1))             # (16, B)
    g = jnp.concatenate(blocks, axis=0).astype(jnp.bfloat16)     # (400, B)

    # ---- fc1 -> ReLU -> fc2 -> ReLU -> fc3 (batch on the lane dim) ---------
    h = jnp.dot(wf1_ref[...], g, preferred_element_type=jnp.float32) + bf1_ref[...]
    h = jnp.maximum(h, 0.0).astype(jnp.bfloat16)                 # (120, B)
    h = jnp.dot(wf2_ref[...], h, preferred_element_type=jnp.float32) + bf2_ref[...]
    h = jnp.maximum(h, 0.0).astype(jnp.bfloat16)                 # (84, B)
    out = jnp.dot(wf3_ref[...], h, preferred_element_type=jnp.float32) + bf3_ref[...]
    out_ref[...] = out.astype(out_ref.dtype)                     # (10, B)


# --------------------------------- forward ---------------------------------- #

@jax.jit
def lenet_forward(x_nchw, kp):
    B = x_nchw.shape[0]
    # Only XLA prep: (B,1,32,32) -> 2x2-phase, lane-flat (4, B*256), bf16.
    xpf = (x_nchw.reshape(B, 16, 2, 16, 2)
           .transpose(2, 4, 0, 1, 3)
           .reshape(4, B * 256)
           .astype(jnp.bfloat16))

    L1 = (B - 1) * 256 + 222
    L2 = (B - 1) * 256 + 137
    flops = 2 * (4 * 6 * 25 * L1 + 4 * 16 * 150 * L2
                 + (120 * 400 + 84 * 120 + 10 * 84) * B)
    args = (xpf, kp["w1"], kp["b1"], kp["w2"], kp["b2"],
            kp["wf1"], kp["bf1"], kp["wf2"], kp["bf2"], kp["wf3"], kp["bf3"])
    bytes_accessed = sum(a.size * a.dtype.itemsize for a in args) + 10 * B * 4

    # TODO(synk): for large B, add a ("parallel",) grid over the lane-flat
    # position dim to use v7x's second TensorCore and tile against 64 MiB VMEM.
    out_t = pl.pallas_call(
        _lenet_kernel,
        out_shape=jax.ShapeDtypeStruct((10, B), jnp.float32),
        in_specs=[_VMEM] * len(args),
        out_specs=_VMEM,
        cost_estimate=pl.CostEstimate(flops=flops, transcendentals=0,
                                      bytes_accessed=bytes_accessed),
    )(*args)
    return out_t.T                                               # (B, 10)


# ----------------------- parameter init & pre-layout ------------------------ #

def init_params(key):
    ks = jax.random.split(key, 10)

    def u(k, shape, fan_in):
        bound = 1.0 / float(fan_in) ** 0.5
        return jax.random.uniform(k, shape, jnp.float32, -bound, bound)

    return {
        "conv1_w": u(ks[0], (6, 1, 5, 5), 1 * 5 * 5),
        "conv1_b": u(ks[1], (6,), 1 * 5 * 5),
        "conv2_w": u(ks[2], (16, 6, 5, 5), 6 * 5 * 5),
        "conv2_b": u(ks[3], (16,), 6 * 5 * 5),
        "fc1_w": u(ks[4], (120, 16 * 5 * 5), 16 * 5 * 5),
        "fc1_b": u(ks[5], (120,), 16 * 5 * 5),
        "fc2_w": u(ks[6], (84, 120), 120),
        "fc2_b": u(ks[7], (84,), 84),
        "fc3_w": u(ks[8], (10, 84), 84),
        "fc3_b": u(ks[9], (10,), 84),
    }


def prepare_params(p):
    """One-time layout: bf16 matmul operands, kernel-friendly orderings."""
    bf16 = jnp.bfloat16

    def col(b):
        return b.reshape(-1, 1).astype(jnp.float32)

    # conv1 (6,1,5,5) -> (6, 25), cols (di, dj)
    w1 = p["conv1_w"].reshape(6, 25).astype(bf16)
    # conv2 (16,6,5,5) -> (16, 150), cols ((di,dj), cin)
    w2 = jnp.transpose(p["conv2_w"], (0, 2, 3, 1)).reshape(16, 150).astype(bf16)
    # fc1 (120, 400) with input features ordered (o, s) -> cols ordered (s, o)
    wf1 = (p["fc1_w"].reshape(120, 16, 25)
           .transpose(0, 2, 1)
           .reshape(120, 400)
           .astype(bf16))
    return {
        "w1": w1, "b1": col(p["conv1_b"]),
        "w2": w2, "b2": col(p["conv2_b"]),
        "wf1": wf1, "bf1": col(p["fc1_b"]),
        "wf2": p["fc2_w"].astype(bf16), "bf2": col(p["fc2_b"]),
        "wf3": p["fc3_w"].astype(bf16), "bf3": col(p["fc3_b"]),
    }


# ----------------------------- pure-JAX reference ---------------------------- #

def lenet_reference(x_nchw, p):
    def conv(x, w, b):
        y = jax.lax.conv_general_dilated(
            x, w, (1, 1), "VALID", dimension_numbers=("NCHW", "OIHW", "NCHW"))
        return jax.nn.relu(y + b[None, :, None, None])

    def pool(x):
        return jax.lax.reduce_window(x, -jnp.inf, jax.lax.max,
                                     (1, 1, 2, 2), (1, 1, 2, 2), "VALID")

    x = pool(conv(x_nchw, p["conv1_w"], p["conv1_b"]))
    x = pool(conv(x, p["conv2_w"], p["conv2_b"]))
    x = x.reshape(x.shape[0], -1)
    x = jax.nn.relu(x @ p["fc1_w"].T + p["fc1_b"])
    x = jax.nn.relu(x @ p["fc2_w"].T + p["fc2_b"])
    return x @ p["fc3_w"].T + p["fc3_b"]


# ------------------------------------ main ----------------------------------- #

if __name__ == "__main__":
    key = jax.random.PRNGKey(0)
    pkey, xkey = jax.random.split(key)
    params = init_params(pkey)
    kparams = prepare_params(params)
    # LeNet requires 32x32 single-channel input to yield 16*5*5 flat features.
    x = jax.random.normal(xkey, (2, 1, 32, 32), jnp.float32)

    out = jax.block_until_ready(lenet_forward(x, kparams))
    ref = lenet_reference(x, params)

    assert out.shape == (2, 10), out.shape
    assert bool(jnp.all(jnp.isfinite(out)))
    max_err = float(jnp.max(jnp.abs(out - ref)))
    assert max_err < 5e-2, f"mismatch vs reference: {max_err}"
    print("KERNEL_OK")
</pallas_src>

<mosaic_0001>
module attributes {stable_mosaic.version = 11 : i64} {
  func.func @_lenet_kernel(%arg0: memref<4x512xbf16, #tpu.memory_space<vmem>>, %arg1: memref<6x25xbf16, #tpu.memory_space<vmem>>, %arg2: memref<6x1xf32, #tpu.memory_space<vmem>>, %arg3: memref<16x150xbf16, #tpu.memory_space<vmem>>, %arg4: memref<16x1xf32, #tpu.memory_space<vmem>>, %arg5: memref<120x400xbf16, #tpu.memory_space<vmem>>, %arg6: memref<120x1xf32, #tpu.memory_space<vmem>>, %arg7: memref<84x120xbf16, #tpu.memory_space<vmem>>, %arg8: memref<84x1xf32, #tpu.memory_space<vmem>>, %arg9: memref<10x84xbf16, #tpu.memory_space<vmem>>, %arg10: memref<10x1xf32, #tpu.memory_space<vmem>>, %arg11: memref<10x2xf32, #tpu.memory_space<vmem>>) attributes {dimension_semantics = [], scalar_prefetch = 0 : i64, scratch_operands = 0 : i64, tpu.core_type = #tpu.core_type<tc>} {
    %c0 = arith.constant 0 : index
    %c0_0 = arith.constant 0 : index
    %0 = vector.load %arg0[%c0, %c0_0] : memref<4x512xbf16, #tpu.memory_space<vmem>>, vector<4x512xbf16>
    %c0_1 = arith.constant 0 : index
    %c0_2 = arith.constant 0 : index
    %1 = vector.load %arg1[%c0_1, %c0_2] : memref<6x25xbf16, #tpu.memory_space<vmem>>, vector<6x25xbf16>
    %2 = vector.extract_strided_slice %0 {offsets = [0, 0], sizes = [1, 478], strides = [1, 1]} : vector<4x512xbf16> to vector<1x478xbf16>
    %3 = vector.extract_strided_slice %0 {offsets = [1, 0], sizes = [1, 478], strides = [1, 1]} : vector<4x512xbf16> to vector<1x478xbf16>
    %4 = vector.extract_strided_slice %0 {offsets = [0, 1], sizes = [1, 478], strides = [1, 1]} : vector<4x512xbf16> to vector<1x478xbf16>
    %5 = vector.extract_strided_slice %0 {offsets = [1, 1], sizes = [1, 478], strides = [1, 1]} : vector<4x512xbf16> to vector<1x478xbf16>
    %6 = vector.extract_strided_slice %0 {offsets = [0, 2], sizes = [1, 478], strides = [1, 1]} : vector<4x512xbf16> to vector<1x478xbf16>
    %7 = vector.extract_strided_slice %0 {offsets = [2, 0], sizes = [1, 478], strides = [1, 1]} : vector<4x512xbf16> to vector<1x478xbf16>
    %8 = vector.extract_strided_slice %0 {offsets = [3, 0], sizes = [1, 478], strides = [1, 1]} : vector<4x512xbf16> to vector<1x478xbf16>
    %9 = vector.extract_strided_slice %0 {offsets = [2, 1], sizes = [1, 478], strides = [1, 1]} : vector<4x512xbf16> to vector<1x478xbf16>
    %10 = vector.extract_strided_slice %0 {offsets = [3, 1], sizes = [1, 478], strides = [1, 1]} : vector<4x512xbf16> to vector<1x478xbf16>
    %11 = vector.extract_strided_slice %0 {offsets = [2, 2], sizes = [1, 478], strides = [1, 1]} : vector<4x512xbf16> to vector<1x478xbf16>
    %12 = vector.extract_strided_slice %0 {offsets = [0, 16], sizes = [1, 478], strides = [1, 1]} : vector<4x512xbf16> to vector<1x478xbf16>
    %13 = vector.extract_strided_slice %0 {offsets = [1, 16], sizes = [1, 478], strides = [1, 1]} : vector<4x512xbf16> to vector<1x478xbf16>
    %14 = vector.extract_strided_slice %0 {offsets = [0, 17], sizes = [1, 478], strides = [1, 1]} : vector<4x512xbf16> to vector<1x478xbf16>
    %15 = vector.extract_strided_slice %0 {offsets = [1, 17], sizes = [1, 478], strides = [1, 1]} : vector<4x512xbf16> to vector<1x478xbf16>
    %16 = vector.extract_strided_slice %0 {offsets = [0, 18], sizes = [1, 478], strides = [1, 1]} : vector<4x512xbf16> to vector<1x478xbf16>
    %17 = vector.extract_strided_slice %0 {offsets = [2, 16], sizes = [1, 478], strides = [1, 1]} : vector<4x512xbf16> to vector<1x478xbf16>
    %18 = vector.extract_strided_slice %0 {offsets = [3, 16], sizes = [1, 478], strides = [1, 1]} : vector<4x512xbf16> to vector<1x478xbf16>
    %19 = vector.extract_strided_slice %0 {offsets = [2, 17], sizes = [1, 478], strides = [1, 1]} : vector<4x512xbf16> to vector<1x478xbf16>
    %20 = vector.extract_strided_slice %0 {offsets = [3, 17], sizes = [1, 478], strides = [1, 1]} : vector<4x512xbf16> to vector<1x478xbf16>
    %21 = vector.extract_strided_slice %0 {offsets = [2, 18], sizes = [1, 478], strides = [1, 1]} : vector<4x512xbf16> to vector<1x478xbf16>
    %22 = vector.extract_strided_slice %0 {offsets = [0, 32], sizes = [1, 478], strides = [1, 1]} : vector<4x512xbf16> to vector<1x478xbf16>
    %23 = vector.extract_strided_slice %0 {offsets = [1, 32], sizes = [1, 478], strides = [1, 1]} : vector<4x512xbf16> to vector<1x478xbf16>
    %24 = vector.extract_strided_slice %0 {offsets = [0, 33], sizes = [1, 478], strides = [1, 1]} : vector<4x512xbf16> to vector<1x478xbf16>
    %25 = vector.extract_strided_slice %0 {offsets = [1, 33], sizes = [1, 478], strides = [1, 1]} : vector<4x512xbf16> to vector<1x478xbf16>
    %26 = vector.extract_strided_slice %0 {offsets = [0, 34], sizes = [1, 478], strides = [1, 1]} : vector<4x512xbf16> to vector<1x478xbf16>
    %27 = tpu.concatenate %2, %3, %4, %5, %6, %7, %8, %9, %10, %11, %12, %13, %14, %15, %16, %17 in 0 : vector<1x478xbf16>, vector<1x478xbf16>, vector<1x478xbf16>, vector<1x478xbf16>, vector<1x478xbf16>, vector<1x478xbf16>, vector<1x478xbf16>, vector<1x478xbf16>, vector<1x478xbf16>, vector<1x478xbf16>, vector<1x478xbf16>, vector<1x478xbf16>, vector<1x478xbf16>, vector<1x478xbf16>, vector<1x478xbf16>, vector<1x478xbf16> -> vector<16x478xbf16>
    %28 = tpu.concatenate %18, %19, %20, %21, %22, %23, %24, %25, %26 in 0 : vector<1x478xbf16>, vector<1x478xbf16>, vector<1x478xbf16>, vector<1x478xbf16>, vector<1x478xbf16>, vector<1x478xbf16>, vector<1x478xbf16>, vector<1x478xbf16>, vector<1x478xbf16> -> vector<9x478xbf16>
    %29 = tpu.concatenate %27, %28 in 0 : vector<16x478xbf16>, vector<9x478xbf16> -> vector<25x478xbf16>
    %cst = arith.constant dense<0.000000e+00> : vector<6x478xf32>
    %30 = tpu.matmul %1, %29, %cst {dimension_numbers = #tpu.dot_dimension_numbers<[1], [0], [0], [1], [0, 0, 1, 1], [], []>} : vector<6x25xbf16>, vector<25x478xbf16>, vector<6x478xf32> -> vector<6x478xf32>
    %31 = vector.extract_strided_slice %0 {offsets = [1, 0], sizes = [1, 478], strides = [1, 1]} : vector<4x512xbf16> to vector<1x478xbf16>
    %32 = vector.extract_strided_slice %0 {offsets = [0, 1], sizes = [1, 478], strides = [1, 1]} : vector<4x512xbf16> to vector<1x478xbf16>
    %33 = vector.extract_strided_slice %0 {offsets = [1, 1], sizes = [1, 478], strides = [1, 1]} : vector<4x512xbf16> to vector<1x478xbf16>
    %34 = vector.extract_strided_slice %0 {offsets = [0, 2], sizes = [1, 478], strides = [1, 1]} : vector<4x512xbf16> to vector<1x478xbf16>
    %35 = vector.extract_strided_slice %0 {offsets = [1, 2], sizes = [1, 478], strides = [1, 1]} : vector<4x512xbf16> to vector<1x478xbf16>
    %36 = vector.extract_strided_slice %0 {offsets = [3, 0], sizes = [1, 478], strides = [1, 1]} : vector<4x512xbf16> to vector<1x478xbf16>
    %37 = vector.extract_strided_slice %0 {offsets = [2, 1], sizes = [1, 478], strides = [1, 1]} : vector<4x512xbf16> to vector<1x478xbf16>
    %38 = vector.extract_strided_slice %0 {offsets = [3, 1], sizes = [1, 478], strides = [1, 1]} : vector<4x512xbf16> to vector<1x478xbf16>
    %39 = vector.extract_strided_slice %0 {offsets = [2, 2], sizes = [1, 478], strides = [1, 1]} : vector<4x512xbf16> to vector<1x478xbf16>
    %40 = vector.extract_strided_slice %0 {offsets = [3, 2], sizes = [1, 478], strides = [1, 1]} : vector<4x512xbf16> to vector<1x478xbf16>
    %41 = vector.extract_strided_slice %0 {offsets = [1, 16], sizes = [1, 478], strides = [1, 1]} : vector<4x512xbf16> to vector<1x478xbf16>
    %42 = vector.extract_strided_slice %0 {offsets = [0, 17], sizes = [1, 478], strides = [1, 1]} : vector<4x512xbf16> to vector<1x478xbf16>
    %43 = vector.extract_strided_slice %0 {offsets = [1, 17], sizes = [1, 478], strides = [1, 1]} : vector<4x512xbf16> to vector<1x478xbf16>
    %44 = vector.extract_strided_slice %0 {offsets = [0, 18], sizes = [1, 478], strides = [1, 1]} : vector<4x512xbf16> to vector<1x478xbf16>
    %45 = vector.extract_strided_slice %0 {offsets = [1, 18], sizes = [1, 478], strides = [1, 1]} : vector<4x512xbf16> to vector<1x478xbf16>
    %46 = vector.extract_strided_slice %0 {offsets = [3, 16], sizes = [1, 478], strides = [1, 1]} : vector<4x512xbf16> to vector<1x478xbf16>
    %47 = vector.extract_strided_slice %0 {offsets = [2, 17], sizes = [1, 478], strides = [1, 1]} : vector<4x512xbf16> to vector<1x478xbf16>
    %48 = vector.extract_strided_slice %0 {offsets = [3, 17], sizes = [1, 478], strides = [1, 1]} : vector<4x512xbf16> to vector<1x478xbf16>
    %49 = vector.extract_strided_slice %0 {offsets = [2, 18], sizes = [1, 478], strides = [1, 1]} : vector<4x512xbf16> to vector<1x478xbf16>
    %50 = vector.extract_strided_slice %0 {offsets = [3, 18], sizes = [1, 478], strides = [1, 1]} : vector<4x512xbf16> to vector<1x478xbf16>
    %51 = vector.extract_strided_slice %0 {offsets = [1, 32], sizes = [1, 478], strides = [1, 1]} : vector<4x512xbf16> to vector<1x478xbf16>
    %52 = vector.extract_strided_slice %0 {offsets = [0, 33], sizes = [1, 478], strides = [1, 1]} : vector<4x512xbf16> to vector<1x478xbf16>
    %53 = vector.extract_strided_slice %0 {offsets = [1, 33], sizes = [1, 478], strides = [1, 1]} : vector<4x512xbf16> to vector<1x478xbf16>
    %54 = vector.extract_strided_slice %0 {offsets = [0, 34], sizes = [1, 478], strides = [1, 1]} : vector<4x512xbf16> to vector<1x478xbf16>
    %55 = vector.extract_strided_slice %0 {offsets = [1, 34], sizes = [1, 478], strides = [1, 1]} : vector<4x512xbf16> to vector<1x478xbf16>
    %56 = tpu.concatenate %31, %32, %33, %34, %35, %36, %37, %38, %39, %40, %41, %42, %43, %44, %45, %46 in 0 : vector<1x478xbf16>, vector<1x478xbf16>, vector<1x478xbf16>, vector<1x478xbf16>, vector<1x478xbf16>, vector<1x478xbf16>, vector<1x478xbf16>, vector<1x478xbf16>, vector<1x478xbf16>, vector<1x478xbf16>, vector<1x478xbf16>, vector<1x478xbf16>, vector<1x478xbf16>, vector<1x478xbf16>, vector<1x478xbf16>, vector<1x478xbf16> -> vector<16x478xbf16>
    %57 = tpu.concatenate %47, %48, %49, %50, %51, %52, %53, %54, %55 in 0 : vector<1x478xbf16>, vector<1x478xbf16>, vector<1x478xbf16>, vector<1x478xbf16>, vector<1x478xbf16>, vector<1x478xbf16>, vector<1x478xbf16>, vector<1x478xbf16>, vector<1x478xbf16> -> vector<9x478xbf16>
    %58 = tpu.concatenate %56, %57 in 0 : vector<16x478xbf16>, vector<9x478xbf16> -> vector<25x478xbf16>
    %cst_3 = arith.constant dense<0.000000e+00> : vector<6x478xf32>
    %59 = tpu.matmul %1, %58, %cst_3 {dimension_numbers = #tpu.dot_dimension_numbers<[1], [0], [0], [1], [0, 0, 1, 1], [], []>} : vector<6x25xbf16>, vector<25x478xbf16>, vector<6x478xf32> -> vector<6x478xf32>
    %60 = arith.maximumf %30, %59 : vector<6x478xf32>
    %61 = vector.extract_strided_slice %0 {offsets = [2, 0], sizes = [1, 478], strides = [1, 1]} : vector<4x512xbf16> to vector<1x478xbf16>
    %62 = vector.extract_strided_slice %0 {offsets = [3, 0], sizes = [1, 478], strides = [1, 1]} : vector<4x512xbf16> to vector<1x478xbf16>
    %63 = vector.extract_strided_slice %0 {offsets = [2, 1], sizes = [1, 478], strides = [1, 1]} : vector<4x512xbf16> to vector<1x478xbf16>
    %64 = vector.extract_strided_slice %0 {offsets = [3, 1], sizes = [1, 478], strides = [1, 1]} : vector<4x512xbf16> to vector<1x478xbf16>
    %65 = vector.extract_strided_slice %0 {offsets = [2, 2], sizes = [1, 478], strides = [1, 1]} : vector<4x512xbf16> to vector<1x478xbf16>
    %66 = vector.extract_strided_slice %0 {offsets = [0, 16], sizes = [1, 478], strides = [1, 1]} : vector<4x512xbf16> to vector<1x478xbf16>
    %67 = vector.extract_strided_slice %0 {offsets = [1, 16], sizes = [1, 478], strides = [1, 1]} : vector<4x512xbf16> to vector<1x478xbf16>
    %68 = vector.extract_strided_slice %0 {offsets = [0, 17], sizes = [1, 478], strides = [1, 1]} : vector<4x512xbf16> to vector<1x478xbf16>
    %69 = vector.extract_strided_slice %0 {offsets = [1, 17], sizes = [1, 478], strides = [1, 1]} : vector<4x512xbf16> to vector<1x478xbf16>
    %70 = vector.extract_strided_slice %0 {offsets = [0, 18], sizes = [1, 478], strides = [1, 1]} : vector<4x512xbf16> to vector<1x478xbf16>
    %71 = vector.extract_strided_slice %0 {offsets = [2, 16], sizes = [1, 478], strides = [1, 1]} : vector<4x512xbf16> to vector<1x478xbf16>
    %72 = vector.extract_strided_slice %0 {offsets = [3, 16], sizes = [1, 478], strides = [1, 1]} : vector<4x512xbf16> to vector<1x478xbf16>
    %73 = vector.extract_strided_slice %0 {offsets = [2, 17], sizes = [1, 478], strides = [1, 1]} : vector<4x512xbf16> to vector<1x478xbf16>
    %74 = vector.extract_strided_slice %0 {offsets = [3, 17], sizes = [1, 478], strides = [1, 1]} : vector<4x512xbf16> to vector<1x478xbf16>
    %75 = vector.extract_strided_slice %0 {offsets = [2, 18], sizes = [1, 478], strides = [1, 1]} : vector<4x512xbf16> to vector<1x478xbf16>
    %76 = vector.extract_strided_slice %0 {offsets = [0, 32], sizes = [1, 478], strides = [1, 1]} : vector<4x512xbf16> to vector<1x478xbf16>
    %77 = vector.extract_strided_slice %0 {offsets = [1, 32], sizes = [1, 478], strides = [1, 1]} : vector<4x512xbf16> to vector<1x478xbf16>
    %78 = vector.extract_strided_slice %0 {offsets = [0, 33], sizes = [1, 478], strides = [1, 1]} : vector<4x512xbf16> to vector<1x478xbf16>
    %79 = vector.extract_strided_slice %0 {offsets = [1, 33], sizes = [1, 478], strides = [1, 1]} : vector<4x512xbf16> to vector<1x478xbf16>
    %80 = vector.extract_strided_slice %0 {offsets = [0, 34], sizes = [1, 478], strides = [1, 1]} : vector<4x512xbf16> to vector<1x478xbf16>
    %81 = vector.extract_strided_slice %0 {offsets = [2, 32], sizes = [1, 478], strides = [1, 1]} : vector<4x512xbf16> to vector<1x478xbf16>
    %82 = vector.extract_strided_slice %0 {offsets = [3, 32], sizes = [1, 478], strides = [1, 1]} : vector<4x512xbf16> to vector<1x478xbf16>
    %83 = vector.extract_strided_slice %0 {offsets = [2, 33], sizes = [1, 478], strides = [1, 1]} : vector<4x512xbf16> to vector<1x478xbf16>
    %84 = vector.extract_strided_slice %0 {offsets = [3, 33], sizes = [1, 478], strides = [1, 1]} : vector<4x512xbf16> to vector<1x478xbf16>
    %85 = vector.extract_strided_slice %0 {offsets = [2, 34], sizes = [1, 478], strides = [1, 1]} : vector<4x512xbf16> to vector<1x478xbf16>
    %86 = tpu.concatenate %61, %62, %63, %64, %65, %66, %67, %68, %69, %70, %71, %72, %73, %74, %75, %76 in 0 : vector<1x478xbf16>, vector<1x478xbf16>, vector<1x478xbf16>, vector<1x478xbf16>, vector<1x478xbf16>, vector<1x478xbf16>, vector<1x478xbf16>, vector<1x478xbf16>, vector<1x478xbf16>, vector<1x478xbf16>, vector<1x478xbf16>, vector<1x478xbf16>, vector<1x478xbf16>, vector<1x478xbf16>, vector<1x478xbf16>, vector<1x478xbf16> -> vector<16x478xbf16>
    %87 = tpu.concatenate %77, %78, %79, %80, %81, %82, %83, %84, %85 in 0 : vector<1x478xbf16>, vector<1x478xbf16>, vector<1x478xbf16>, vector<1x478xbf16>, vector<1x478xbf16>, vector<1x478xbf16>, vector<1x478xbf16>, vector<1x478xbf16>, vector<1x478xbf16> -> vector<9x478xbf16>
    %88 = tpu.concatenate %86, %87 in 0 : vector<16x478xbf16>, vector<9x478xbf16> -> vector<25x478xbf16>
    %cst_4 = arith.constant dense<0.000000e+00> : vector<6x478xf32>
    %89 = tpu.matmul %1, %88, %cst_4 {dimension_numbers = #tpu.dot_dimension_numbers<[1], [0], [0], [1], [0, 0, 1, 1], [], []>} : vector<6x25xbf16>, vector<25x478xbf16>, vector<6x478xf32> -> vector<6x478xf32>
    %90 = arith.maximumf %60, %89 : vector<6x478xf32>
    %91 = vector.extract_strided_slice %0 {offsets = [3, 0], sizes = [1, 478], strides = [1, 1]} : vector<4x512xbf16> to vector<1x478xbf16>
    %92 = vector.extract_strided_slice %0 {offsets = [2, 1], sizes = [1, 478], strides = [1, 1]} : vector<4x512xbf16> to vector<1x478xbf16>
    %93 = vector.extract_strided_slice %0 {offsets = [3, 1], sizes = [1, 478], strides = [1, 1]} : vector<4x512xbf16> to vector<1x478xbf16>
    %94 = vector.extract_strided_slice %0 {offsets = [2, 2], sizes = [1, 478], strides = [1, 1]} : vector<4x512xbf16> to vector<1x478xbf16>
    %95 = vector.extract_strided_slice %0 {offsets = [3, 2], sizes = [1, 478], strides = [1, 1]} : vector<4x512xbf16> to vector<1x478xbf16>
    %96 = vector.extract_strided_slice %0 {offsets = [1, 16], sizes = [1, 478], strides = [1, 1]} : vector<4x512xbf16> to vector<1x478xbf16>
    %97 = vector.extract_strided_slice %0 {offsets = [0, 17], sizes = [1, 478], strides = [1, 1]} : vector<4x512xbf16> to vector<1x478xbf16>
    %98 = vector.extract_strided_slice %0 {offsets = [1, 17], sizes = [1, 478], strides = [1, 1]} : vector<4x512xbf16> to vector<1x478xbf16>
    %99 = vector.extract_strided_slice %0 {offsets = [0, 18], sizes = [1, 478], strides = [1, 1]} : vector<4x512xbf16> to vector<1x478xbf16>
    %100 = vector.extract_strided_slice %0 {offsets = [1, 18], sizes = [1, 478], strides = [1, 1]} : vector<4x512xbf16> to vector<1x478xbf16>
    %101 = vector.extract_strided_slice %0 {offsets = [3, 16], sizes = [1, 478], strides = [1, 1]} : vector<4x512xbf16> to vector<1x478xbf16>
    %102 = vector.extract_strided_slice %0 {offsets = [2, 17], sizes = [1, 478], strides = [1, 1]} : vector<4x512xbf16> to vector<1x478xbf16>
    %103 = vector.extract_strided_slice %0 {offsets = [3, 17], sizes = [1, 478], strides = [1, 1]} : vector<4x512xbf16> to vector<1x478xbf16>
    %104 = vector.extract_strided_slice %0 {offsets = [2, 18], sizes = [1, 478], strides = [1, 1]} : vector<4x512xbf16> to vector<1x478xbf16>
    %105 = vector.extract_strided_slice %0 {offsets = [3, 18], sizes = [1, 478], strides = [1, 1]} : vector<4x512xbf16> to vector<1x478xbf16>
    %106 = vector.extract_strided_slice %0 {offsets = [1, 32], sizes = [1, 478], strides = [1, 1]} : vector<4x512xbf16> to vector<1x478xbf16>
    %107 = vector.extract_strided_slice %0 {offsets = [0, 33], sizes = [1, 478], strides = [1, 1]} : vector<4x512xbf16> to vector<1x478xbf16>
    %108 = vector.extract_strided_slice %0 {offsets = [1, 33], sizes = [1, 478], strides = [1, 1]} : vector<4x512xbf16> to vector<1x478xbf16>
    %109 = vector.extract_strided_slice %0 {offsets = [0, 34], sizes = [1, 478], strides = [1, 1]} : vector<4x512xbf16> to vector<1x478xbf16>
    %110 = vector.extract_strided_slice %0 {offsets = [1, 34], sizes = [1, 478], strides = [1, 1]} : vector<4x512xbf16> to vector<1x478xbf16>
    %111 = vector.extract_strided_slice %0 {offsets = [3, 32], sizes = [1, 478], strides = [1, 1]} : vector<4x512xbf16> to vector<1x478xbf16>
    %112 = vector.extract_strided_slice %0 {offsets = [2, 33], sizes = [1, 478], strides = [1, 1]} : vector<4x512xbf16> to vector<1x478xbf16>
    %113 = vector.extract_strided_slice %0 {offsets = [3, 33], sizes = [1, 478], strides = [1, 1]} : vector<4x512xbf16> to vector<1x478xbf16>
    %114 = vector.extract_strided_slice %0 {offsets = [2, 34], sizes = [1, 478], strides = [1, 1]} : vector<4x512xbf16> to vector<1x478xbf16>
    %115 = vector.extract_strided_slice %0 {offsets = [3, 34], sizes = [1, 478], strides = [1, 1]} : vector<4x512xbf16> to vector<1x478xbf16>
    %116 = tpu.concatenate %91, %92, %93, %94, %95, %96, %97, %98, %99, %100, %101, %102, %103, %104, %105, %106 in 0 : vector<1x478xbf16>, vector<1x478xbf16>, vector<1x478xbf16>, vector<1x478xbf16>, vector<1x478xbf16>, vector<1x478xbf16>, vector<1x478xbf16>, vector<1x478xbf16>, vector<1x478xbf16>, vector<1x478xbf16>, vector<1x478xbf16>, vector<1x478xbf16>, vector<1x478xbf16>, vector<1x478xbf16>, vector<1x478xbf16>, vector<1x478xbf16> -> vector<16x478xbf16>
    %117 = tpu.concatenate %107, %108, %109, %110, %111, %112, %113, %114, %115 in 0 : vector<1x478xbf16>, vector<1x478xbf16>, vector<1x478xbf16>, vector<1x478xbf16>, vector<1x478xbf16>, vector<1x478xbf16>, vector<1x478xbf16>, vector<1x478xbf16>, vector<1x478xbf16> -> vector<9x478xbf16>
    %118 = tpu.concatenate %116, %117 in 0 : vector<16x478xbf16>, vector<9x478xbf16> -> vector<25x478xbf16>
    %cst_5 = arith.constant dense<0.000000e+00> : vector<6x478xf32>
    %119 = tpu.matmul %1, %118, %cst_5 {dimension_numbers = #tpu.dot_dimension_numbers<[1], [0], [0], [1], [0, 0, 1, 1], [], []>} : vector<6x25xbf16>, vector<25x478xbf16>, vector<6x478xf32> -> vector<6x478xf32>
    %120 = arith.maximumf %90, %119 : vector<6x478xf32>
    %c0_6 = arith.constant 0 : index
    %c0_7 = arith.constant 0 : index
    %121 = vector.load %arg2[%c0_6, %c0_7] : memref<6x1xf32, #tpu.memory_space<vmem>>, vector<6x1xf32>
    %122 = vector.broadcast %121 : vector<6x1xf32> to vector<6x478xf32>
    %123 = arith.addf %120, %122 : vector<6x478xf32>
    %cst_8 = arith.constant 0.000000e+00 : f32
    %124 = vector.broadcast %cst_8 : f32 to vector<6x478xf32>
    %125 = arith.maximumf %123, %124 : vector<6x478xf32>
    %126 = arith.truncf %125 : vector<6x478xf32> to vector<6x478xbf16>
    %c0_9 = arith.constant 0 : index
    %c0_10 = arith.constant 0 : index
    %127 = vector.load %arg3[%c0_9, %c0_10] : memref<16x150xbf16, #tpu.memory_space<vmem>>, vector<16x150xbf16>
    %128 = vector.extract_strided_slice %126 {offsets = [0, 0], sizes = [6, 393], strides = [1, 1]} : vector<6x478xbf16> to vector<6x393xbf16>
    %129 = vector.extract_strided_slice %126 {offsets = [0, 1], sizes = [6, 393], strides = [1, 1]} : vector<6x478xbf16> to vector<6x393xbf16>
    %130 = vector.extract_strided_slice %126 {offsets = [0, 2], sizes = [6, 393], strides = [1, 1]} : vector<6x478xbf16> to vector<6x393xbf16>
    %131 = vector.extract_strided_slice %126 {offsets = [0, 3], sizes = [6, 393], strides = [1, 1]} : vector<6x478xbf16> to vector<6x393xbf16>
    %132 = vector.extract_strided_slice %126 {offsets = [0, 4], sizes = [6, 393], strides = [1, 1]} : vector<6x478xbf16> to vector<6x393xbf16>
    %133 = vector.extract_strided_slice %126 {offsets = [0, 16], sizes = [6, 393], strides = [1, 1]} : vector<6x478xbf16> to vector<6x393xbf16>
    %134 = vector.extract_strided_slice %126 {offsets = [0, 17], sizes = [6, 393], strides = [1, 1]} : vector<6x478xbf16> to vector<6x393xbf16>
    %135 = vector.extract_strided_slice %126 {offsets = [0, 18], sizes = [6, 393], strides = [1, 1]} : vector<6x478xbf16> to vector<6x393xbf16>
    %136 = vector.extract_strided_slice %126 {offsets = [0, 19], sizes = [6, 393], strides = [1, 1]} : vector<6x478xbf16> to vector<6x393xbf16>
    %137 = vector.extract_strided_slice %126 {offsets = [0, 20], sizes = [6, 393], strides = [1, 1]} : vector<6x478xbf16> to vector<6x393xbf16>
    %138 = vector.extract_strided_slice %126 {offsets = [0, 32], sizes = [6, 393], strides = [1, 1]} : vector<6x478xbf16> to vector<6x393xbf16>
    %139 = vector.extract_strided_slice %126 {offsets = [0, 33], sizes = [6, 393], strides = [1, 1]} : vector<6x478xbf16> to vector<6x393xbf16>
    %140 = vector.extract_strided_slice %126 {offsets = [0, 34], sizes = [6, 393], strides = [1, 1]} : vector<6x478xbf16> to vector<6x393xbf16>
    %141 = vector.extract_strided_slice %126 {offsets = [0, 35], sizes = [6, 393], strides = [1, 1]} : vector<6x478xbf16> to vector<6x393xbf16>
    %142 = vector.extract_strided_slice %126 {offsets = [0, 36], sizes = [6, 393], strides = [1, 1]} : vector<6x478xbf16> to vector<6x393xbf16>
    %143 = vector.extract_strided_slice %126 {offsets = [0, 48], sizes = [6, 393], strides = [1, 1]} : vector<6x478xbf16> to vector<6x393xbf16>
    %144 = vector.extract_strided_slice %126 {offsets = [0, 49], sizes = [6, 393], strides = [1, 1]} : vector<6x478xbf16> to vector<6x393xbf16>
    %145 = vector.extract_strided_slice %126 {offsets = [0, 50], sizes = [6, 393], strides = [1, 1]} : vector<6x478xbf16> to vector<6x393xbf16>
    %146 = vector.extract_strided_slice %126 {offsets = [0, 51], sizes = [6, 393], strides = [1, 1]} : vector<6x478xbf16> to vector<6x393xbf16>
    %147 = vector.extract_strided_slice %126 {offsets = [0, 52], sizes = [6, 393], strides = [1, 1]} : vector<6x478xbf16> to vector<6x393xbf16>
    %148 = vector.extract_strided_slice %126 {offsets = [0, 64], sizes = [6, 393], strides = [1, 1]} : vector<6x478xbf16> to vector<6x393xbf16>
    %149 = vector.extract_strided_slice %126 {offsets = [0, 65], sizes = [6, 393], strides = [1, 1]} : vector<6x478xbf16> to vector<6x393xbf16>
    %150 = vector.extract_strided_slice %126 {offsets = [0, 66], sizes = [6, 393], strides = [1, 1]} : vector<6x478xbf16> to vector<6x393xbf16>
    %151 = vector.extract_strided_slice %126 {offsets = [0, 67], sizes = [6, 393], strides = [1, 1]} : vector<6x478xbf16> to vector<6x393xbf16>
    %152 = vector.extract_strided_slice %126 {offsets = [0, 68], sizes = [6, 393], strides = [1, 1]} : vector<6x478xbf16> to vector<6x393xbf16>
    %153 = tpu.concatenate %128, %129, %130, %131, %132, %133, %134, %135, %136, %137, %138, %139, %140, %141, %142, %143 in 0 : vector<6x393xbf16>, vector<6x393xbf16>, vector<6x393xbf16>, vector<6x393xbf16>, vector<6x393xbf16>, vector<6x393xbf16>, vector<6x393xbf16>, vector<6x393xbf16>, vector<6x393xbf16>, vector<6x393xbf16>, vector<6x393xbf16>, vector<6x393xbf16>, vector<6x393xbf16>, vector<6x393xbf16>, vector<6x393xbf16>, vector<6x393xbf16> -> vector<96x393xbf16>
    %154 = tpu.concatenate %144, %145, %146, %147, %148, %149, %150, %151, %152 in 0 : vector<6x393xbf16>, vector<6x393xbf16>, vector<6x393xbf16>, vector<6x393xbf16>, vector<6x393xbf16>, vector<6x393xbf16>, vector<6x393xbf16>, vector<6x393xbf16>, vector<6x393xbf16> -> vector<54x393xbf16>
    %155 = tpu.concatenate %153, %154 in 0 : vector<96x393xbf16>, vector<54x393xbf16> -> vector<150x393xbf16>
    %cst_11 = arith.constant dense<0.000000e+00> : vector<16x393xf32>
    %156 = tpu.matmul %127, %155, %cst_11 {dimension_numbers = #tpu.dot_dimension_numbers<[1], [0], [0], [1], [0, 0, 1, 1], [], []>} : vector<16x150xbf16>, vector<150x393xbf16>, vector<16x393xf32> -> vector<16x393xf32>
    %157 = vector.extract_strided_slice %126 {offsets = [0, 1], sizes = [6, 393], strides = [1, 1]} : vector<6x478xbf16> to vector<6x393xbf16>
    %158 = vector.extract_strided_slice %126 {offsets = [0, 2], sizes = [6, 393], strides = [1, 1]} : vector<6x478xbf16> to vector<6x393xbf16>
    %159 = vector.extract_strided_slice %126 {offsets = [0, 3], sizes = [6, 393], strides = [1, 1]} : vector<6x478xbf16> to vector<6x393xbf16>
    %160 = vector.extract_strided_slice %126 {offsets = [0, 4], sizes = [6, 393], strides = [1, 1]} : vector<6x478xbf16> to vector<6x393xbf16>
    %161 = vector.extract_strided_slice %126 {offsets = [0, 5], sizes = [6, 393], strides = [1, 1]} : vector<6x478xbf16> to vector<6x393xbf16>
    %162 = vector.extract_strided_slice %126 {offsets = [0, 17], sizes = [6, 393], strides = [1, 1]} : vector<6x478xbf16> to vector<6x393xbf16>
    %163 = vector.extract_strided_slice %126 {offsets = [0, 18], sizes = [6, 393], strides = [1, 1]} : vector<6x478xbf16> to vector<6x393xbf16>
    %164 = vector.extract_strided_slice %126 {offsets = [0, 19], sizes = [6, 393], strides = [1, 1]} : vector<6x478xbf16> to vector<6x393xbf16>
    %165 = vector.extract_strided_slice %126 {offsets = [0, 20], sizes = [6, 393], strides = [1, 1]} : vector<6x478xbf16> to vector<6x393xbf16>
    %166 = vector.extract_strided_slice %126 {offsets = [0, 21], sizes = [6, 393], strides = [1, 1]} : vector<6x478xbf16> to vector<6x393xbf16>
    %167 = vector.extract_strided_slice %126 {offsets = [0, 33], sizes = [6, 393], strides = [1, 1]} : vector<6x478xbf16> to vector<6x393xbf16>
    %168 = vector.extract_strided_slice %126 {offsets = [0, 34], sizes = [6, 393], strides = [1, 1]} : vector<6x478xbf16> to vector<6x393xbf16>
    %169 = vector.extract_strided_slice %126 {offsets = [0, 35], sizes = [6, 393], strides = [1, 1]} : vector<6x478xbf16> to vector<6x393xbf16>
    %170 = vector.extract_strided_slice %126 {offsets = [0, 36], sizes = [6, 393], strides = [1, 1]} : vector<6x478xbf16> to vector<6x393xbf16>
    %171 = vector.extract_strided_slice %126 {offsets = [0, 37], sizes = [6, 393], strides = [1, 1]} : vector<6x478xbf16> to vector<6x393xbf16>
    %172 = vector.extract_strided_slice %126 {offsets = [0, 49], sizes = [6, 393], strides = [1, 1]} : vector<6x478xbf16> to vector<6x393xbf16>
    %173 = vector.extract_strided_slice %126 {offsets = [0, 50], sizes = [6, 393], strides = [1, 1]} : vector<6x478xbf16> to vector<6x393xbf16>
    %174 = vector.extract_strided_slice %126 {offsets = [0, 51], sizes = [6, 393], strides = [1, 1]} : vector<6x478xbf16> to vector<6x393xbf16>
    %175 = vector.extract_strided_slice %126 {offsets = [0, 52], sizes = [6, 393], strides = [1, 1]} : vector<6x478xbf16> to vector<6x393xbf16>
    %176 = vector.extract_strided_slice %126 {offsets = [0, 53], sizes = [6, 393], strides = [1, 1]} : vector<6x478xbf16> to vector<6x393xbf16>
    %177 = vector.extract_strided_slice %126 {offsets = [0, 65], sizes = [6, 393], strides = [1, 1]} : vector<6x478xbf16> to vector<6x393xbf16>
    %178 = vector.extract_strided_slice %126 {offsets = [0, 66], sizes = [6, 393], strides = [1, 1]} : vector<6x478xbf16> to vector<6x393xbf16>
    %179 = vector.extract_strided_slice %126 {offsets = [0, 67], sizes = [6, 393], strides = [1, 1]} : vector<6x478xbf16> to vector<6x393xbf16>
    %180 = vector.extract_strided_slice %126 {offsets = [0, 68], sizes = [6, 393], strides = [1, 1]} : vector<6x478xbf16> to vector<6x393xbf16>
    %181 = vector.extract_strided_slice %126 {offsets = [0, 69], sizes = [6, 393], strides = [1, 1]} : vector<6x478xbf16> to vector<6x393xbf16>
    %182 = tpu.concatenate %157, %158, %159, %160, %161, %162, %163, %164, %165, %166, %167, %168, %169, %170, %171, %172 in 0 : vector<6x393xbf16>, vector<6x393xbf16>, vector<6x393xbf16>, vector<6x393xbf16>, vector<6x393xbf16>, vector<6x393xbf16>, vector<6x393xbf16>, vector<6x393xbf16>, vector<6x393xbf16>, vector<6x393xbf16>, vector<6x393xbf16>, vector<6x393xbf16>, vector<6x393xbf16>, vector<6x393xbf16>, vector<6x393xbf16>, vector<6x393xbf16> -> vector<96x393xbf16>
    %183 = tpu.concatenate %173, %174, %175, %176, %177, %178, %179, %180, %181 in 0 : vector<6x393xbf16>, vector<6x393xbf16>, vector<6x393xbf16>, vector<6x393xbf16>, vector<6x393xbf16>, vector<6x393xbf16>, vector<6x393xbf16>, vector<6x393xbf16>, vector<6x393xbf16> -> vector<54x393xbf16>
    %184 = tpu.concatenate %182, %183 in 0 : vector<96x393xbf16>, vector<54x393xbf16> -> vector<150x393xbf16>
    %cst_12 = arith.constant dense<0.000000e+00> : vector<16x393xf32>
    %185 = tpu.matmul %127, %184, %cst_12 {dimension_numbers = #tpu.dot_dimension_numbers<[1], [0], [0], [1], [0, 0, 1, 1], [], []>} : vector<16x150xbf16>, vector<150x393xbf16>, vector<16x393xf32> -> vector<16x393xf32>
    %186 = arith.maximumf %156, %185 : vector<16x393xf32>
    %187 = vector.extract_strided_slice %126 {offsets = [0, 16], sizes = [6, 393], strides = [1, 1]} : vector<6x478xbf16> to vector<6x393xbf16>
    %188 = vector.extract_strided_slice %126 {offsets = [0, 17], sizes = [6, 393], strides = [1, 1]} : vector<6x478xbf16> to vector<6x393xbf16>
    %189 = vector.extract_strided_slice %126 {offsets = [0, 18], sizes = [6, 393], strides = [1, 1]} : vector<6x478xbf16> to vector<6x393xbf16>
    %190 = vector.extract_strided_slice %126 {offsets = [0, 19], sizes = [6, 393], strides = [1, 1]} : vector<6x478xbf16> to vector<6x393xbf16>
    %191 = vector.extract_strided_slice %126 {offsets = [0, 20], sizes = [6, 393], strides = [1, 1]} : vector<6x478xbf16> to vector<6x393xbf16>
    %192 = vector.extract_strided_slice %126 {offsets = [0, 32], sizes = [6, 393], strides = [1, 1]} : vector<6x478xbf16> to vector<6x393xbf16>
    %193 = vector.extract_strided_slice %126 {offsets = [0, 33], sizes = [6, 393], strides = [1, 1]} : vector<6x478xbf16> to vector<6x393xbf16>
    %194 = vector.extract_strided_slice %126 {offsets = [0, 34], sizes = [6, 393], strides = [1, 1]} : vector<6x478xbf16> to vector<6x393xbf16>
    %195 = vector.extract_strided_slice %126 {offsets = [0, 35], sizes = [6, 393], strides = [1, 1]} : vector<6x478xbf16> to vector<6x393xbf16>
    %196 = vector.extract_strided_slice %126 {offsets = [0, 36], sizes = [6, 393], strides = [1, 1]} : vector<6x478xbf16> to vector<6x393xbf16>
    %197 = vector.extract_strided_slice %126 {offsets = [0, 48], sizes = [6, 393], strides = [1, 1]} : vector<6x478xbf16> to vector<6x393xbf16>
    %198 = vector.extract_strided_slice %126 {offsets = [0, 49], sizes = [6, 393], strides = [1, 1]} : vector<6x478xbf16> to vector<6x393xbf16>
    %199 = vector.extract_strided_slice %126 {offsets = [0, 50], sizes = [6, 393], strides = [1, 1]} : vector<6x478xbf16> to vector<6x393xbf16>
    %200 = vector.extract_strided_slice %126 {offsets = [0, 51], sizes = [6, 393], strides = [1, 1]} : vector<6x478xbf16> to vector<6x393xbf16>
    %201 = vector.extract_strided_slice %126 {offsets = [0, 52], sizes = [6, 393], strides = [1, 1]} : vector<6x478xbf16> to vector<6x393xbf16>
    %202 = vector.extract_strided_slice %126 {offsets = [0, 64], sizes = [6, 393], strides = [1, 1]} : vector<6x478xbf16> to vector<6x393xbf16>
    %203 = vector.extract_strided_slice %126 {offsets = [0, 65], sizes = [6, 393], strides = [1, 1]} : vector<6x478xbf16> to vector<6x393xbf16>
    %204 = vector.extract_strided_slice %126 {offsets = [0, 66], sizes = [6, 393], strides = [1, 1]} : vector<6x478xbf16> to vector<6x393xbf16>
    %205 = vector.extract_strided_slice %126 {offsets = [0, 67], sizes = [6, 393], strides = [1, 1]} : vector<6x478xbf16> to vector<6x393xbf16>
    %206 = vector.extract_strided_slice %126 {offsets = [0, 68], sizes = [6, 393], strides = [1, 1]} : vector<6x478xbf16> to vector<6x393xbf16>
    %207 = vector.extract_strided_slice %126 {offsets = [0, 80], sizes = [6, 393], strides = [1, 1]} : vector<6x478xbf16> to vector<6x393xbf16>
    %208 = vector.extract_strided_slice %126 {offsets = [0, 81], sizes = [6, 393], strides = [1, 1]} : vector<6x478xbf16> to vector<6x393xbf16>
    %209 = vector.extract_strided_slice %126 {offsets = [0, 82], sizes = [6, 393], strides = [1, 1]} : vector<6x478xbf16> to vector<6x393xbf16>
    %210 = vector.extract_strided_slice %126 {offsets = [0, 83], sizes = [6, 393], strides = [1, 1]} : vector<6x478xbf16> to vector<6x393xbf16>
    %211 = vector.extract_strided_slice %126 {offsets = [0, 84], sizes = [6, 393], strides = [1, 1]} : vector<6x478xbf16> to vector<6x393xbf16>
    %212 = tpu.concatenate %187, %188, %189, %190, %191, %192, %193, %194, %195, %196, %197, %198, %199, %200, %201, %202 in 0 : vector<6x393xbf16>, vector<6x393xbf16>, vector<6x393xbf16>, vector<6x393xbf16>, vector<6x393xbf16>, vector<6x393xbf16>, vector<6x393xbf16>, vector<6x393xbf16>, vector<6x393xbf16>, vector<6x393xbf16>, vector<6x393xbf16>, vector<6x393xbf16>, vector<6x393xbf16>, vector<6x393xbf16>, vector<6x393xbf16>, vector<6x393xbf16> -> vector<96x393xbf16>
    %213 = tpu.concatenate %203, %204, %205, %206, %207, %208, %209, %210, %211 in 0 : vector<6x393xbf16>, vector<6x393xbf16>, vector<6x393xbf16>, vector<6x393xbf16>, vector<6x393xbf16>, vector<6x393xbf16>, vector<6x393xbf16>, vector<6x393xbf16>, vector<6x393xbf16> -> vector<54x393xbf16>
    %214 = tpu.concatenate %212, %213 in 0 : vector<96x393xbf16>, vector<54x393xbf16> -> vector<150x393xbf16>
    %cst_13 = arith.constant dense<0.000000e+00> : vector<16x393xf32>
    %215 = tpu.matmul %127, %214, %cst_13 {dimension_numbers = #tpu.dot_dimension_numbers<[1], [0], [0], [1], [0, 0, 1, 1], [], []>} : vector<16x150xbf16>, vector<150x393xbf16>, vector<16x393xf32> -> vector<16x393xf32>
    %216 = arith.maximumf %186, %215 : vector<16x393xf32>
    %217 = vector.extract_strided_slice %126 {offsets = [0, 17], sizes = [6, 393], strides = [1, 1]} : vector<6x478xbf16> to vector<6x393xbf16>
    %218 = vector.extract_strided_slice %126 {offsets = [0, 18], sizes = [6, 393], strides = [1, 1]} : vector<6x478xbf16> to vector<6x393xbf16>
    %219 = vector.extract_strided_slice %126 {offsets = [0, 19], sizes = [6, 393], strides = [1, 1]} : vector<6x478xbf16> to vector<6x393xbf16>
    %220 = vector.extract_strided_slice %126 {offsets = [0, 20], sizes = [6, 393], strides = [1, 1]} : vector<6x478xbf16> to vector<6x393xbf16>
    %221 = vector.extract_strided_slice %126 {offsets = [0, 21], sizes = [6, 393], strides = [1, 1]} : vector<6x478xbf16> to vector<6x393xbf16>
    %222 = vector.extract_strided_slice %126 {offsets = [0, 33], sizes = [6, 393], strides = [1, 1]} : vector<6x478xbf16> to vector<6x393xbf16>
    %223 = vector.extract_strided_slice %126 {offsets = [0, 34], sizes = [6, 393], strides = [1, 1]} : vector<6x478xbf16> to vector<6x393xbf16>
    %224 = vector.extract_strided_slice %126 {offsets = [0, 35], sizes = [6, 393], strides = [1, 1]} : vector<6x478xbf16> to vector<6x393xbf16>
    %225 = vector.extract_strided_slice %126 {offsets = [0, 36], sizes = [6, 393], strides = [1, 1]} : vector<6x478xbf16> to vector<6x393xbf16>
    %226 = vector.extract_strided_slice %126 {offsets = [0, 37], sizes = [6, 393], strides = [1, 1]} : vector<6x478xbf16> to vector<6x393xbf16>
    %227 = vector.extract_strided_slice %126 {offsets = [0, 49], sizes = [6, 393], strides = [1, 1]} : vector<6x478xbf16> to vector<6x393xbf16>
    %228 = vector.extract_strided_slice %126 {offsets = [0, 50], sizes = [6, 393], strides = [1, 1]} : vector<6x478xbf16> to vector<6x393xbf16>
    %229 = vector.extract_strided_slice %126 {offsets = [0, 51], sizes = [6, 393], strides = [1, 1]} : vector<6x478xbf16> to vector<6x393xbf16>
    %230 = vector.extract_strided_slice %126 {offsets = [0, 52], sizes = [6, 393], strides = [1, 1]} : vector<6x478xbf16> to vector<6x393xbf16>
    %231 = vector.extract_strided_slice %126 {offsets = [0, 53], sizes = [6, 393], strides = [1, 1]} : vector<6x478xbf16> to vector<6x393xbf16>
    %232 = vector.extract_strided_slice %126 {offsets = [0, 65], sizes = [6, 393], strides = [1, 1]} : vector<6x478xbf16> to vector<6x393xbf16>
    %233 = vector.extract_strided_slice %126 {offsets = [0, 66], sizes = [6, 393], strides = [1, 1]} : vector<6x478xbf16> to vector<6x393xbf16>
    %234 = vector.extract_strided_slice %126 {offsets = [0, 67], sizes = [6, 393], strides = [1, 1]} : vector<6x478xbf16> to vector<6x393xbf16>
    %235 = vector.extract_strided_slice %126 {offsets = [0, 68], sizes = [6, 393], strides = [1, 1]} : vector<6x478xbf16> to vector<6x393xbf16>
    %236 = vector.extract_strided_slice %126 {offsets = [0, 69], sizes = [6, 393], strides = [1, 1]} : vector<6x478xbf16> to vector<6x393xbf16>
    %237 = vector.extract_strided_slice %126 {offsets = [0, 81], sizes = [6, 393], strides = [1, 1]} : vector<6x478xbf16> to vector<6x393xbf16>
    %238 = vector.extract_strided_slice %126 {offsets = [0, 82], sizes = [6, 393], strides = [1, 1]} : vector<6x478xbf16> to vector<6x393xbf16>
    %239 = vector.extract_strided_slice %126 {offsets = [0, 83], sizes = [6, 393], strides = [1, 1]} : vector<6x478xbf16> to vector<6x393xbf16>
    %240 = vector.extract_strided_slice %126 {offsets = [0, 84], sizes = [6, 393], strides = [1, 1]} : vector<6x478xbf16> to vector<6x393xbf16>
    %241 = vector.extract_strided_slice %126 {offsets = [0, 85], sizes = [6, 393], strides = [1, 1]} : vector<6x478xbf16> to vector<6x393xbf16>
    %242 = tpu.concatenate %217, %218, %219, %220, %221, %222, %223, %224, %225, %226, %227, %228, %229, %230, %231, %232 in 0 : vector<6x393xbf16>, vector<6x393xbf16>, vector<6x393xbf16>, vector<6x393xbf16>, vector<6x393xbf16>, vector<6x393xbf16>, vector<6x393xbf16>, vector<6x393xbf16>, vector<6x393xbf16>, vector<6x393xbf16>, vector<6x393xbf16>, vector<6x393xbf16>, vector<6x393xbf16>, vector<6x393xbf16>, vector<6x393xbf16>, vector<6x393xbf16> -> vector<96x393xbf16>
    %243 = tpu.concatenate %233, %234, %235, %236, %237, %238, %239, %240, %241 in 0 : vector<6x393xbf16>, vector<6x393xbf16>, vector<6x393xbf16>, vector<6x393xbf16>, vector<6x393xbf16>, vector<6x393xbf16>, vector<6x393xbf16>, vector<6x393xbf16>, vector<6x393xbf16> -> vector<54x393xbf16>
    %244 = tpu.concatenate %242, %243 in 0 : vector<96x393xbf16>, vector<54x393xbf16> -> vector<150x393xbf16>
    %cst_14 = arith.constant dense<0.000000e+00> : vector<16x393xf32>
    %245 = tpu.matmul %127, %244, %cst_14 {dimension_numbers = #tpu.dot_dimension_numbers<[1], [0], [0], [1], [0, 0, 1, 1], [], []>} : vector<16x150xbf16>, vector<150x393xbf16>, vector<16x393xf32> -> vector<16x393xf32>
    %246 = arith.maximumf %216, %245 : vector<16x393xf32>
    %c0_15 = arith.constant 0 : index
    %c0_16 = arith.constant 0 : index
    %247 = vector.load %arg4[%c0_15, %c0_16] : memref<16x1xf32, #tpu.memory_space<vmem>>, vector<16x1xf32>
    %248 = vector.broadcast %247 : vector<16x1xf32> to vector<16x393xf32>
    %249 = arith.addf %246, %248 : vector<16x393xf32>
    %cst_17 = arith.constant 0.000000e+00 : f32
    %250 = vector.broadcast %cst_17 : f32 to vector<16x393xf32>
    %251 = arith.maximumf %249, %250 : vector<16x393xf32>
    %252 = vector.extract_strided_slice %251 {offsets = [0, 0], sizes = [16, 1], strides = [1, 1]} : vector<16x393xf32> to vector<16x1xf32>
    %253 = vector.extract_strided_slice %251 {offsets = [0, 256], sizes = [16, 1], strides = [1, 1]} : vector<16x393xf32> to vector<16x1xf32>
    %254 = tpu.concatenate %252, %253 in 1 : vector<16x1xf32>, vector<16x1xf32> -> vector<16x2xf32>
    %255 = vector.extract_strided_slice %251 {offsets = [0, 2], sizes = [16, 1], strides = [1, 1]} : vector<16x393xf32> to vector<16x1xf32>
    %256 = vector.extract_strided_slice %251 {offsets = [0, 258], sizes = [16, 1], strides = [1, 1]} : vector<16x393xf32> to vector<16x1xf32>
    %257 = tpu.concatenate %255, %256 in 1 : vector<16x1xf32>, vector<16x1xf32> -> vector<16x2xf32>
    %258 = vector.extract_strided_slice %251 {offsets = [0, 4], sizes = [16, 1], strides = [1, 1]} : vector<16x393xf32> to vector<16x1xf32>
    %259 = vector.extract_strided_slice %251 {offsets = [0, 260], sizes = [16, 1], strides = [1, 1]} : vector<16x393xf32> to vector<16x1xf32>
    %260 = tpu.concatenate %258, %259 in 1 : vector<16x1xf32>, vector<16x1xf32> -> vector<16x2xf32>
    %261 = vector.extract_strided_slice %251 {offsets = [0, 6], sizes = [16, 1], strides = [1, 1]} : vector<16x393xf32> to vector<16x1xf32>
    %262 = vector.extract_strided_slice %251 {offsets = [0, 262], sizes = [16, 1], strides = [1, 1]} : vector<16x393xf32> to vector<16x1xf32>
    %263 = tpu.concatenate %261, %262 in 1 : vector<16x1xf32>, vector<16x1xf32> -> vector<16x2xf32>
    %264 = vector.extract_strided_slice %251 {offsets = [0, 8], sizes = [16, 1], strides = [1, 1]} : vector<16x393xf32> to vector<16x1xf32>
    %265 = vector.extract_strided_slice %251 {offsets = [0, 264], sizes = [16, 1], strides = [1, 1]} : vector<16x393xf32> to vector<16x1xf32>
    %266 = tpu.concatenate %264, %265 in 1 : vector<16x1xf32>, vector<16x1xf32> -> vector<16x2xf32>
    %267 = vector.extract_strided_slice %251 {offsets = [0, 32], sizes = [16, 1], strides = [1, 1]} : vector<16x393xf32> to vector<16x1xf32>
    %268 = vector.extract_strided_slice %251 {offsets = [0, 288], sizes = [16, 1], strides = [1, 1]} : vector<16x393xf32> to vector<16x1xf32>
    %269 = tpu.concatenate %267, %268 in 1 : vector<16x1xf32>, vector<16x1xf32> -> vector<16x2xf32>
    %270 = vector.extract_strided_slice %251 {offsets = [0, 34], sizes = [16, 1], strides = [1, 1]} : vector<16x393xf32> to vector<16x1xf32>
    %271 = vector.extract_strided_slice %251 {offsets = [0, 290], sizes = [16, 1], strides = [1, 1]} : vector<16x393xf32> to vector<16x1xf32>
    %272 = tpu.concatenate %270, %271 in 1 : vector<16x1xf32>, vector<16x1xf32> -> vector<16x2xf32>
    %273 = vector.extract_strided_slice %251 {offsets = [0, 36], sizes = [16, 1], strides = [1, 1]} : vector<16x393xf32> to vector<16x1xf32>
    %274 = vector.extract_strided_slice %251 {offsets = [0, 292], sizes = [16, 1], strides = [1, 1]} : vector<16x393xf32> to vector<16x1xf32>
    %275 = tpu.concatenate %273, %274 in 1 : vector<16x1xf32>, vector<16x1xf32> -> vector<16x2xf32>
    %276 = vector.extract_strided_slice %251 {offsets = [0, 38], sizes = [16, 1], strides = [1, 1]} : vector<16x393xf32> to vector<16x1xf32>
    %277 = vector.extract_strided_slice %251 {offsets = [0, 294], sizes = [16, 1], strides = [1, 1]} : vector<16x393xf32> to vector<16x1xf32>
    %278 = tpu.concatenate %276, %277 in 1 : vector<16x1xf32>, vector<16x1xf32> -> vector<16x2xf32>
    %279 = vector.extract_strided_slice %251 {offsets = [0, 40], sizes = [16, 1], strides = [1, 1]} : vector<16x393xf32> to vector<16x1xf32>
    %280 = vector.extract_strided_slice %251 {offsets = [0, 296], sizes = [16, 1], strides = [1, 1]} : vector<16x393xf32> to vector<16x1xf32>
    %281 = tpu.concatenate %279, %280 in 1 : vector<16x1xf32>, vector<16x1xf32> -> vector<16x2xf32>
    %282 = vector.extract_strided_slice %251 {offsets = [0, 64], sizes = [16, 1], strides = [1, 1]} : vector<16x393xf32> to vector<16x1xf32>
    %283 = vector.extract_strided_slice %251 {offsets = [0, 320], sizes = [16, 1], strides = [1, 1]} : vector<16x393xf32> to vector<16x1xf32>
    %284 = tpu.concatenate %282, %283 in 1 : vector<16x1xf32>, vector<16x1xf32> -> vector<16x2xf32>
    %285 = vector.extract_strided_slice %251 {offsets = [0, 66], sizes = [16, 1], strides = [1, 1]} : vector<16x393xf32> to vector<16x1xf32>
    %286 = vector.extract_strided_slice %251 {offsets = [0, 322], sizes = [16, 1], strides = [1, 1]} : vector<16x393xf32> to vector<16x1xf32>
    %287 = tpu.concatenate %285, %286 in 1 : vector<16x1xf32>, vector<16x1xf32> -> vector<16x2xf32>
    %288 = vector.extract_strided_slice %251 {offsets = [0, 68], sizes = [16, 1], strides = [1, 1]} : vector<16x393xf32> to vector<16x1xf32>
    %289 = vector.extract_strided_slice %251 {offsets = [0, 324], sizes = [16, 1], strides = [1, 1]} : vector<16x393xf32> to vector<16x1xf32>
    %290 = tpu.concatenate %288, %289 in 1 : vector<16x1xf32>, vector<16x1xf32> -> vector<16x2xf32>
    %291 = vector.extract_strided_slice %251 {offsets = [0, 70], sizes = [16, 1], strides = [1, 1]} : vector<16x393xf32> to vector<16x1xf32>
    %292 = vector.extract_strided_slice %251 {offsets = [0, 326], sizes = [16, 1], strides = [1, 1]} : vector<16x393xf32> to vector<16x1xf32>
    %293 = tpu.concatenate %291, %292 in 1 : vector<16x1xf32>, vector<16x1xf32> -> vector<16x2xf32>
    %294 = vector.extract_strided_slice %251 {offsets = [0, 72], sizes = [16, 1], strides = [1, 1]} : vector<16x393xf32> to vector<16x1xf32>
    %295 = vector.extract_strided_slice %251 {offsets = [0, 328], sizes = [16, 1], strides = [1, 1]} : vector<16x393xf32> to vector<16x1xf32>
    %296 = tpu.concatenate %294, %295 in 1 : vector<16x1xf32>, vector<16x1xf32> -> vector<16x2xf32>
    %297 = vector.extract_strided_slice %251 {offsets = [0, 96], sizes = [16, 1], strides = [1, 1]} : vector<16x393xf32> to vector<16x1xf32>
    %298 = vector.extract_strided_slice %251 {offsets = [0, 352], sizes = [16, 1], strides = [1, 1]} : vector<16x393xf32> to vector<16x1xf32>
    %299 = tpu.concatenate %297, %298 in 1 : vector<16x1xf32>, vector<16x1xf32> -> vector<16x2xf32>
    %300 = vector.extract_strided_slice %251 {offsets = [0, 98], sizes = [16, 1], strides = [1, 1]} : vector<16x393xf32> to vector<16x1xf32>
    %301 = vector.extract_strided_slice %251 {offsets = [0, 354], sizes = [16, 1], strides = [1, 1]} : vector<16x393xf32> to vector<16x1xf32>
    %302 = tpu.concatenate %300, %301 in 1 : vector<16x1xf32>, vector<16x1xf32> -> vector<16x2xf32>
    %303 = vector.extract_strided_slice %251 {offsets = [0, 100], sizes = [16, 1], strides = [1, 1]} : vector<16x393xf32> to vector<16x1xf32>
    %304 = vector.extract_strided_slice %251 {offsets = [0, 356], sizes = [16, 1], strides = [1, 1]} : vector<16x393xf32> to vector<16x1xf32>
    %305 = tpu.concatenate %303, %304 in 1 : vector<16x1xf32>, vector<16x1xf32> -> vector<16x2xf32>
    %306 = vector.extract_strided_slice %251 {offsets = [0, 102], sizes = [16, 1], strides = [1, 1]} : vector<16x393xf32> to vector<16x1xf32>
    %307 = vector.extract_strided_slice %251 {offsets = [0, 358], sizes = [16, 1], strides = [1, 1]} : vector<16x393xf32> to vector<16x1xf32>
    %308 = tpu.concatenate %306, %307 in 1 : vector<16x1xf32>, vector<16x1xf32> -> vector<16x2xf32>
    %309 = vector.extract_strided_slice %251 {offsets = [0, 104], sizes = [16, 1], strides = [1, 1]} : vector<16x393xf32> to vector<16x1xf32>
    %310 = vector.extract_strided_slice %251 {offsets = [0, 360], sizes = [16, 1], strides = [1, 1]} : vector<16x393xf32> to vector<16x1xf32>
    %311 = tpu.concatenate %309, %310 in 1 : vector<16x1xf32>, vector<16x1xf32> -> vector<16x2xf32>
    %312 = vector.extract_strided_slice %251 {offsets = [0, 128], sizes = [16, 1], strides = [1, 1]} : vector<16x393xf32> to vector<16x1xf32>
    %313 = vector.extract_strided_slice %251 {offsets = [0, 384], sizes = [16, 1], strides = [1, 1]} : vector<16x393xf32> to vector<16x1xf32>
    %314 = tpu.concatenate %312, %313 in 1 : vector<16x1xf32>, vector<16x1xf32> -> vector<16x2xf32>
    %315 = vector.extract_strided_slice %251 {offsets = [0, 130], sizes = [16, 1], strides = [1, 1]} : vector<16x393xf32> to vector<16x1xf32>
    %316 = vector.extract_strided_slice %251 {offsets = [0, 386], sizes = [16, 1], strides = [1, 1]} : vector<16x393xf32> to vector<16x1xf32>
    %317 = tpu.concatenate %315, %316 in 1 : vector<16x1xf32>, vector<16x1xf32> -> vector<16x2xf32>
    %318 = vector.extract_strided_slice %251 {offsets = [0, 132], sizes = [16, 1], strides = [1, 1]} : vector<16x393xf32> to vector<16x1xf32>
    %319 = vector.extract_strided_slice %251 {offsets = [0, 388], sizes = [16, 1], strides = [1, 1]} : vector<16x393xf32> to vector<16x1xf32>
    %320 = tpu.concatenate %318, %319 in 1 : vector<16x1xf32>, vector<16x1xf32> -> vector<16x2xf32>
    %321 = vector.extract_strided_slice %251 {offsets = [0, 134], sizes = [16, 1], strides = [1, 1]} : vector<16x393xf32> to vector<16x1xf32>
    %322 = vector.extract_strided_slice %251 {offsets = [0, 390], sizes = [16, 1], strides = [1, 1]} : vector<16x393xf32> to vector<16x1xf32>
    %323 = tpu.concatenate %321, %322 in 1 : vector<16x1xf32>, vector<16x1xf32> -> vector<16x2xf32>
    %324 = vector.extract_strided_slice %251 {offsets = [0, 136], sizes = [16, 1], strides = [1, 1]} : vector<16x393xf32> to vector<16x1xf32>
    %325 = vector.extract_strided_slice %251 {offsets = [0, 392], sizes = [16, 1], strides = [1, 1]} : vector<16x393xf32> to vector<16x1xf32>
    %326 = tpu.concatenate %324, %325 in 1 : vector<16x1xf32>, vector<16x1xf32> -> vector<16x2xf32>
    %327 = tpu.concatenate %254, %257, %260, %263, %266, %269, %272, %275, %278, %281, %284, %287, %290, %293, %296, %299 in 0 : vector<16x2xf32>, vector<16x2xf32>, vector<16x2xf32>, vector<16x2xf32>, vector<16x2xf32>, vector<16x2xf32>, vector<16x2xf32>, vector<16x2xf32>, vector<16x2xf32>, vector<16x2xf32>, vector<16x2xf32>, vector<16x2xf32>, vector<16x2xf32>, vector<16x2xf32>, vector<16x2xf32>, vector<16x2xf32> -> vector<256x2xf32>
    %328 = tpu.concatenate %302, %305, %308, %311, %314, %317, %320, %323, %326 in 0 : vector<16x2xf32>, vector<16x2xf32>, vector<16x2xf32>, vector<16x2xf32>, vector<16x2xf32>, vector<16x2xf32>, vector<16x2xf32>, vector<16x2xf32>, vector<16x2xf32> -> vector<144x2xf32>
    %329 = tpu.concatenate %327, %328 in 0 : vector<256x2xf32>, vector<144x2xf32> -> vector<400x2xf32>
    %330 = arith.truncf %329 : vector<400x2xf32> to vector<400x2xbf16>
    %c0_18 = arith.constant 0 : index
    %c0_19 = arith.constant 0 : index
    %331 = vector.load %arg5[%c0_18, %c0_19] : memref<120x400xbf16, #tpu.memory_space<vmem>>, vector<120x400xbf16>
    %cst_20 = arith.constant dense<0.000000e+00> : vector<120x2xf32>
    %332 = tpu.matmul %331, %330, %cst_20 {dimension_numbers = #tpu.dot_dimension_numbers<[1], [0], [0], [1], [0, 0, 1, 1], [], []>} : vector<120x400xbf16>, vector<400x2xbf16>, vector<120x2xf32> -> vector<120x2xf32>
    %c0_21 = arith.constant 0 : index
    %c0_22 = arith.constant 0 : index
    %333 = vector.load %arg6[%c0_21, %c0_22] : memref<120x1xf32, #tpu.memory_space<vmem>>, vector<120x1xf32>
    %334 = vector.broadcast %333 : vector<120x1xf32> to vector<120x2xf32>
    %335 = arith.addf %332, %334 : vector<120x2xf32>
    %cst_23 = arith.constant 0.000000e+00 : f32
    %336 = vector.broadcast %cst_23 : f32 to vector<120x2xf32>
    %337 = arith.maximumf %335, %336 : vector<120x2xf32>
    %338 = arith.truncf %337 : vector<120x2xf32> to vector<120x2xbf16>
    %c0_24 = arith.constant 0 : index
    %c0_25 = arith.constant 0 : index
    %339 = vector.load %arg7[%c0_24, %c0_25] : memref<84x120xbf16, #tpu.memory_space<vmem>>, vector<84x120xbf16>
    %cst_26 = arith.constant dense<0.000000e+00> : vector<84x2xf32>
    %340 = tpu.matmul %339, %338, %cst_26 {dimension_numbers = #tpu.dot_dimension_numbers<[1], [0], [0], [1], [0, 0, 1, 1], [], []>} : vector<84x120xbf16>, vector<120x2xbf16>, vector<84x2xf32> -> vector<84x2xf32>
    %c0_27 = arith.constant 0 : index
    %c0_28 = arith.constant 0 : index
    %341 = vector.load %arg8[%c0_27, %c0_28] : memref<84x1xf32, #tpu.memory_space<vmem>>, vector<84x1xf32>
    %342 = vector.broadcast %341 : vector<84x1xf32> to vector<84x2xf32>
    %343 = arith.addf %340, %342 : vector<84x2xf32>
    %cst_29 = arith.constant 0.000000e+00 : f32
    %344 = vector.broadcast %cst_29 : f32 to vector<84x2xf32>
    %345 = arith.maximumf %343, %344 : vector<84x2xf32>
    %346 = arith.truncf %345 : vector<84x2xf32> to vector<84x2xbf16>
    %c0_30 = arith.constant 0 : index
    %c0_31 = arith.constant 0 : index
    %347 = vector.load %arg9[%c0_30, %c0_31] : memref<10x84xbf16, #tpu.memory_space<vmem>>, vector<10x84xbf16>
    %cst_32 = arith.constant dense<0.000000e+00> : vector<10x2xf32>
    %348 = tpu.matmul %347, %346, %cst_32 {dimension_numbers = #tpu.dot_dimension_numbers<[1], [0], [0], [1], [0, 0, 1, 1], [], []>} : vector<10x84xbf16>, vector<84x2xbf16>, vector<10x2xf32> -> vector<10x2xf32>
    %c0_33 = arith.constant 0 : index
    %c0_34 = arith.constant 0 : index
    %349 = vector.load %arg10[%c0_33, %c0_34] : memref<10x1xf32, #tpu.memory_space<vmem>>, vector<10x1xf32>
    %350 = vector.broadcast %349 : vector<10x1xf32> to vector<10x2xf32>
    %351 = arith.addf %348, %350 : vector<10x2xf32>
    %c0_35 = arith.constant 0 : index
    %c0_36 = arith.constant 0 : index
    %352 = vector.load %arg11[%c0_35, %c0_36] : memref<10x2xf32, #tpu.memory_space<vmem>>, vector<10x2xf32>
    tpu.vector_store %arg11[%c0_35, %c0_36], %351 {strides = array<i32>} : memref<10x2xf32, #tpu.memory_space<vmem>>, vector<10x2xf32>,
    return
  }
}

</mosaic_0001>

<bundles_post_ra>
// kernel: lenet_forward.1
= control target key start
LH: loop header
LB: loop body
LE: loop exit
PB: predicated region body
PF: predicated region fallthrough
CT: control target
= control target key end

     0   :  { %v46_v0 = vlaneseq  ;;  %v5282_v2 = vmov 1983009808   ;;  %s5284_s19 = smov 126   ;;  %s5285_s20 = smov 112   ;;  %vm9292_vm0 = vcmask 1040384   ;;  %vm9288_vm2 = vcmask 1039360   ;;  %s9141_s0 = inlined_call_operand.vmem [shape: bf16[4,512], index: 0, kind: input, shape index: {}]   ;;  %s9142_s1 = inlined_call_operand.vmem [shape: bf16[6,25], index: 1, kind: input, shape index: {}]   ;;  %s9143_s2 = inlined_call_operand.vmem [shape: f32[6,1], index: 2, kind: input, shape index: {}]   ;;  %s9144_s3 = inlined_call_operand.vmem [shape: bf16[16,150], index: 3, kind: input, shape index: {}]   ;;  %s9145_s4 = inlined_call_operand.vmem [shape: f32[16,1], index: 4, kind: input, shape index: {}]   ;;  %s9146_s5 = inlined_call_operand.vmem [shape: bf16[120,400], index: 5, kind: input, shape index: {}]   ;;  %s9147_s6 = inlined_call_operand.vmem [shape: f32[120,1], index: 6, kind: input, shape index: {}]   ;;  %s9148_s8 = inlined_call_operand.vmem [shape: f32[84,1], index: 8, kind: input, shape index: {}]   ;;  %s9149_s10 = inlined_call_operand.vmem [shape: f32[10,1], index: 10, kind: input, shape index: {}]   ;;  %s9150_s7 = inlined_call_operand.vmem [shape: bf16[84,120], index: 7, kind: input, shape index: {}]   ;;  %s9151_s9 = inlined_call_operand.vmem [shape: bf16[10,84], index: 9, kind: input, shape index: {}]   ;;  %s9152_s11 = inlined_call_operand.vmem [shape: f32[10,2], index: 11, kind: output, shape index: {}]  }
   0x1   :  { %v39_v1 = vld [vmem:[%s9141_s0] sm:$0xff]  ;;  %v44_v3 = vunpack.c.l.s4 %v5282_v2  ;;  %s5283_s0 = smov 127   ;;  %s5286_s21 = smov 111   ;;  %vm263_vm1 = vsmask.f32 256  ;;  %vm9282_vm4 = vcmask 1041408  }
   0x2   :  { %v47_v4 = vshrl.u32 %v46_v0, 7  ;;  %v42_v5 = vcombine.high %v39_v1, %v39_v1  ;;  %v83_v26 = vcombine.low %v39_v1, %v39_v1  ;;  %s5287_s22 = smov 110   ;;  %s5288_s23 = smov 113   ;;  %vm5756_vm3 = vmand %vm9292_vm0, %vm263_vm1  ;;  %vm286_vm5 = vsmask.f32 1280 }
   0x3   :  { %v45_v6 = vunpack.c.0.s8 %v44_v3  ;;  %s5289_s24 = smov 1   ;;  %vm9289_vm6 = vcmask 916480   ;;  %vm100_vm7 = vcmask 1031168   ;;  %vm5796_vm8 = vmand %vm9282_vm4, %vm286_vm5  ;;  %vm9297_vm9 = vcmask 1042432   ;;  %s5291_s25 = smov 96  }
   0x4   :  { %vm310_vm10 = vsmask.f32 2304  ;;  %vm9271_vm11 = vcmask 908288   ;;  %vm9296_vm12 = vcmask 1043456   ;;  %vm334_vm13 = vsmask.f32 3328 }
   0x5   :  { %v48_v7 = vsub.s32 %v45_v6, %v47_v4  ;;  %vm5832_vm14 = vmand %vm9297_vm9, %vm310_vm10  ;;  %vm9270_vm15 = vcmask 900096   ;;  %vm9269_vm5 = vcmask 924672   ;;  %vm9295_vm10 = vcmask 1044480   ;;  %s5295_s30 = smov 125   ;;  %s5296_s12 = smov 124  }
   0x6   :  { %vm5885_vm1 = vmand %vm9296_vm12, %vm334_vm13  ;;  %vm358_vm13 = vsmask.f32 4352  ;;  %s5297_s13 = smov 108   ;;  %s5298_s14 = smov 94  }
   0x7   :  { %v5397_v8 = vrot.slane %v39_v1, %v48_v7  ;;  %v5399_v9 = vrot.slane %v42_v5, %v48_v7  ;;  %v5463_v29 = vrot.slane %v83_v26, %v48_v7  ;;  %s5299_s15 = smov 93   ;;  %s5300_s16 = smov 92  }
   0x8   :  { %s5301_s17 = smov 80   ;;  %s5302_s18 = smov 79  }
   0x9   :  { %9316 = vst [vmem:[#allocation2_spill] sm:$0xff] %v5399_v9  ;;  %v5402_v10 = vshrl.u32 %v5399_v9, 16  ;;  %v5406_v11 = vcombine.high %v5399_v9, %v5399_v9  ;;  %v5410_v12 = vcombine.high %v5397_v8, %v5397_v8  ;;  %v5413_v13 = vshll.u32 %v5399_v9, 16  ;;  %9320 = vst [vmem:[#allocation6_spill] sm:$0xff] %v5463_v29  ;;  %s5311_s26 = smov 33   ;;  %s5313_s27 = smov 30  }
   0xa   :  { %v5421_v15 = vshrl.u32 %v5397_v8, 16  ;;  %v5427_v17 = vshll.u32 %v5397_v8, 16  ;;  %v5474_v34 = vcombine.high %v5463_v29, %v5463_v29  ;;  %v506_v43 = vrot.slane %v5399_v9, 5  ;;  %s5316_s28 = smov 123   ;;  %s5317_s29 = smov 25  }
   0xb   :  { %9317 = vst [vmem:[#allocation3_spill] sm:$0xff] %v5410_v12  ;;  %467 = vrot.lane.b32.xlu1 %v5402_v10, %s5283_s0  ;;  %v5418_v14 = vshrl.u32 %v5406_v11, 16  ;;  %v5424_v16 = vshll.u32 %v5410_v12, 16  ;;  %v446_v20 = vrot.slane %v5413_v13, 1  ;;  %v5438_v21 = vshll.u32 %v5406_v11, 16 }
   0xc   :  { %v5443_v22 = vshrl.u32 %v5410_v12, 16  ;;  %v9158_v24 = vrot.slane %v5427_v17, 1  ;;  %v136_v30 = vrot.slane %v5427_v17, 6  ;;  %v138_v33 = vrot.slane %v5413_v13, 6 }
   0xd   :  { %469 = vrot.lane.b32.xlu0 %v5418_v14, %s5283_s0  ;;  %v5433_v18 = vpack.i.bf16 %v5413_v13, %v5424_v16  ;;  %v445_v19 = vrot.slane %v5424_v16, 1  ;;  %9318 = vst [vmem:[#allocation4_spill] sm:$0xff] %v5438_v21  ;;  %v9157_v25 = vrot.slane %v5438_v21, 1  ;;  %v5455_v27 = vpack.i.bf16 %v5427_v17, %v5438_v21 }
   0xe   :  { %v139_v31 = vrot.slane %v5438_v21, 6  ;;  %v137_v32 = vrot.slane %v5424_v16, 6  ;;  %v170_v37 = vrot.slane %v5427_v17, 5  ;;  %v173_v38 = vrot.slane %v5438_v21, 5 }
   0xf   :  { %463 = vrot.lane.b32.xlu1 %v5421_v15, %s5283_s0  ;;  %v5447_v23 = vpack.i.bf16 %v446_v20, %v445_v19  ;;  %v4847_v28 = vpack.i.bf16 %v9158_v24, %v9157_v25  ;;  %v171_v39 = vrot.slane %v5424_v16, 5  ;;  %v172_v40 = vrot.slane %v5413_v13, 5 }
  0x10   :  { %v5476_v35 = vpack.i.bf16 %v136_v30, %v139_v31  ;;  %v5478_v36 = vpack.i.bf16 %v138_v33, %v137_v32  ;;  %v5488_v42 = vpack.i.bf16 %v173_v38, %v170_v37  ;;  %v505_v44 = vrot.slane %v5410_v12, 5 }
  0x11   :  { %4833 = vrot.lane.b32.xlu0 %v5433_v18, %s5284_s19  ;;  %9319 = vst [vmem:[#allocation5_spill] sm:$0xff] %v5447_v23  ;;  %v5486_v41 = vpack.i.bf16 %v172_v40, %v171_v39  ;;  %v504_v45 = vrot.slane %v5397_v8, 5  ;;  %v507_v46 = vrot.slane %v5406_v11, 5  ;;  %v5511_v47 = vcombine.low %v5399_v9, %v5399_v9 }
  0x12   :  { %v5520_v48 = vcombine.low %v5397_v8, %v5397_v8  ;;  %v5535_v49 = vrot.slane %v5402_v10, 6  ;;  %v5540_v50 = vrot.slane %v5443_v22, 6  ;;  %v5545_v51 = vrot.slane %v5421_v15, 6 }
  0x13   :  { %465 = vrot.lane.b32.xlu1 %v5443_v22, %s5283_s0  ;;  %9321 = vst [vmem:[#allocation7_spill] sm:$0xff] %v5511_v47  ;;  %v5550_v52 = vrot.slane %v5418_v14, 6  ;;  %v157_v53 = vrot.slane %v5402_v10, 5  ;;  %v156_v54 = vrot.slane %v5443_v22, 5  ;;  %v155_v55 = vrot.slane %v5421_v15, 5 }
  0x14   :  { %9322 = vst [vmem:[#allocation8_spill] sm:$0xff] %v5520_v48  ;;  %9323 = vst [vmem:[#allocation9_spill] sm:$0xff] %v5535_v49  ;;  %v158_v56 = vrot.slane %v5418_v14, 5  ;;  %v4867_v57 = vpack.i.bf16 %v170_v37, %v173_v38  ;;  %v9156_v58 = vrot.slane %v5402_v10, 4  ;;  %v9155_v59 = vrot.slane %v5443_v22, 4 }
  0x15   :  { %4843 = vrot.lane.b32.xlu0 %v5447_v23, %s5283_s0  ;;  %9324 = vst [vmem:[#allocation10_spill] sm:$0xff] %v5545_v51  ;;  %9325 = vst [vmem:[#allocation11_spill] sm:$0xff] %v5550_v52  ;;  %v9154_v60 = vrot.slane %v5418_v14, 4  ;;  %v9153_v61 = vrot.slane %v5421_v15, 4  ;;  %v5598_v62 = vrot.slane %v5402_v10, 7  ;;  %v5603_v63 = vrot.slane %v5443_v22, 7 }
  0x16   :  { %v5608_v0 = vrot.slane %v5421_v15, 7  ;;  %v5611_v1 = vrot.slane %v5427_v17, 7  ;;  %v5614_v2 = vrot.slane %v5438_v21, 7  ;;  %v5619_v3 = vrot.slane %v5418_v14, 7 }
  0x17   :  { %4838 = vrot.lane.b32.xlu1 %v5455_v27, %s5284_s19  ;;  %9326 = vst [vmem:[#allocation12_spill] sm:$0xff] %v5598_v62  ;;  %9327 = vst [vmem:[#allocation13_spill] sm:$0xff] %v5603_v63  ;;  %v5622_v4 = vrot.slane %v5424_v16, 7  ;;  %v5625_v5 = vrot.slane %v5413_v13, 7  ;;  %v5657_v19 = vrot.slane %v5410_v12, 7  ;;  %v5662_v20 = vrot.slane %v5397_v8, 7 }
  0x18   :  { %9328 = vst [vmem:[#allocation14_spill] sm:$0xff] %v5608_v0  ;;  %9329 = vst [vmem:[#allocation15_spill] sm:$0xff] %v5611_v1  ;;  %v4887_v6 = vpack.i.bf16 %v5611_v1, %v5614_v2  ;;  %v5667_v26 = vrot.slane %v5406_v11, 7  ;;  %v245_v23 = vrot.slane %v5413_v13, 2 }
  0x19   :  { %4848 = vrot.lane.b32.xlu0 %v4847_v28, %s5283_s0  ;;  %9330 = vst [vmem:[#allocation16_spill] sm:$0xff] %v5614_v2  ;;  %9331 = vst [vmem:[#allocation17_spill] sm:$0xff] %v5619_v3  ;;  %v4882_v7 = vpack.i.bf16 %v5625_v5, %v5622_v4 }
  0x1a   :  { %9332 = vst [vmem:[#allocation18_spill] sm:$0xff] %v5622_v4  ;;  %9333 = vst [vmem:[#allocation19_spill] sm:$0xff] %v5625_v5 }
  0x1b   :  { %493 = vrot.lane.b32.xlu1 %v5397_v8, %s5285_s20  ;;  %9335 = vst [vmem:[#allocation21_spill] sm:$0xff] %v5657_v19  ;;  %9336 = vst [vmem:[#allocation22_spill] sm:$0xff] %v5662_v20 }
  0x1c   :  { %9337 = vst [vmem:[#allocation23_spill] sm:$0xff] %v5667_v26 }
  0x1d   :  { %491 = vrot.lane.b32.xlu0 %v5474_v34, %s5285_s20 }
  0x1f   :  { %489 = vrot.lane.b32.xlu1 %v5463_v29, %s5285_s20 }
  0x21   :  { %495 = vrot.lane.b32.xlu0 %v5410_v12, %s5285_s20 }
  0x23   :  { %512 = vrot.lane.b32.xlu1 %v506_v43, %s5286_s21 }
  0x25   :  { %510 = vrot.lane.b32.xlu0 %v505_v44, %s5286_s21 }
  0x27   :  { %508 = vrot.lane.b32.xlu1 %v504_v45, %s5286_s21 }
  0x29   :  { %514 = vrot.lane.b32.xlu0 %v507_v46, %s5286_s21 }
  0x2b   :  { %528 = vrot.lane.b32.xlu1 %v5511_v47, %s5287_s22 }
  0x2d   :  { %526 = vrot.lane.b32.xlu0 %v5397_v8, %s5287_s22 }
  0x2f   :  { %524 = vrot.lane.b32.xlu1 %v5520_v48, %s5287_s22 }
  0x31   :  { %530 = vrot.lane.b32.xlu0 %v5399_v9, %s5287_s22 }
  0x33   :  { %1054 = vrot.lane.b32.xlu1 %v5399_v9, %s5283_s0 }
  0x35   :  { %796 = vrot.lane.b32.xlu0 %v5410_v12, %s5283_s0 }
  0x37   :  { %794 = vrot.lane.b32.xlu1 %v5397_v8, %s5283_s0 }
  0x39   :  { %1056 = vrot.lane.b32.xlu0 %v5406_v11, %s5283_s0 }
  0x3b   :  { %1067 = vrot.lane.b32.xlu1 %v5535_v49, %s5288_s23 }
  0x3d   :  { %1065 = vrot.lane.b32.xlu0 %v5540_v50, %s5288_s23 }
  0x3f   :  { %1063 = vrot.lane.b32.xlu1 %v5545_v51, %s5288_s23 }
  0x41   :  { %1069 = vrot.lane.b32.xlu0 %v5550_v52, %s5288_s23 }
  0x43   :  { %4858 = vrot.lane.b32.xlu1 %v5476_v35, %s5285_s20 }
  0x45   :  { %4853 = vrot.lane.b32.xlu0 %v5478_v36, %s5285_s20 }
  0x47   :  { %1094 = vrot.lane.b32.xlu1 %v157_v53, %s5285_s20 }
  0x49   :  { %1092 = vrot.lane.b32.xlu0 %v156_v54, %s5285_s20 }
  0x4b   :  { %1090 = vrot.lane.b32.xlu1 %v155_v55, %s5285_s20 }
  0x4d   :  { %1096 = vrot.lane.b32.xlu0 %v158_v56, %s5285_s20 }
  0x4f   :  { %4868 = vrot.lane.b32.xlu1 %v4867_v57, %s5286_s21  ;;  %v9162_v57 = vrot.slane %v5443_v22, 1 }
  0x51   :  { %4863 = vrot.lane.b32.xlu0 %v5486_v41, %s5286_s21 }
  0x53   :  { %1124 = vrot.lane.b32.xlu1 %v9156_v58, %s5286_s21  ;;  %v5777_v58 = vcombine.low %v5463_v29, %v5463_v29 }
  0x55   :  { %1122 = vrot.lane.b32.xlu0 %v9155_v59, %s5286_s21  ;;  %9347 = vst [vmem:[#allocation31_spill] sm:$0xff] %v5777_v58 }
  0x57   :  { %4873 = vrot.lane.b32.xlu1 %v5433_v18, %s5283_s0  ;;  %v5651_v18 = vrot.slane %v5399_v9, 7 }
  0x59   :  { %1126 = vrot.lane.b32.xlu0 %v9154_v60, %s5286_s21  ;;  %9334 = vst [vmem:[#allocation20_spill] sm:$0xff] %v5651_v18 }
  0x5b   :  { %1120 = vrot.lane.b32.xlu1 %v9153_v61, %s5286_s21 }
  0x5d   :  { %4878 = vrot.lane.b32.xlu0 %v5455_v27, %s5283_s0 }
  0x5f   :  { %753 = vrot.lane.b32.xlu1 %v5598_v62, %s5283_s0 }
  0x61   :  { %751 = vrot.lane.b32.xlu0 %v5603_v63, %s5283_s0 }
  0x63   :  { %749 = vrot.lane.b32.xlu1 %v5608_v0, %s5283_s0 }
  0x65   :  { %755 = vrot.lane.b32.xlu0 %v5619_v3, %s5283_s0 }
  0x67   :  { %4888 = vrot.lane.b32.xlu1 %v4887_v6, %s5284_s19 }
  0x69   :  { %4883 = vrot.lane.b32.xlu0 %v4882_v7, %s5284_s19 }
  0x6b   :  { %790 = vrot.lane.b32.xlu1 %v5463_v29, %s5283_s0 }
  0x6d   :  { %792 = vrot.lane.b32.xlu0 %v5474_v34, %s5283_s0 }
  0x6f   :  { %809 = vrot.lane.b32.xlu1 %v506_v43, %s5284_s19 }
  0x71   :  { %807 = vrot.lane.b32.xlu0 %v505_v44, %s5284_s19 }
  0x73   :  { %805 = vrot.lane.b32.xlu1 %v504_v45, %s5284_s19  ;;  %v9160_v45 = vrot.slane %v5410_v12, 3 }
  0x75   :  { %811 = vrot.lane.b32.xlu0 %v507_v46, %s5284_s19 }
  0x77   :  { %71 = vrot.lane.b32.xlu1 %v5651_v18, %s5283_s0 }
  0x79   :  { %69 = vrot.lane.b32.xlu0 %v5657_v19, %s5283_s0 }
  0x7b   :  { %67 = vrot.lane.b32.xlu1 %v5662_v20, %s5283_s0 }
  0x7d   :  { %v5671_v27 = vpop.permute.xlu1 %467  ;;  %73 = vrot.lane.b32.xlu0 %v5667_v26, %s5283_s0 }
  0x7f   :  { %v5675_v28 = vpop.permute.xlu0 %469  ;;  %1857 = vrot.lane.b32.xlu1 %v5603_v63, %s5289_s24 }
  0x81   :  { %v5679_v30 = vpop.permute.xlu1 %463  ;;  %1855 = vrot.lane.b32.xlu0 %v5608_v0, %s5289_s24 }
  0x83   :  { %v5683_v31 = vpop.permute.xlu0 %4833  ;;  %1861 = vrot.lane.b32.xlu1 %v5619_v3, %s5289_s24 }
  0x84   :  { %v4836_v25 = vunpack.i.h.bf16 %v5683_v31  ;;  %v4835_v24 = vunpack.i.l.bf16 %v5683_v31 }
  0x85   :  { %v5687_v32 = vpop.permute.xlu1 %465  ;;  %1859 = vrot.lane.b32.xlu0 %v5598_v62, %s5289_s24 }
  0x87   :  { %v5691_v33 = vpop.permute.xlu0 %4843  ;;  %4898 = vrot.lane.b32.xlu1 %v5476_v35, %s5283_s0 }
  0x89   :  { %v5695_v37 = vpop.permute.xlu1 %4838  ;;  %4893 = vrot.lane.b32.xlu0 %v5478_v36, %s5283_s0 }
  0x8a   :  { %v4841_v62 = vunpack.i.h.bf16 %v5695_v37 }
  0x8b   :  { %v5699_v38 = vpop.permute.xlu0 %4848  ;;  %163 = vrot.lane.b32.xlu1 %v157_v53, %s5283_s0 }
  0x8d   :  { %v5704_v39 = vpop.permute.xlu1 %493  ;;  %161 = vrot.lane.b32.xlu0 %v156_v54, %s5283_s0  ;;  %v4846_v54 = vunpack.i.h.bf16 %v5691_v33 }
  0x8e   :  { %9338 = vst [vmem:[#allocation24_spill] sm:$0xff] %v5704_v39 }
  0x8f   :  { %v5709_v40 = vpop.permute.xlu0 %491  ;;  %159 = vrot.lane.b32.xlu1 %v155_v55, %s5283_s0  ;;  %v4845_v55 = vunpack.i.l.bf16 %v5691_v33 }
  0x91   :  { %v5714_v35 = vpop.permute.xlu1 %489  ;;  %165 = vrot.lane.b32.xlu0 %v158_v56, %s5283_s0  ;;  %v9161_v56 = vrot.slane %v5399_v9, 3  ;;  %v457_v33 = vsel %vm9288_vm2, %v4845_v55, %v4846_v54 }
  0x92   :  { %9339 = vst [vmem:[#allocation25_spill] sm:$0xff] %v5714_v35  ;;  %v536_v60 = vsel %vm5756_vm3, %v9162_v57, %v457_v33  ;;  %v472_v33 = vsel %vm9288_vm2, %v5687_v32, %v5671_v27  ;;  %v5916_v47 = vsel %vm9289_vm6, %v5714_v35, %v5709_v40 }
  0x93   :  { %v5719_v36 = vpop.permute.xlu0 %495  ;;  %96 = vrot.lane.b32.xlu1 %v5397_v8, %s5284_s19  ;;  %9368 = vst [vmem:[#allocation43_spill] sm:$0xff] %v5916_v47 }
  0x94   :  { %9340 = vst [vmem:[#allocation26_spill] sm:$0xff] %v5719_v36 }
  0x95   :  { %v5723_v43 = vpop.permute.xlu1 %512  ;;  %94 = vrot.lane.b32.xlu0 %v5474_v34, %s5284_s19  ;;  %v9159_v34 = vrot.slane %v5397_v8, 3 }
  0x97   :  { %v5727_v44 = vpop.permute.xlu0 %510  ;;  %4903 = vrot.lane.b32.xlu1 %v5486_v41, %s5284_s19 }
  0x98   :  { %v5852_v4 = vsel %vm9271_vm11, %v5727_v44, %v5723_v43 }
  0x99   :  { %v5732_v46 = vpop.permute.xlu1 %508  ;;  %92 = vrot.lane.b32.xlu0 %v5463_v29, %s5284_s19  ;;  %9360 = vst [vmem:[#allocation38_spill] sm:$0xff] %v5852_v4 }
  0x9b   :  { %v5736_v53 = vpop.permute.xlu0 %514  ;;  %195 = vrot.lane.b32.xlu1 %v9160_v45, %s5285_s20  ;;  %v545_v45 = vsel %vm9292_vm0, %v536_v60, %v472_v33  ;;  %v9353_v33 = vrot.slane %v5402_v10, 1 }
  0x9c   :  { %9341 = vst [vmem:[#allocation27_spill] sm:$0xff] %v5736_v53 }
  0x9d   :  { %v5744_v41 = vpop.permute.xlu1 %528  ;;  %4908 = vrot.lane.b32.xlu0 %v5488_v42, %s5284_s19  ;;  %v9167_v42 = vunpack.i.l.bf16 %v5699_v38 }
  0x9f   :  { %v5750_v6 = vpop.permute.xlu0 %526  ;;  %193 = vrot.lane.b32.xlu1 %v9159_v34, %s5285_s20  ;;  %v4851_v34 = vunpack.i.h.bf16 %v5699_v38  ;;  %v458_v31 = vsel %vm9288_vm2, %v4846_v54, %v9167_v42  ;;  %v5811_v54 = vrot.slane %v5399_v9, 1  ;;  %v244_v42 = vrot.slane %v5424_v16, 2 }
  0xa0   :  { %9342 = vst [vmem:[#allocation28_spill] sm:$0xff] %v5750_v6  ;;  %v537_v0 = vsel %vm5756_vm3, %v9353_v33, %v458_v31  ;;  %v9359_v31 = vrot.slane %v5421_v15, 1 }
  0xa1   :  { %v5761_v61 = vpop.permute.xlu1 %524  ;;  %197 = vrot.lane.b32.xlu0 %v9161_v56, %s5285_s20  ;;  %v5804_v56 = vsel %vm9289_vm6, %v5709_v40, %v5704_v39  ;;  %9352 = vst [vmem:[#allocation34_spill] sm:$0xff] %v5811_v54  ;;  %v456_v60 = vsel %vm9288_vm2, %v4851_v34, %v4845_v55  ;;  %v473_v55 = vsel %vm9288_vm2, %v5671_v27, %v5675_v28 }
  0xa2   :  { %9345 = vst [vmem:[#allocation29_spill] sm:$0xff] %v5761_v61  ;;  %9350 = vst [vmem:[#allocation32_spill] sm:$0xff] %v5804_v56  ;;  %v535_v33 = vsel %vm5756_vm3, %v9359_v31, %v456_v60  ;;  %v549_v27 = vsel %vm9292_vm0, %v537_v0, %v473_v55  ;;  %v246_v60 = vrot.slane %v5438_v21, 2  ;;  %v471_v31 = vsel %vm9288_vm2, %v5679_v30, %v5687_v32 }
  0xa3   :  { %v5771_v59 = vpop.permute.xlu0 %530  ;;  %215 = vrot.lane.b32.xlu1 %v5520_v48, %s5286_s21  ;;  %v9362_v0 = vunpack.i.l.bf16 %v5695_v37  ;;  %v541_v30 = vsel %vm9292_vm0, %v535_v33, %v471_v31  ;;  %v482_v31 = vsel %vm100_vm7, %v4841_v62, %v4835_v24 }
  0xa4   :  { %9346 = vst [vmem:[#allocation30_spill] sm:$0xff] %v5771_v59  ;;  %v5920_v48 = vsel %vm5796_vm8, %v541_v30, %v482_v31  ;;  %v5951_v30 = vsel %vm9271_vm11, %v5732_v46, %v5727_v44  ;;  %v5960_v31 = vsel %vm9270_vm15, %v5744_v41, %v5771_v59 }
  0xa5   :  { %v5787_v57 = vpop.permute.xlu1 %1054  ;;  %213 = vrot.lane.b32.xlu0 %v5463_v29, %s5286_s21  ;;  %v483_v29 = vsel %vm100_vm7, %v4835_v24, %v4836_v25  ;;  %v484_v55 = vsel %vm100_vm7, %v4836_v25, %v9362_v0  ;;  %v5901_v25 = vsel %vm9270_vm15, %v5750_v6, %v5744_v41  ;;  %9369 = vst [vmem:[#allocation44_spill] sm:$0xff] %v5920_v48  ;;  %9371 = vst [vmem:[#allocation46_spill] sm:$0xff] %v5951_v30 }
  0xa6   :  { %v5823_v3 = vsel %vm5796_vm8, %v545_v45, %v483_v29  ;;  %v5840_v45 = vrot.slane %v5410_v12, 1  ;;  %9366 = vst [vmem:[#allocation41_spill] sm:$0xff] %v5901_v25  ;;  %v5905_v33 = vsel %vm5796_vm8, %v549_v27, %v484_v55  ;;  %v5932_v24 = vsel %vm9271_vm11, %v5723_v43, %v5736_v53  ;;  %9372 = vst [vmem:[#allocation47_spill] sm:$0xff] %v5960_v31 }
  0xa7   :  { %v5806_v2 = vpop.permute.xlu0 %796  ;;  %211 = vrot.lane.b32.xlu1 %v5777_v58, %s5286_s21  ;;  %9354 = vst [vmem:[#allocation35_spill] sm:$0xff] %v5823_v3  ;;  %v565_v29 = vsel %vm9282_vm4, %v5823_v3, %v5804_v56  ;;  %v5858_v3 = vpack.i.bf16 %v245_v23, %v244_v42  ;;  %v5873_v23 = vsel %vm9289_vm6, %v5704_v39, %v5719_v36  ;;  %v5896_v39 = vrot.slane %v5397_v8, 1 }
  0xa8   :  { %9351 = vst [vmem:[#allocation33_spill] sm:$0xff] %v5806_v2  ;;  %9358 = vst [vmem:[#allocation37_spill] sm:$0xff] %v5840_v45  ;;  %v576_v9 = vsel %vm5832_vm14, %v565_v29, %v5804_v56  ;;  %v569_v0 = vsel %vm9282_vm4, %v5905_v33, %v5873_v23  ;;  %v9190_v27 = vrot.slane %v5406_v11, 3  ;;  %v561_v55 = vsel %vm9282_vm4, %v5920_v48, %v5916_v47 }
  0xa9   :  { %v5825_v1 = vpop.permute.xlu1 %794  ;;  %98 = vrot.lane.b32.xlu0 %v5410_v12, %s5284_s19  ;;  %v243_v12 = vrot.slane %v5427_v17, 2  ;;  %9361 = vst [vmem:[#allocation39_spill] sm:$0xff] %v5873_v23  ;;  %v585_v29 = vsel %vm9297_vm9, %v576_v9, %v5852_v4  ;;  %9365 = vst [vmem:[#allocation40_spill] sm:$0xff] %v5896_v39 }
  0xaa   :  { %9355 = vst [vmem:[#allocation36_spill] sm:$0xff] %v5825_v1  ;;  %9367 = vst [vmem:[#allocation42_spill] sm:$0xff] %v5905_v33 }
  0xab   :  { %v5854_v63 = vpop.permute.xlu0 %1056  ;;  %235 = vrot.lane.b32.xlu1 %v5811_v54, %s5287_s22  ;;  %v5908_v9 = vpack.i.bf16 %v246_v60, %v243_v12  ;;  %v596_v12 = vsel %vm5885_vm1, %v585_v29, %v5852_v4  ;;  %9370 = vst [vmem:[#allocation45_spill] sm:$0xff] %v5932_v24  ;;  %v577_v60 = vsel %vm5832_vm14, %v569_v0, %v5873_v23  ;;  %v9193_v0 = vrot.slane %v5418_v14, 1 }
  0xac   :  { %v604_v62 = vsel %vm9296_vm12, %v596_v12, %v5901_v25  ;;  %v589_v43 = vsel %vm9297_vm9, %v577_v60, %v5932_v24  ;;  %v575_v12 = vsel %vm5832_vm14, %v561_v55, %v5916_v47  ;;  %v5981_v60 = vsel %vm9270_vm15, %v5761_v61, %v5750_v6 }
  0xad   :  { %v5875_v42 = vpop.permute.xlu1 %1067  ;;  %233 = vrot.lane.b32.xlu0 %v5840_v45, %s5287_s22  ;;  %v597_v44 = vsel %vm5885_vm1, %v589_v43, %v5932_v24  ;;  %v581_v46 = vsel %vm9297_vm9, %v575_v12, %v5951_v30  ;;  %9373 = vst [vmem:[#allocation48_spill] sm:$0xff] %v5981_v60  ;;  %v6042_v25 = vrot.slane %v5406_v11, 1  ;;  %v835_v4 = vrot.slane %v5427_v17, 3 }
  0xae   :  { %v607_v41 = vsel %vm9296_vm12, %v597_v44, %v5960_v31  ;;  %v595_v44 = vsel %vm5885_vm1, %v581_v46, %v5951_v30  ;;  %v9376_v46 = vunpack.i.l.bf16 %v5695_v37  ;;  %v9204_v37 = vrot.slane %v5443_v22, 3 }
  0xaf   :  { %v5891_v56 = vpop.permute.xlu0 %1065  ;;  %4913 = vrot.lane.b32.xlu1 %v5858_v3, %s5285_s20  ;;  %v601_v31 = vsel %vm9296_vm12, %v595_v44, %v5981_v60  ;;  %v9221_v60 = vrot.slane %v5402_v10, 2  ;;  %vm382_vm15 = vsmask.f32 5376 }
  0xb1   :  { %v5922_v54 = vpop.permute.xlu1 %1063  ;;  %231 = vrot.lane.b32.xlu0 %v5896_v39, %s5287_s22 }
  0xb3   :  { %v5936_v40 = vpop.permute.xlu0 %1069  ;;  %617 = vrot.lane.b32.xlu1 %v604_v62, %s5285_s20 }
  0xb5   :  { %v5953_v29 = vpop.permute.xlu1 %4858  ;;  %4918 = vrot.lane.b32.xlu0 %v5908_v9, %s5285_s20 }
  0xb7   :  { %v5966_v62 = vpop.permute.xlu0 %4853  ;;  %199 = vrot.lane.b32.xlu1 %v9190_v27, %s5285_s20  ;;  %v9374_v27 = vunpack.i.l.bf16 %v5699_v38 }
  0xb9   :  { %v5983_v55 = vpop.permute.xlu1 %1094  ;;  %619 = vrot.lane.b32.xlu0 %v607_v41, %s5285_s20  ;;  %v538_v43 = vsel %vm5756_vm3, %v9193_v0, %v9374_v27  ;;  %v9194_v0 = vmov 0  }
  0xba   :  { %v553_v38 = vsel %vm9292_vm0, %v538_v43, %v5675_v28  ;;  %676 = vmatprep.mubr.bf16.mxu1 %v9194_v0  ;;  %1264 = vmatprep.mubr.bf16.mxu0 %v9194_v0 }
  0xbb   :  { %v5992_v12 = vpop.permute.xlu0 %1092  ;;  %777 = vrot.lane.b32.xlu1 %v5540_v50, %s5284_s19  ;;  %4982 = vset.pattern.permute.xlu0 %v9194_v0 }
  0xbc   :  { %4983 = vset.pattern.permute.xlu1 %v9194_v0 }
  0xbd   :  { %v6001_v41 = vpop.permute.xlu1 %1090  ;;  %615 = vrot.lane.b32.xlu0 %v601_v31, %s5285_s20  ;;  %v6017_v31 = vsel %vm5796_vm8, %v553_v38, %v9376_v46 }
  0xbe   :  { %9377 = vst [vmem:[#allocation50_spill] sm:$0xff] %v6017_v31  ;;  %v573_v28 = vsel %vm9282_vm4, %v6017_v31, %v5719_v36 }
  0xbf   :  { %v6006_v27 = vpop.permute.xlu0 %1096  ;;  %217 = vrot.lane.b32.xlu1 %v5397_v8, %s5286_s21  ;;  %v578_v46 = vsel %vm5832_vm14, %v573_v28, %v5719_v36  ;;  %v838_v36 = vrot.slane %v5438_v21, 3 }
  0xc0   :  { %9375 = vst [vmem:[#allocation49_spill] sm:$0xff] %v6006_v27  ;;  %v593_v0 = vsel %vm9297_vm9, %v578_v46, %v5736_v53  ;;  %v9214_v46 = vrot.slane %v5402_v10, 3 }
  0xc1   :  { %v6019_v44 = vpop.permute.xlu1 %4868  ;;  %779 = vrot.lane.b32.xlu0 %v5535_v49, %s5284_s19  ;;  %v598_v28 = vsel %vm5885_vm1, %v593_v0, %v5736_v53  ;;  %v9219_v0 = vrot.slane %v5421_v15, 3  ;;  %v4855_v49 = vunpack.i.l.bf16 %v5966_v62 }
  0xc2   :  { %v610_v47 = vsel %vm9296_vm12, %v598_v28, %v5771_v59  ;;  %v836_v28 = vrot.slane %v5424_v16, 3  ;;  %v837_v59 = vrot.slane %v5413_v13, 3 }
  0xc3   :  { %v6027_v43 = vpop.permute.xlu0 %4863  ;;  %781 = vrot.lane.b32.xlu1 %v5550_v52, %s5284_s19 }
  0xc5   :  { %v6032_v38 = vpop.permute.xlu1 %1124  ;;  %775 = vrot.lane.b32.xlu0 %v5545_v51, %s5284_s19  ;;  %v9396_v51 = vrot.slane %v5421_v15, 1 }
  0xc7   :  { %v6044_v30 = vpop.permute.xlu0 %1122  ;;  %826 = vrot.lane.b32.xlu1 %v9204_v37, %s5285_s20  ;;  %v9220_v37 = vrot.slane %v5418_v14, 3 }
  0xc9   :  { %v6049_v24 = vpop.permute.xlu1 %4873  ;;  %237 = vrot.lane.b32.xlu0 %v6042_v25, %s5287_s22 }
  0xcb   :  { %v6059_v23 = vpop.permute.xlu0 %1126  ;;  %621 = vrot.lane.b32.xlu1 %v610_v47, %s5285_s20  ;;  %v6078_v47 = vpack.i.bf16 %v838_v36, %v835_v4  ;;  %v9223_v4 = vrot.slane %v5443_v22, 2 }
  0xcc   :  { %9378 = vst [vmem:[#allocation51_spill] sm:$0xff] %v6059_v23 }
  0xcd   :  { %v6065_v48 = vpop.permute.xlu1 %1120  ;;  %828 = vrot.lane.b32.xlu0 %v9214_v46, %s5285_s20  ;;  %9379 = vst [vmem:[#allocation52_spill] sm:$0xff] %v6078_v47  ;;  %v6085_v46 = vpack.i.bf16 %v837_v59, %v836_v28 }
  0xcf   :  { %v6073_v53 = vpop.permute.xlu0 %4878  ;;  %830 = vrot.lane.b32.xlu1 %v9220_v37, %s5285_s20  ;;  %9380 = vst [vmem:[#allocation53_spill] sm:$0xff] %v6085_v46 }
  0xd1   :  { %v6080_v33 = vpop.permute.xlu1 %753  ;;  %824 = vrot.lane.b32.xlu0 %v9219_v0, %s5285_s20  ;;  %v9227_v0 = vrot.slane %v5418_v14, 2 }
  0xd3   :  { %v6087_v31 = vpop.permute.xlu0 %751  ;;  %4928 = vrot.lane.b32.xlu1 %v6078_v47, %s5286_s21 }
  0xd5   :  { %v6092_v6 = vpop.permute.xlu1 %749  ;;  %4923 = vrot.lane.b32.xlu0 %v6085_v46, %s5286_s21 }
  0xd7   :  { %v6097_v36 = vpop.permute.xlu0 %755  ;;  %862 = vrot.lane.b32.xlu1 %v9221_v60, %s5286_s21  ;;  %v9229_v60 = vrot.slane %v5421_v15, 2 }
  0xd9   :  { %v6102_v59 = vpop.permute.xlu1 %4888  ;;  %860 = vrot.lane.b32.xlu0 %v9223_v4, %s5286_s21 }
  0xdb   :  { %v6107_v28 = vpop.permute.xlu0 %4883  ;;  %1322 = vrot.lane.b32.xlu1 %v5651_v18, %s5284_s19 }
  0xdd   :  { %v6112_v37 = vpop.permute.xlu1 %790  ;;  %1320 = vrot.lane.b32.xlu0 %v5657_v19, %s5284_s19 }
  0xde   :  { %9381 = vst [vmem:[#allocation54_spill] sm:$0xff] %v6112_v37 }
  0xdf   :  { %v6117_v61 = vpop.permute.xlu0 %792  ;;  %864 = vrot.lane.b32.xlu1 %v9227_v0, %s5286_s21  ;;  %v1058_v0 = vsel %vm9288_vm2, %v5806_v2, %v5787_v57 }
  0xe0   :  { %9382 = vst [vmem:[#allocation55_spill] sm:$0xff] %v6117_v61  ;;  %v6177_v61 = vsel %vm9289_vm6, %v5992_v12, %v5983_v55 }
  0xe1   :  { %v6122_v4 = vpop.permute.xlu1 %809  ;;  %858 = vrot.lane.b32.xlu0 %v9229_v60, %s5286_s21  ;;  %v4856_v60 = vunpack.i.h.bf16 %v5966_v62  ;;  %9391 = vst [vmem:[#allocation62_spill] sm:$0xff] %v6177_v61 }
  0xe2   :  { %9383 = vst [vmem:[#allocation56_spill] sm:$0xff] %v6122_v4 }
  0xe3   :  { %v6127_v35 = vpop.permute.xlu0 %807  ;;  %1318 = vrot.lane.b32.xlu1 %v5662_v20, %s5284_s19  ;;  %v6159_v62 = vsel %vm9289_vm6, %v4855_v49, %v4856_v60  ;;  %v4865_v20 = vunpack.i.l.bf16 %v6027_v43 }
  0xe4   :  { %9384 = vst [vmem:[#allocation57_spill] sm:$0xff] %v6127_v35  ;;  %9388 = vst [vmem:[#allocation60_spill] sm:$0xff] %v6159_v62  ;;  %v4866_v35 = vunpack.i.h.bf16 %v6027_v43 }
  0xe5   :  { %v6131_v46 = vpop.permute.xlu1 %805  ;;  %4933 = vrot.lane.b32.xlu0 %v5858_v3, %s5287_s22  ;;  %v1139_v3 = vsel %vm9292_vm0, %v5840_v45, %v1058_v0 }
  0xe6   :  { %9385 = vst [vmem:[#allocation58_spill] sm:$0xff] %v6131_v46  ;;  %v1073_v46 = vsel %vm9269_vm5, %v5891_v56, %v5875_v42  ;;  %v6165_v45 = vsel %vm5796_vm8, %v1139_v3, %v1058_v0  ;;  %v9392_v0 = vrot.slane %v5418_v14, 1 }
  0xe7   :  { %v6138_v47 = vpop.permute.xlu0 %811  ;;  %4938 = vrot.lane.b32.xlu1 %v5908_v9, %s5287_s22  ;;  %v9387_v9 = vrot.slane %v5402_v10, 1  ;;  %9389 = vst [vmem:[#allocation61_spill] sm:$0xff] %v6165_v45 }
  0xe8   :  { %9386 = vst [vmem:[#allocation59_spill] sm:$0xff] %v6138_v47  ;;  %v9390_v47 = vrot.slane %v5443_v22, 1 }
  0xe9   :  { %v6144_v52 = vpop.permute.xlu1 %71  ;;  %1324 = vrot.lane.b32.xlu0 %v5667_v26, %s5284_s19 }
  0xeb   :  { %v6153_v37 = vpop.permute.xlu0 %69  ;;  %888 = vrot.lane.b32.xlu1 %v9387_v9, %s5287_s22  ;;  %v1159_v9 = vsel %vm9282_vm4, %v6165_v45, %v1073_v46  ;;  %v1059_v46 = vsel %vm9288_vm2, %v5787_v57, %v5854_v63  ;;  %v6210_v57 = vsel %vm9271_vm11, %v6044_v30, %v6032_v38 }
  0xec   :  { %v1170_v43 = vsel %vm5832_vm14, %v1159_v9, %v6159_v62  ;;  %v1330_v9 = vrot.slane %v5424_v16, 4  ;;  %v1331_v62 = vrot.slane %v5413_v13, 4  ;;  %9397 = vst [vmem:[#allocation66_spill] sm:$0xff] %v6210_v57  ;;  %v1329_v16 = vrot.slane %v5427_v17, 4 }
  0xed   :  { %v6167_v4 = vpop.permute.xlu1 %67  ;;  %886 = vrot.lane.b32.xlu0 %v9390_v47, %s5287_s22  ;;  %v6188_v47 = vsel %vm9271_vm11, %v4865_v20, %v4866_v35 }
  0xee   :  { %9394 = vst [vmem:[#allocation64_spill] sm:$0xff] %v6188_v47  ;;  %v6237_v26 = vpack.i.bf16 %v1331_v62, %v1330_v9 }
  0xef   :  { %890 = vrot.lane.b32.xlu1 %v9392_v0, %s5287_s22  ;;  %v6185_v3 = vpop.permute.xlu0 %73  ;;  %v6203_v0 = vsel %vm9288_vm2, %v5825_v1, %v5806_v2  ;;  %v9399_v2 = vld [vmem:[#allocation34_spill] sm:$0xff]  ;;  %v6225_v1 = vunpack.i.l.bf16 %v5953_v29 }
  0xf0   :  { %9393 = vst [vmem:[#allocation63_spill] sm:$0xff] %v6185_v3  ;;  %v1179_v3 = vsel %vm9297_vm9, %v1170_v43, %v6177_v61  ;;  %v1143_v43 = vsel %vm9292_vm0, %v9399_v2, %v1059_v46  ;;  %v4861_v61 = vunpack.i.h.bf16 %v5953_v29  ;;  %v4871_v29 = vunpack.i.h.bf16 %v6019_v44 }
  0xf1   :  { %v6193_v45 = vpop.permute.xlu1 %1857  ;;  %884 = vrot.lane.b32.xlu0 %v9396_v51, %s5287_s22  ;;  %v1190_v13 = vsel %vm5885_vm1, %v1179_v3, %v6188_v47  ;;  %9400 = vst [vmem:[#allocation68_spill] sm:$0xff] %v6225_v1  ;;  %v1074_v3 = vsel %vm9269_vm5, %v5875_v42, %v5936_v40  ;;  %v6241_v2 = vsel %vm9289_vm6, %v4856_v60, %v6225_v1 }
  0xf2   :  { %9395 = vst [vmem:[#allocation65_spill] sm:$0xff] %v6193_v45  ;;  %v1332_v45 = vrot.slane %v5438_v21, 4  ;;  %v6245_v21 = vunpack.i.l.bf16 %v6019_v44  ;;  %v1072_v42 = vsel %vm9269_vm5, %v5922_v54, %v5891_v56  ;;  %v6259_v60 = vsel %vm9289_vm6, %v5983_v55, %v6006_v27 }
  0xf3   :  { %895 = vrot.lane.b32.xlu1 %v5777_v58, %s5285_s20  ;;  %v6214_v51 = vpop.permute.xlu0 %1855  ;;  %v9401_v58 = vld [vmem:[#allocation8_spill] sm:$0xff]  ;;  %9405 = vst [vmem:[#allocation71_spill] sm:$0xff] %v6259_v60  ;;  %v6269_v56 = vsel %vm9289_vm6, %v4861_v61, %v4855_v49  ;;  %v6292_v49 = vsel %vm9271_vm11, %v6032_v38, %v6059_v23  ;;  %v6310_v38 = vsel %vm9271_vm11, %v6065_v48, %v6044_v30  ;;  %vm9293_vm5 = vcmask 1045504  }
  0xf4   :  { %9398 = vst [vmem:[#allocation67_spill] sm:$0xff] %v6214_v51  ;;  %v1135_v51 = vsel %vm9292_vm0, %v5896_v39, %v6203_v0  ;;  %9402 = vst [vmem:[#allocation8_spill] sm:$0xff] %v6241_v2  ;;  %v1198_v39 = vsel %vm9296_vm12, %v1190_v13, %v6210_v57  ;;  %v6264_v62 = vpack.i.bf16 %v1332_v45, %v1329_v16  ;;  %v9417_v57 = vld [vmem:[#allocation3_spill] sm:$0xff] }
  0xf5   :  { %v6233_v47 = vpop.permute.xlu1 %1861  ;;  %897 = vrot.lane.b32.xlu0 %v9401_v58, %s5285_s20  ;;  %9403 = vst [vmem:[#allocation69_spill] sm:$0xff] %v6245_v21  ;;  %v6254_v58 = vsel %vm5796_vm8, %v1143_v43, %v1059_v46  ;;  %9406 = vst [vmem:[#allocation72_spill] sm:$0xff] %v6269_v56  ;;  %v6273_v54 = vsel %vm9271_vm11, %v4866_v35, %v6245_v21  ;;  %v6278_v55 = vsel %vm5796_vm8, %v1135_v51, %v6203_v0 }
  0xf6   :  { %9404 = vst [vmem:[#allocation70_spill] sm:$0xff] %v6254_v58  ;;  %v1163_v9 = vsel %vm9282_vm4, %v6254_v58, %v1074_v3  ;;  %9407 = vst [vmem:[#allocation73_spill] sm:$0xff] %v6273_v54  ;;  %v1155_v35 = vsel %vm9282_vm4, %v6278_v55, %v1072_v42  ;;  %v9435_v58 = vld [vmem:[#allocation10_spill] sm:$0xff] }
  0xf7   :  { %1211 = vrot.lane.b32.xlu1 %v1198_v39, %s5286_s21  ;;  %v6262_v44 = vpop.permute.xlu0 %1859  ;;  %9408 = vst [vmem:[#allocation74_spill] sm:$0xff] %v6278_v55  ;;  %v6283_v39 = vsel %vm9289_vm6, %v6001_v41, %v5992_v12  ;;  %9410 = vst [vmem:[#allocation76_spill] sm:$0xff] %v6292_v49  ;;  %v1171_v61 = vsel %vm5832_vm14, %v1163_v9, %v6241_v2  ;;  %v6302_v41 = vsel %vm9271_vm11, %v4871_v29, %v4865_v20  ;;  %v9433_v55 = vld [vmem:[#allocation23_spill] sm:$0xff] }
  0xf8   :  { %9409 = vst [vmem:[#allocation75_spill] sm:$0xff] %v6283_v39  ;;  %v1183_v12 = vsel %vm9297_vm9, %v1171_v61, %v6259_v60  ;;  %9411 = vst [vmem:[#allocation77_spill] sm:$0xff] %v6302_v41  ;;  %v1169_v46 = vsel %vm5832_vm14, %v1155_v35, %v6269_v56  ;;  %v1147_v20 = vsel %vm9292_vm0, %v6042_v25, %v5854_v63 }
  0xf9   :  { %v6285_v45 = vpop.permute.xlu1 %4898  ;;  %4943 = vrot.lane.b32.xlu0 %v6237_v26, %s5287_s22  ;;  %9412 = vst [vmem:[#allocation78_spill] sm:$0xff] %v6310_v38  ;;  %v1191_v13 = vsel %vm5885_vm1, %v1183_v12, %v6273_v54  ;;  %v1175_v16 = vsel %vm9297_vm9, %v1169_v46, %v6283_v39  ;;  %v6337_v29 = vsel %vm5796_vm8, %v1147_v20, %v5854_v63  ;;  %v9414_v12 = vld [vmem:[#allocation7_spill] sm:$0xff]  ;;  %v9415_v46 = vld [vmem:[#allocation2_spill] sm:$0xff]  ;;  %v4890_v54 = vunpack.i.l.bf16 %v6102_v59  ;;  %vm6586_vm11 = vmand %vm9293_vm5, %vm382_vm15 }
  0xfa   :  { %v1201_v48 = vsel %vm9296_vm12, %v1191_v13, %v6292_v49  ;;  %v1189_v43 = vsel %vm5885_vm1, %v1175_v16, %v6302_v41  ;;  %9413 = vst [vmem:[#allocation79_spill] sm:$0xff] %v6337_v29  ;;  %v1167_v9 = vsel %vm9282_vm4, %v6337_v29, %v5936_v40  ;;  %v77_v16 = vsel %vm9288_vm2, %v6153_v37, %v6144_v52 }
  0xfb   :  { %4948 = vrot.lane.b32.xlu1 %v6264_v62, %s5287_s22  ;;  %v6314_v51 = vpop.permute.xlu0 %4893  ;;  %v1195_v3 = vsel %vm9296_vm12, %v1189_v43, %v6310_v38  ;;  %v1172_v61 = vsel %vm5832_vm14, %v1167_v9, %v6225_v1  ;;  %v4876_v43 = vunpack.i.h.bf16 %v6049_v24  ;;  %v4880_v9 = vunpack.i.l.bf16 %v6073_v53 }
  0xfc   :  { %v1187_v63 = vsel %vm9297_vm9, %v1172_v61, %v6006_v27  ;;  %v9416_v61 = vrot.slane %v9415_v46, 3  ;;  %v275_v38 = vsel %vm9292_vm0, %v9417_v57, %v77_v16  ;;  %v758_v41 = vsel %vm9288_vm2, %v6087_v31, %v6080_v33 }
  0xfd   :  { %v6326_v30 = vpop.permute.xlu1 %163  ;;  %1213 = vrot.lane.b32.xlu0 %v1201_v48, %s5286_s21  ;;  %v1192_v40 = vsel %vm5885_vm1, %v1187_v63, %v6245_v21  ;;  %v4886_v63 = vunpack.i.h.bf16 %v6107_v28  ;;  %vm9459_vm15 = vcmask 1046528  }
  0xfe   :  { %v1204_v20 = vsel %vm9296_vm12, %v1192_v40, %v6059_v23  ;;  %v740_v40 = vsel %vm9288_vm2, %v4876_v43, %v4880_v9 }
  0xff   :  { %1209 = vrot.lane.b32.xlu1 %v1195_v3, %s5286_s21  ;;  %v6340_v42 = vpop.permute.xlu0 %161  ;;  %v4875_v3 = vunpack.i.l.bf16 %v6049_v24 }
 0x101   :  { %v6348_v35 = vpop.permute.xlu1 %159  ;;  %1348 = vrot.lane.b32.xlu0 %v9414_v12, %s5285_s20  ;;  %v739_v23 = vsel %vm9288_vm2, %v4875_v3, %v4876_v43  ;;  %v9420_v43 = vunpack.i.l.bf16 %v6107_v28 }
 0x103   :  { %1350 = vrot.lane.b32.xlu1 %v9415_v46, %s5285_s20  ;;  %v6356_v13 = vpop.permute.xlu0 %165 }
 0x105   :  { %v6366_v48 = vpop.permute.xlu1 %96  ;;  %1215 = vrot.lane.b32.xlu0 %v1204_v20, %s5286_s21  ;;  %v76_v20 = vsel %vm9288_vm2, %v6167_v4, %v6153_v37  ;;  %v6397_v37 = vsel %vm5796_vm8, %v275_v38, %v77_v16  ;;  %v9419_v4 = vld [vmem:[#allocation12_spill] sm:$0xff]  ;;  %v4881_v38 = vunpack.i.h.bf16 %v6073_v53  ;;  %v907_v16 = vsel %vm5756_vm3, %v5443_v22, %v739_v23 }
 0x106   :  { %v271_v39 = vsel %vm9292_vm0, %v5397_v8, %v76_v20  ;;  %v916_v56 = vsel %vm9292_vm0, %v907_v16, %v758_v41 }
 0x107   :  { %1361 = vrot.lane.b32.xlu1 %v9416_v61, %s5286_s21  ;;  %v95_v12 = vpop.permute.xlu0 %94  ;;  %v9418_v61 = vrot.slane %v9417_v57, 3  ;;  %v759_v57 = vsel %vm9288_vm2, %v6080_v33, %v6097_v36 }
 0x108   :  { %v102_v24 = vsel %vm100_vm7, %v95_v12, %v6366_v48 }
 0x109   :  { %v6384_v49 = vpop.permute.xlu1 %4903  ;;  %1359 = vrot.lane.b32.xlu0 %v9418_v61, %s5286_s21  ;;  %v769_v61 = vsel %vm100_vm7, %v9420_v43, %v4886_v63  ;;  %v299_v60 = vsel %vm9282_vm4, %v6397_v37, %v102_v24  ;;  %v9421_v43 = vld [vmem:[#allocation13_spill] sm:$0xff]  ;;  %v908_v24 = vsel %vm5756_vm3, %v5402_v10, %v740_v40 }
 0x10a   :  { %v920_v53 = vsel %vm9292_vm0, %v908_v24, %v759_v57  ;;  %v6428_v23 = vsel %vm5796_vm8, %v916_v56, %v769_v61  ;;  %v9272_v56 = vunpack.i.h.bf16 %v6314_v51  ;;  %v4895_v61 = vunpack.i.l.bf16 %v6314_v51  ;;  %v9427_v24 = vld [vmem:[#allocation15_spill] sm:$0xff] }
 0x10b   :  { %1658 = vrot.lane.b32.xlu1 %v9419_v4, %s5284_s19  ;;  %v93_v21 = vpop.permute.xlu0 %92  ;;  %v770_v4 = vsel %vm100_vm7, %v4886_v63, %v4890_v54  ;;  %v9423_v63 = vrot.slane %v5406_v11, 3 }
 0x10c   :  { %v101_v33 = vsel %vm100_vm7, %v93_v21, %v95_v12  ;;  %v6432_v21 = vsel %vm5796_vm8, %v271_v39, %v76_v20  ;;  %v9422_v12 = vld [vmem:[#allocation18_spill] sm:$0xff]  ;;  %v6444_v57 = vsel %vm5796_vm8, %v920_v53, %v770_v4  ;;  %v738_v20 = vsel %vm9288_vm2, %v4881_v38, %v4875_v3 }
 0x10d   :  { %v6417_v27 = vpop.permute.xlu1 %195  ;;  %1656 = vrot.lane.b32.xlu0 %v9421_v43, %s5284_s19  ;;  %v313_v41 = vsel %vm5832_vm14, %v299_v60, %v9422_v12  ;;  %9424 = vst [vmem:[#allocation7_spill] sm:$0xff] %v6444_v57  ;;  %v295_v39 = vsel %vm9282_vm4, %v6432_v21, %v101_v33  ;;  %v909_v60 = vsel %vm5756_vm3, %v5418_v14, %v4880_v9  ;;  %v9425_v4 = vrot.slane %v5397_v8, 3 }
 0x10e   :  { %v757_v43 = vsel %vm9288_vm2, %v6092_v6, %v6087_v31  ;;  %v924_v33 = vsel %vm9292_vm0, %v909_v60, %v6097_v36  ;;  %v4891_v3 = vunpack.i.h.bf16 %v6102_v59  ;;  %v323_v9 = vsel %vm9297_vm9, %v313_v41, %v5540_v50  ;;  %v9428_v31 = vld [vmem:[#allocation17_spill] sm:$0xff] }
 0x10f   :  { %1363 = vrot.lane.b32.xlu1 %v9423_v63, %s5286_s21  ;;  %v6440_v40 = vpop.permute.xlu0 %4908  ;;  %v6469_v38 = vsel %vm5796_vm8, %v924_v33, %v4890_v54  ;;  %v1505_v8 = vsel %vm9282_vm4, %v6428_v23, %v5657_v19  ;;  %v312_v6 = vsel %vm5832_vm14, %v295_v39, %v9427_v24  ;;  %v1508_v59 = vsel %vm9282_vm4, %v6444_v57, %v5651_v18  ;;  %v9429_v33 = vld [vmem:[#allocation14_spill] sm:$0xff]  ;;  %v9437_v57 = vld [vmem:[#allocation55_spill] sm:$0xff] }
 0x110   :  { %9426 = vst [vmem:[#allocation2_spill] sm:$0xff] %v6469_v38  ;;  %v4901_v54 = vunpack.i.h.bf16 %v6285_v45  ;;  %v6488_v53 = vsel %vm9288_vm2, %v4895_v61, %v9272_v56  ;;  %v4905_v63 = vunpack.i.l.bf16 %v6384_v49  ;;  %v906_v39 = vsel %vm5756_vm3, %v5421_v15, %v738_v20  ;;  %v9431_v56 = vld [vmem:[#allocation4_spill] sm:$0xff]  ;;  %vm6542_vm3 = vmand %vm9295_vm10, %vm358_vm13 }
 0x111   :  { %v6454_v16 = vpop.permute.xlu1 %193  ;;  %1357 = vrot.lane.b32.xlu0 %v9425_v4, %s5286_s21  ;;  %v337_v60 = vsel %vm5885_vm1, %v323_v9, %v6488_v53  ;;  %v9432_v41 = vrot.slane %v9431_v56, 1  ;;  %v912_v1 = vsel %vm9292_vm0, %v906_v39, %v757_v43  ;;  %v1511_v7 = vsel %vm9282_vm4, %v6469_v38, %v9433_v55 }
 0x112   :  { %v9434_v20 = vunpack.i.l.bf16 %v6107_v28  ;;  %v319_v29 = vsel %vm9297_vm9, %v312_v6, %v9435_v58  ;;  %v1514_v56 = vsel %vm5832_vm14, %v1505_v8, %v5657_v19  ;;  %v6526_v43 = vsel %vm9288_vm2, %v6340_v42, %v6326_v30  ;;  %v9439_v28 = vld [vmem:[#allocation31_spill] sm:$0xff]  ;;  %v9457_v19 = vld [vmem:[#allocation33_spill] sm:$0xff] }
 0x113   :  { %1660 = vrot.lane.b32.xlu1 %v9428_v31, %s5284_s19  ;;  %v6479_v36 = vpop.permute.xlu0 %197  ;;  %v9430_v31 = vrot.slane %v5427_v17, 1  ;;  %9438 = vst [vmem:[#allocation3_spill] sm:$0xff] %v6526_v43  ;;  %v1515_v6 = vsel %vm5832_vm14, %v1508_v59, %v5651_v18  ;;  %v9441_v39 = vunpack.i.h.bf16 %v6384_v49  ;;  %vm406_vm13 = vsmask.f32 6400  ;;  %v9450_v18 = vld [vmem:[#allocation22_spill] sm:$0xff] }
 0x114   :  { %v768_v9 = vsel %vm100_vm7, %v4891_v3, %v9434_v20 }
 0x115   :  { %v6498_v4 = vpop.permute.xlu1 %215  ;;  %1654 = vrot.lane.b32.xlu0 %v9429_v33, %s5284_s19  ;;  %v4957_v2 = vpack.i.bf16 %v9432_v41, %v9430_v31  ;;  %v9436_v33 = vld [vmem:[#allocation36_spill] sm:$0xff]  ;;  %v6534_v41 = vsel %vm9288_vm2, %v4901_v54, %v4895_v61  ;;  %v183_v8 = vsel %vm100_vm7, %v4905_v63, %v9441_v39  ;;  %v4910_v31 = vunpack.i.l.bf16 %v6440_v40  ;;  %v9445_v39 = vld [vmem:[#allocation6_spill] sm:$0xff] }
 0x116   :  { %v6518_v17 = vsel %vm9288_vm2, %v9437_v57, %v9436_v33  ;;  %9440 = vst [vmem:[#allocation12_spill] sm:$0xff] %v6534_v41  ;;  %v347_v33 = vsel %vm9296_vm12, %v337_v60, %v6526_v43  ;;  %v6550_v59 = vsel %vm5796_vm8, %v912_v1, %v768_v9  ;;  %v336_v61 = vsel %vm5885_vm1, %v319_v29, %v6534_v41  ;;  %v9448_v41 = vld [vmem:[#allocation56_spill] sm:$0xff]  ;;  %v9453_v43 = vld [vmem:[#allocation57_spill] sm:$0xff] }
 0x117   :  { %1372 = vrot.lane.b32.xlu1 %v9439_v28, %s5287_s22  ;;  %v214_v3 = vpop.permute.xlu0 %213  ;;  %9444 = vst [vmem:[#allocation13_spill] sm:$0xff] %v6550_v59  ;;  %v203_v54 = vsel %vm9289_vm6, %v6417_v27, %v6479_v36  ;;  %v1521_v58 = vsel %vm9297_vm9, %v1514_v56, %v6518_v17  ;;  %v1524_v1 = vsel %vm9297_vm9, %v1515_v6, %v6203_v0 }
 0x118   :  { %v6567_v29 = vsel %vm9288_vm2, %v6348_v35, %v6340_v42  ;;  %v361_v60 = vsel %vm6542_vm3, %v347_v33, %v183_v8  ;;  %v1516_v6 = vsel %vm5832_vm14, %v1511_v7, %v9433_v55  ;;  %v1502_v42 = vsel %vm9282_vm4, %v6550_v59, %v9450_v18 }
 0x119   :  { %v212_v28 = vpop.permute.xlu1 %211  ;;  %1374 = vrot.lane.b32.xlu0 %v9445_v39, %s5287_s22  ;;  %9446 = vst [vmem:[#allocation18_spill] sm:$0xff] %v6567_v29  ;;  %v9447_v39 = vld [vmem:[#allocation59_spill] sm:$0xff]  ;;  %v182_v35 = vsel %vm100_vm7, %v4910_v31, %v4905_v63  ;;  %v343_v8 = vsel %vm9296_vm12, %v336_v61, %v6567_v29  ;;  %v371_v33 = vsel %vm9295_vm10, %v361_v60, %v203_v54  ;;  %vm9454_vm4 = vcmask 908288   ;;  %v9455_v31 = vld [vmem:[#allocation5_spill] sm:$0xff] }
 0x11a   :  { %v6575_v56 = vsel %vm100_vm7, %v9448_v41, %v9447_v39  ;;  %v6596_v7 = vsel %vm100_vm7, %v9453_v43, %v9448_v41  ;;  %v221_v55 = vsel %vm9454_vm4, %v214_v3, %v6498_v4  ;;  %v1531_v59 = vsel %vm5885_vm1, %v1524_v1, %v6203_v0  ;;  %v9456_v60 = vld [vmem:[#allocation63_spill] sm:$0xff] }
 0x11b   :  { %4958 = vrot.lane.b32.xlu1 %v4957_v2, %s5291_s25  ;;  %v99_v9 = vpop.permute.xlu0 %98  ;;  %9449 = vst [vmem:[#allocation17_spill] sm:$0xff] %v6575_v56  ;;  %v1530_v61 = vsel %vm5885_vm1, %v1521_v58, %v6518_v17  ;;  %v78_v41 = vsel %vm9288_vm2, %v6144_v52, %v9456_v60  ;;  %v1538_v29 = vsel %vm9296_vm12, %v1531_v59, %v6575_v56  ;;  %vm430_vm4 = vsmask.f32 7424 }
 0x11c   :  { %v1527_v24 = vsel %vm9297_vm9, %v1516_v6, %v9457_v19  ;;  %v202_v58 = vsel %vm9289_vm6, %v6454_v16, %v6417_v27  ;;  %v360_v1 = vsel %vm6542_vm3, %v343_v8, %v182_v35  ;;  %v385_v52 = vsel %vm6586_vm11, %v371_v33, %v203_v54 }
 0x11d   :  { %v6600_v63 = vpop.permute.xlu1 %235  ;;  %4953 = vrot.lane.b32.xlu0 %v9455_v31, %s5291_s25  ;;  %v9458_v31 = vld [vmem:[#allocation54_spill] sm:$0xff]  ;;  %v1513_v6 = vsel %vm5832_vm14, %v1502_v42, %v9450_v18  ;;  %v1536_v16 = vsel %vm9296_vm12, %v1530_v61, %v6596_v7  ;;  %v279_v54 = vsel %vm9292_vm0, %v9415_v46, %v78_v41  ;;  %vm9462_vm6 = vcmask 900096  }
 0x11e   :  { %v6620_v38 = vsel %vm9288_vm2, %v9458_v31, %v9437_v57  ;;  %v283_v57 = vsel %vm9292_vm0, %v5406_v11, %v9456_v60  ;;  %v395_v31 = vsel %vm9293_vm5, %v385_v52, %v221_v55  ;;  %vm6639_vm2 = vmand %vm9459_vm15, %vm406_vm13  ;;  %v1532_v11 = vsel %vm5885_vm1, %v1527_v24, %v9457_v19 }
 0x11f   :  { %1549 = vrot.lane.b32.xlu1 %v1538_v29, %s5291_s25  ;;  %v234_v59 = vpop.permute.xlu0 %233  ;;  %v367_v35 = vsel %vm9295_vm10, %v360_v1, %v202_v58  ;;  %v103_v8 = vsel %vm100_vm7, %v6366_v48, %v99_v9  ;;  %vm9463_vm13 = vcmask 1047552   ;;  %v1518_v52 = vsel %vm9297_vm9, %v1513_v6, %v6620_v38 }
 0x120   :  { %v241_v29 = vsel %vm9462_vm6, %v234_v59, %v6600_v63  ;;  %vm6662_vm6 = vmand %vm9463_vm13, %vm430_vm4  ;;  %v6671_v24 = vsel %vm5796_vm8, %v283_v57, %v9456_v60  ;;  %vm9466_vm15 = vcmask 908288   ;;  %v9467_v1 = vrot.slane %v5402_v10, 4 }
 0x121   :  { %v6649_v42 = vpop.permute.xlu1 %4913  ;;  %1547 = vrot.lane.b32.xlu0 %v1536_v16, %s5291_s25  ;;  %v220_v48 = vsel %vm9466_vm15, %v212_v28, %v214_v3  ;;  %v409_v33 = vsel %vm6639_vm2, %v395_v31, %v221_v55  ;;  %v6681_v56 = vsel %vm5796_vm8, %v279_v54, %v78_v41  ;;  %vm9468_vm4 = vcmask 1041408   ;;  %v9472_v28 = vld [vmem:[#allocation58_spill] sm:$0xff] }
 0x122   :  { %v4915_v46 = vunpack.i.l.bf16 %v6649_v42  ;;  %v307_v6 = vsel %vm9468_vm4, %v6671_v24, %v99_v9  ;;  %v9469_v60 = vunpack.i.h.bf16 %v6649_v42  ;;  %vm9470_vm13 = vcmask 916480   ;;  %vm9473_vm8 = vmmov %vm9468_vm4 }
 0x123   :  { %1673 = vrot.lane.b32.xlu1 %v9467_v1, %s5285_s20  ;;  %v232_v16 = vpop.permute.xlu0 %231  ;;  %vm9471_vm15 = vcmask 1046528   ;;  %v6692_v1 = vsel %vm100_vm7, %v9472_v28, %v9453_v43  ;;  %v384_v55 = vsel %vm6586_vm11, %v367_v35, %v202_v58  ;;  %v303_v5 = vsel %vm9473_vm8, %v6681_v56, %v103_v8  ;;  %vm9481_vm8 = vmmov %vm9470_vm13 }
 0x124   :  { %v256_v57 = vsel %vm9470_vm13, %v4915_v46, %v9469_v60  ;;  %v419_v3 = vsel %vm9471_vm15, %v409_v33, %v241_v29  ;;  %v9474_v9 = vrot.slane %v5443_v22, 4  ;;  %v391_v54 = vsel %vm9293_vm5, %v384_v55, %v220_v48  ;;  %v9475_v29 = vld [vmem:[#allocation16_spill] sm:$0xff]  ;;  %v9478_v55 = vld [vmem:[#allocation11_spill] sm:$0xff] }
 0x125   :  { %v618_v41 = vpop.permute.xlu1 %617  ;;  %v433_v31 = vsel %vm6662_vm6, %v419_v3, %v256_v57  ;;  %v1540_v43 = vsel %vm9296_vm12, %v1532_v11, %v9447_v39  ;;  %v315_v58 = vsel %vm5832_vm14, %v307_v6, %v9475_v29  ;;  %vm9476_vm4 = vcmask 900096   ;;  %v9477_v3 = vld [vmem:[#allocation19_spill] sm:$0xff] }
 0x126   :  { %1671 = vrot.lane.b32.xlu0 %v9474_v9, %s5285_s20  ;;  %644 = vmatprep.subr.bf16.mxu1 %v433_v31  ;;  %v240_v35 = vsel %vm9476_vm4, %v232_v16, %v234_v59  ;;  %v1529_v33 = vsel %vm5885_vm1, %v1518_v52, %v6620_v38  ;;  %v5292_v60 = vmov 65535   ;;  %v314_v11 = vsel %vm5832_vm14, %v303_v5, %v9477_v3 }
 0x127   :  { %v6710_v8 = vpop.permute.xlu0 %4918  ;;  %1551 = vrot.lane.b32.xlu1 %v1540_v43, %s5291_s25  ;;  %v630_v57 = vsel %vm9296_vm12, 4294967295, %v5292_v60  ;;  %v1534_v59 = vsel %vm9296_vm12, %v1529_v33, %v6692_v1  ;;  %v408_v16 = vsel %vm6639_vm2, %v391_v54, %v220_v48  ;;  %v331_v52 = vsel %vm9297_vm9, %v315_v58, %v9478_v55  ;;  %v9479_v33 = vld [vmem:[#allocation9_spill] sm:$0xff] }
 0x128   :  { %v4920_v28 = vunpack.i.l.bf16 %v6710_v8  ;;  %v415_v31 = vsel %vm9471_vm15, %v408_v16, %v240_v35  ;;  %v6731_v5 = vsel %vm9295_vm10, %v630_v57, 0  ;;  %v6734_v43 = vunpack.i.l.bf16 %v6285_v45  ;;  %vm9486_vm15 = vmmov %vm9481_vm8 }
 0x129   :  { %v200_v6 = vpop.permute.xlu1 %199  ;;  %v327_v60 = vsel %vm9297_vm9, %v314_v11, %v9479_v33  ;;  %v9480_v54 = vrot.slane %v5418_v14, 4  ;;  %v9482_v35 = vunpack.i.h.bf16 %v6314_v51  ;;  %vm9483_vm4 = vcmask 1039360  }
 0x12a   :  { %1545 = vrot.lane.b32.xlu0 %v1534_v59, %s5291_s25  ;;  %v255_v9 = vsel %vm9470_vm13, %v4920_v28, %v4915_v46  ;;  %v339_v57 = vsel %vm5885_vm1, %v331_v52, %v6734_v43  ;;  %v9484_v28 = vrot.slane %v5421_v15, 4  ;;  %v4911_v51 = vunpack.i.h.bf16 %v6440_v40  ;;  %vm9485_vm13 = vmmov %vm9483_vm4 }
 0x12b   :  { %v620_v48 = vpop.permute.xlu0 %619  ;;  %1675 = vrot.lane.b32.xlu1 %v9480_v54, %s5285_s20  ;;  %v432_v58 = vsel %vm6662_vm6, %v415_v31, %v255_v9  ;;  %v6748_v45 = vsel %vm9483_vm4, %v9482_v35, %v6734_v43  ;;  %v6768_v52 = vsel %vm9485_vm13, %v6326_v30, %v6356_v13  ;;  %v355_v31 = vsel %vm9296_vm12, %v339_v57, %v6356_v13 }
 0x12c   :  { %v624_v46 = vsel %vm9481_vm8, %v618_v41, %v620_v48  ;;  %645 = vmatpush1.bf16.msra.mxu1 %v432_v58  ;;  %v338_v16 = vsel %vm5885_vm1, %v327_v60, %v6748_v45  ;;  %v9487_v30 = vunpack.i.h.bf16 %v6384_v49  ;;  %v363_v35 = vsel %vm6542_vm3, %v355_v31, %v4911_v51 }
 0x12d   :  { %v6753_v11 = vpop.permute.xlu1 %777  ;;  %v636_v59 = vand.u32 %v6731_v5, %v624_v46  ;;  %v351_v60 = vsel %vm9296_vm12, %v338_v16, %v6768_v52  ;;  %v9488_v57 = vrot.slane %v5402_v10, 3  ;;  %vm626_vm4 = vcmask 203776  }
 0x12e   :  { %1669 = vrot.lane.b32.xlu0 %v9484_v28, %s5285_s20  ;;  %v184_v46 = vsel %vm100_vm7, %v9487_v30, %v4911_v51  ;;  %v9489_v16 = vrot.slane %v5443_v22, 3  ;;  %vm9490_vm13 = vcmask 908288  }
 0x12f   :  { %v616_v9 = vpop.permute.xlu0 %615  ;;  %646 = vmatprep.subr.bf16.mxu1 %v636_v59  ;;  %4968 = vrot.lane.b32.xlu1 %v6264_v62, %s5286_s21  ;;  %v204_v62 = vsel %vm9481_vm8, %v6479_v36, %v200_v6  ;;  %v362_v49 = vsel %vm6542_vm3, %v351_v60, %v184_v46  ;;  %v379_v36 = vsel %vm9295_vm10, %v363_v35, %v200_v6  ;;  %v9492_v60 = vmov 0  }
 0x130   :  { %v623_v54 = vsel %vm9486_vm15, %v616_v9, %v618_v41  ;;  %v375_v28 = vsel %vm9295_vm10, %v362_v49, %v204_v62  ;;  %v387_v9 = vsel %vm6586_vm11, %v379_v36, %v200_v6  ;;  %v9493_v6 = vrot.slane %v5421_v15, 3  ;;  %v9494_v36 = vld [vmem:[#allocation52_spill] sm:$0xff] }
 0x131   :  { %v633_v40 = vand.u32 %v6731_v5, %v623_v54  ;;  %v218_v58 = vpop.permute.xlu1 %217  ;;  %v9491_v54 = vrot.slane %v5418_v14, 3  ;;  %vm9495_vm15 = vcmask 900096   ;;  %vm9496_vm8 = vcmask 1046528  }
 0x132   :  { %4963 = vrot.lane.b32.xlu0 %v6237_v26, %s5286_s21  ;;  %v6793_v26 = vld [vmem:[%s9142_s1] sm:$0x7]  ;;  %v222_v51 = vsel %vm9490_vm13, %v6498_v4, %v218_v58  ;;  %v403_v30 = vsel %vm9293_vm5, %v387_v9, %v218_v58  ;;  %v4921_v4 = vunpack.i.h.bf16 %v6710_v8  ;;  %v9497_v9 = vld [vmem:[#allocation53_spill] sm:$0xff]  ;;  %vm9499_vm13 = vcmask 916480   ;;  %vm9500_vm0 = vmmov %vm9496_vm8  ;;  %s5293_s1 = smov 95  }
 0x133   :  { %v6785_v41 = vpop.permute.xlu0 %779  ;;  %647 = vmatpush1.bf16.msra.mxu1 %v633_v40  ;;  %1699 = vrot.lane.b32.xlu1 %v9488_v57, %s5286_s21  ;;  %v386_v40 = vsel %vm6586_vm11, %v375_v28, %v204_v62  ;;  %v411_v49 = vsel %vm6639_vm2, %v403_v30, %v218_v58  ;;  %v9498_v58 = vunpack.i.h.bf16 %v6649_v42 }
 0x134   :  { %v399_v46 = vsel %vm9293_vm5, %v386_v40, %v222_v51  ;;  %vm9501_vm5 = vmmov %vm9499_vm13 }
 0x135   :  { %v6799_v59 = vpop.permute.xlu1 %781  ;;  %v410_v28 = vsel %vm6639_vm2, %v399_v46, %v222_v51  ;;  %v257_v40 = vsel %vm9499_vm13, %v9498_v58, %v4921_v4 }
 0x136   :  { %1697 = vrot.lane.b32.xlu0 %v9489_v16, %s5286_s21  ;;  %4570 = vmatmul.mubr.msk.bf16.vlgmr.msra.gmra.mrb[0].mxu1 %vm626_vm4, %v6793_v26 }
 0x137   :  { %v776_v31 = vpop.permute.xlu0 %775  ;;  %1701 = vrot.lane.b32.xlu1 %v9491_v54, %s5286_s21  ;;  %717 = vmatprep.mubr.bf16.mxu1 %v9492_v60 }
 0x139   :  { %v6819_v35 = vpop.permute.xlu1 %826 }
 0x13a   :  { %1695 = vrot.lane.b32.xlu0 %v9493_v6, %s5286_s21 }
 0x13b   :  { %v238_v57 = vpop.permute.xlu0 %237  ;;  %4978 = vrot.lane.b32.xlu1 %v9494_v36, %s5287_s22  ;;  %v9505_v36 = vld [vmem:[#allocation67_spill] sm:$0xff] }
 0x13c   :  { %v242_v62 = vsel %vm9495_vm15, %v6600_v63, %v238_v57  ;;  %v427_v8 = vsel %vm9496_vm8, %v411_v49, %v238_v57  ;;  %v9502_v57 = vrot.slane %v5402_v10, 2  ;;  %vm9294_vm15 = vcmask 7168   ;;  %v9504_v49 = vld [vmem:[#allocation65_spill] sm:$0xff] }
 0x13d   :  { %v622_v16 = vpop.permute.xlu1 %621  ;;  %v435_v54 = vsel %vm6662_vm6, %v427_v8, %v4921_v4  ;;  %v423_v30 = vsel %vm9500_vm0, %v410_v28, %v242_v62  ;;  %v1864_v62 = vsel %vm9294_vm15, %v9505_v36, %v9504_v49  ;;  %v1865_v8 = vsel %vm9294_vm15, %v9504_v49, %v6262_v44  ;;  %v9518_v49 = vld [vmem:[#allocation7_spill] sm:$0xff] }
 0x13e   :  { %4973 = vrot.lane.b32.xlu0 %v9497_v9, %s5287_s22  ;;  %v625_v63 = vsel %vm9501_vm5, %v620_v48, %v622_v16  ;;  %v642_v6 = vand.u32 %v6731_v5, %v622_v16  ;;  %685 = vmatprep.subr.bf16.mxu1 %v435_v54  ;;  %v434_v51 = vsel %vm6662_vm6, %v423_v30, %v257_v40  ;;  %v9503_v48 = vrot.slane %v5443_v22, 2  ;;  %v9510_v40 = vld [vmem:[#allocation34_spill] sm:$0xff] }
 0x13f   :  { %v6845_v46 = vpop.permute.xlu0 %828  ;;  %686 = vmatpush1.bf16.msra.mxu1 %v434_v51  ;;  %1725 = vrot.lane.b32.xlu1 %v9502_v57, %s5287_s22  ;;  %v639_v42 = vand.u32 %v6731_v5, %v625_v63  ;;  %v9506_v28 = vrot.slane %v5418_v14, 2  ;;  %v1866_v22 = vsel %vm9294_vm15, %v6262_v44, %v6233_v47  ;;  %v9507_v9 = vrot.slane %v5421_v15, 2 }
 0x140   :  { %687 = vmatprep.subr.bf16.mxu1 %v642_v6  ;;  %vm9508_vm0 = vcmask 1041408   ;;  %v784_v30 = vsel %vm100_vm7, %v6753_v11, %v6785_v41 }
 0x141   :  { %v6851_v4 = vpop.permute.xlu1 %830  ;;  %v1871_v54 = vsel %vm9508_vm0, %v6397_v37, %v1864_v62  ;;  %vm9509_vm5 = vmmov %vm9508_vm0 }
 0x142   :  { %1723 = vrot.lane.b32.xlu0 %v9503_v48, %s5287_s22  ;;  %v1874_v58 = vsel %vm9509_vm5, %v6681_v56, %v1865_v8  ;;  %vm9511_vm8 = vmmov %vm9508_vm0  ;;  %v1880_v47 = vsel %vm5832_vm14, %v1871_v54, %v9422_v12  ;;  %v9512_v56 = vld [vmem:[#allocation37_spill] sm:$0xff] }
 0x143   :  { %v6862_v10 = vpop.permute.xlu0 %824  ;;  %688 = vmatpush1.bf16.msra.mxu1 %v639_v42  ;;  %1727 = vrot.lane.b32.xlu1 %v9506_v28, %s5287_s22  ;;  %v1877_v15 = vsel %vm9511_vm8, %v6671_v24, %v1866_v22  ;;  %v1881_v44 = vsel %vm5832_vm14, %v1874_v58, %v9477_v3  ;;  %vm9513_vm13 = vmmov %vm9508_vm0  ;;  %v785_v3 = vsel %vm100_vm7, %v6785_v41, %v6799_v59  ;;  %v9517_v42 = vld [vmem:[#allocation15_spill] sm:$0xff]  ;;  %v9525_v58 = vld [vmem:[#allocation20_spill] sm:$0xff] }
 0x144   :  { %v1882_v24 = vsel %vm5832_vm14, %v1877_v15, %v9475_v29  ;;  %v1868_v12 = vsel %vm9513_vm13, %v6432_v21, %v9505_v36  ;;  %v1890_v6 = vsel %vm9297_vm9, %v1881_v44, %v9479_v33  ;;  %v1887_v51 = vsel %vm9297_vm9, %v1880_v47, %v5540_v50  ;;  %v9514_v21 = vld [vmem:[#allocation40_spill] sm:$0xff]  ;;  %v9515_v50 = vld [vmem:[#allocation2_spill] sm:$0xff]  ;;  %vm9516_vm5 = vmmov %vm9508_vm0 }
 0x145   :  { %v6870_v16 = vpop.permute.xlu1 %4928  ;;  %v936_v29 = vsel %vm9508_vm0, %v6428_v23, %v784_v30  ;;  %v1897_v41 = vsel %vm5885_vm1, %v1890_v6, %v6748_v45  ;;  %v1896_v33 = vsel %vm5885_vm1, %v1887_v51, %v6488_v53  ;;  %v944_v23 = vsel %vm9516_vm5, %v9515_v50, %v6799_v59  ;;  %vm9519_vm8 = vmmov %vm9508_vm0  ;;  %v9520_v53 = vld [vmem:[#allocation21_spill] sm:$0xff]  ;;  %v9524_v28 = vld [vmem:[#allocation23_spill] sm:$0xff] }
 0x146   :  { %1721 = vrot.lane.b32.xlu0 %v9507_v9, %s5287_s22  ;;  %4571 = vmatmul.mubr.msk.bf16.vlgmr.msra.gmra.mrb[4].mxu1 %vm626_vm4, %v6793_v26  ;;  %v1879_v48 = vsel %vm5832_vm14, %v1868_v12, %v9517_v42  ;;  %v940_v45 = vsel %vm9519_vm8, %v9518_v49, %v785_v3  ;;  %v947_v59 = vsel %vm5832_vm14, %v936_v29, %v9520_v53  ;;  %vm9522_vm13 = vmmov %vm9508_vm0  ;;  %v9526_v47 = vld [vmem:[#allocation10_spill] sm:$0xff]  ;;  %v9529_v42 = vld [vmem:[#allocation17_spill] sm:$0xff]  ;;  %vm9530_vm0 = vcmask 916480  }
 0x147   :  { %v6881_v14 = vpop.permute.xlu0 %4923  ;;  %1736 = vrot.lane.b32.xlu1 %v9510_v40, %s5291_s25  ;;  %1305 = vmatprep.mubr.bf16.mxu1 %v9492_v60  ;;  %v949_v22 = vsel %vm5832_vm14, %v944_v23, %v9524_v28  ;;  %v948_v40 = vsel %vm5832_vm14, %v940_v45, %v9525_v58  ;;  %v1884_v44 = vsel %vm9297_vm9, %v1879_v48, %v9526_v47  ;;  %v9528_v3 = vld [vmem:[#allocation18_spill] sm:$0xff]  ;;  %v4931_v48 = vunpack.i.h.bf16 %v6870_v16  ;;  %vm9531_vm5 = vmmov %vm9530_vm0 }
 0x148   :  { %v960_v51 = vsel %vm9297_vm9, %v948_v40, %v6203_v0  ;;  %v4926_v49 = vunpack.i.h.bf16 %v6881_v14  ;;  %vm9532_vm8 = vmmov %vm9530_vm0 }
 0x149   :  { %v6894_v37 = vpop.permute.xlu1 %862  ;;  %v968_v50 = vsel %vm5885_vm1, %v960_v51, %v6203_v0  ;;  %v4925_v0 = vunpack.i.l.bf16 %v6881_v14 }
 0x14a   :  { %1734 = vrot.lane.b32.xlu0 %v9512_v56, %s5291_s25  ;;  %v956_v56 = vsel %vm9297_vm9, %v947_v59, %v6518_v17  ;;  %v833_v59 = vsel %vm9530_vm0, %v6819_v35, %v6845_v46  ;;  %vm9534_vm0 = vcmask 1045504  }
 0x14b   :  { %v6904_v63 = vpop.permute.xlu0 %860  ;;  %1738 = vrot.lane.b32.xlu1 %v6042_v25, %s5291_s25  ;;  %v783_v25 = vsel %vm100_vm7, %v776_v31, %v6753_v11  ;;  %v1904_v11 = vsel %vm9296_vm12, %v1897_v41, %v6768_v52  ;;  %v1893_v31 = vsel %vm9297_vm9, %v1882_v24, %v9478_v55  ;;  %v9521_v52 = vld [vmem:[#allocation13_spill] sm:$0xff]  ;;  %v9523_v55 = vld [vmem:[#allocation3_spill] sm:$0xff] }
 0x14c   :  { %v932_v62 = vsel %vm9522_vm13, %v9521_v52, %v783_v25  ;;  %v1902_v8 = vsel %vm9296_vm12, %v1896_v33, %v9523_v55  ;;  %v1898_v54 = vsel %vm5885_vm1, %v1893_v31, %v6734_v43  ;;  %v9527_v43 = vld [vmem:[#allocation12_spill] sm:$0xff]  ;;  %v967_v25 = vsel %vm5885_vm1, %v956_v56, %v6518_v17 }
 0x14d   :  { %v6922_v57 = vpop.permute.xlu1 %1322  ;;  %v1906_v15 = vsel %vm9296_vm12, %v1898_v54, %v6356_v13  ;;  %v946_v30 = vsel %vm5832_vm14, %v932_v62, %v9450_v18  ;;  %v1895_v12 = vsel %vm5885_vm1, %v1884_v44, %v9527_v43  ;;  %v964_v13 = vsel %vm9297_vm9, %v949_v22, %v9457_v19 }
 0x14e   :  { %1732 = vrot.lane.b32.xlu0 %v9514_v21, %s5291_s25  ;;  %v1900_v6 = vsel %vm9296_vm12, %v1895_v12, %v9528_v3  ;;  %v952_v18 = vsel %vm9297_vm9, %v946_v30, %v6620_v38  ;;  %v2021_v21 = vld [vmem:[%s9143_s2] sm:$0x3f]  ;;  %v969_v41 = vsel %vm5885_vm1, %v964_v13, %v9457_v19  ;;  %v976_v23 = vsel %vm9296_vm12, %v967_v25, %v6596_v7  ;;  %s5294_s2 = smov 109  }
 0x14f   :  { %v6944_v36 = vpop.permute.xlu0 %1320  ;;  %1915 = vrot.lane.b32.xlu1 %v1904_v11, %s5293_s1  ;;  %v966_v17 = vsel %vm5885_vm1, %v952_v18, %v6620_v38  ;;  %v984_v31 = vsel %vm9296_vm12, %v969_v41, %v9447_v39  ;;  %v980_v19 = vsel %vm9296_vm12, %v968_v50, %v9529_v42  ;;  %v987_v38 = vsel %vm6542_vm3, %v976_v23, %v6596_v7  ;;  %v9540_v18 = vld [vmem:[#allocation24_spill] sm:$0xff] }
 0x150   :  { %v972_v53 = vsel %vm9296_vm12, %v966_v17, %v6692_v1  ;;  %v989_v52 = vsel %vm6542_vm3, %v984_v31, %v9447_v39  ;;  %v4930_v62 = vunpack.i.l.bf16 %v6870_v16  ;;  %v988_v7 = vsel %vm6542_vm3, %v980_v19, %v9529_v42  ;;  %v9550_v19 = vld [vmem:[#allocation25_spill] sm:$0xff] }
 0x151   :  { %v6957_v9 = vpop.permute.xlu1 %864  ;;  %v1004_v28 = vsel %vm9295_vm10, %v989_v52, %v6851_v4  ;;  %v832_v22 = vsel %vm9532_vm8, %v6862_v10, %v6819_v35  ;;  %v986_v39 = vsel %vm6542_vm3, %v972_v53, %v6692_v1  ;;  %vm9533_vm13 = vcmask 908288  }
 0x152   :  { %1913 = vrot.lane.b32.xlu0 %v1902_v8, %s5293_s1  ;;  %v834_v8 = vsel %vm9531_vm5, %v6845_v46, %v6851_v4  ;;  %v848_v16 = vsel %vm9533_vm13, %v4925_v0, %v4926_v49  ;;  %v1009_v46 = vsel %vm6586_vm11, %v1004_v28, %v4931_v48  ;;  %v996_v40 = vsel %vm9295_vm10, %v987_v38, %v833_v59  ;;  %vm9535_vm5 = vmmov %vm9533_vm13 }
 0x153   :  { %v859_v24 = vpop.permute.xlu0 %858  ;;  %1917 = vrot.lane.b32.xlu1 %v1906_v15, %s5293_s1  ;;  %v1024_v4 = vsel %vm9534_vm0, %v1009_v46, %v6957_v9  ;;  %v1000_v35 = vsel %vm9295_vm10, %v988_v7, %v834_v8  ;;  %v992_v10 = vsel %vm9295_vm10, %v986_v39, %v832_v22  ;;  %v847_v1 = vsel %vm9535_vm5, %v4930_v62, %v4925_v0  ;;  %vm9536_vm8 = vmmov %vm9535_vm5 }
 0x154   :  { %v849_v30 = vsel %vm9536_vm8, %v4926_v49, %v4931_v48  ;;  %v1007_v43 = vsel %vm6586_vm11, %v996_v40, %v848_v16  ;;  %vm9537_vm13 = vmmov %vm9535_vm5  ;;  %vm9538_vm0 = vcmask 1046528   ;;  %vm9541_vm8 = vcmask 900096  }
 0x155   :  { %v6985_v29 = vpop.permute.xlu1 %1318  ;;  %v866_v12 = vsel %vm9537_vm13, %v859_v24, %v6904_v63  ;;  %vm9539_vm15 = vmmov %vm9535_vm5  ;;  %v1006_v24 = vsel %vm6586_vm11, %v992_v10, %v847_v1  ;;  %v9559_v1 = vld [vmem:[#allocation79_spill] sm:$0xff] }
 0x156   :  { %1911 = vrot.lane.b32.xlu0 %v1900_v6, %s5293_s1  ;;  %v867_v3 = vsel %vm9539_vm15, %v6904_v63, %v6894_v37  ;;  %v868_v6 = vsel %vm9535_vm5, %v6894_v37, %v6957_v9  ;;  %vm9542_vm13 = vmmov %vm9541_vm8  ;;  %v1008_v37 = vsel %vm6586_vm11, %v1000_v35, %v849_v30  ;;  %vm9545_vm5 = vcmask 1045504  }
 0x157   :  { %v4934_v33 = vpop.permute.xlu0 %4933  ;;  %v1012_v9 = vsel %vm9545_vm5, %v1006_v24, %v866_v12  ;;  %vm9549_vm9 = vmmov %vm9545_vm5  ;;  %v1326_v10 = vsel %vm100_vm7, %v6985_v29, %v6944_v36  ;;  %v1327_v30 = vsel %vm100_vm7, %v6944_v36, %v6922_v57  ;;  %v9567_v36 = vld [vmem:[#allocation61_spill] sm:$0xff]  ;;  %v9569_v24 = vld [vmem:[#allocation8_spill] sm:$0xff] }
 0x158   :  { %v4936_v15 = vunpack.i.h.bf16 %v4934_v33  ;;  %v4935_v47 = vunpack.i.l.bf16 %v4934_v33  ;;  %v1020_v31 = vsel %vm9549_vm9, %v1008_v37, %v868_v6 }
 0x159   :  { %v4939_v11 = vpop.permute.xlu1 %4938 }
 0x15a   :  { %2024 = vperm.xlu0 %4982, %v2021_v21   ;;  %v4941_v14 = vunpack.i.h.bf16 %v4939_v11  ;;  %v4940_v54 = vunpack.i.l.bf16 %v4939_v11 }
 0x15b   :  { %v7014_v45 = vpop.permute.xlu0 %1324 }
 0x15c   :  { %v1029_v56 = vsel %vm6639_vm2, %v1024_v4, %v4941_v14  ;;  %v877_v21 = vsel %vm9541_vm8, %v4940_v54, %v4935_v47  ;;  %v879_v41 = vsel %vm9542_vm13, %v4936_v15, %v4941_v14  ;;  %vm9551_vm13 = vcmask 916480  }
 0x15d   :  { %v889_v55 = vpop.permute.xlu1 %888  ;;  %v1026_v42 = vsel %vm6639_vm2, %v1012_v9, %v877_v21  ;;  %v1028_v38 = vsel %vm6639_vm2, %v1020_v31, %v879_v41  ;;  %v9571_v9 = vld [vmem:[#allocation49_spill] sm:$0xff]  ;;  %v9574_v31 = vld [vmem:[#allocation71_spill] sm:$0xff] }
 0x15f   :  { %v887_v58 = vpop.permute.xlu0 %886 }
 0x161   :  { %v891_v44 = vpop.permute.xlu1 %890 }
 0x162   :  { %v1044_v13 = vsel %vm9538_vm0, %v1029_v56, %v891_v44  ;;  %vm9543_vm0 = vmmov %vm9541_vm8 }
 0x163   :  { %v885_v51 = vpop.permute.xlu0 %884  ;;  %v1049_v25 = vsel %vm6662_vm6, %v1044_v13, %v9540_v18  ;;  %vm9544_vm15 = vmmov %vm9543_vm0 }
 0x164   :  { %v892_v33 = vsel %vm9543_vm0, %v885_v51, %v887_v58  ;;  %1273 = vmatprep.subr.bf16.mxu1 %v1049_v25  ;;  %v878_v63 = vsel %vm9544_vm15, %v4935_v47, %v4936_v15  ;;  %vm9546_vm10 = vmmov %vm9543_vm0  ;;  %v1328_v47 = vsel %vm100_vm7, %v6922_v57, %v7014_v45  ;;  %v9566_v25 = vld [vmem:[#allocation68_spill] sm:$0xff] }
 0x165   :  { %v893_v50 = vsel %vm9546_vm10, %v887_v58, %v889_v55  ;;  %vm9547_vm12 = vmmov %vm9543_vm0  ;;  %v896_v17 = vpop.permute.xlu1 %895  ;;  %vm9552_vm10 = vcmask 1046528  }
 0x166   :  { %v894_v23 = vsel %vm9547_vm12, %v889_v55, %v891_v44  ;;  %vm9548_vm8 = vmmov %vm9545_vm5  ;;  %v899_v48 = vsel %vm9551_vm13, %v896_v17, %v9550_v19  ;;  %v1032_v53 = vsel %vm9552_vm10, %v1026_v42, %v892_v33  ;;  %vm9557_vm5 = vcmask 908288   ;;  %v9573_v17 = vld [vmem:[#allocation60_spill] sm:$0xff] }
 0x167   :  { %v1016_v11 = vsel %vm9548_vm8, %v1007_v43, %v867_v3  ;;  %v898_v49 = vpop.permute.xlu0 %897  ;;  %vm9553_vm12 = vmmov %vm9551_vm13  ;;  %v1046_v28 = vsel %vm6662_vm6, %v1032_v53, %v899_v48  ;;  %vm9560_vm13 = vcmask 1041408   ;;  %v9561_v43 = vld [vmem:[#allocation70_spill] sm:$0xff] }
 0x168   :  { %v1027_v0 = vsel %vm6639_vm2, %v1016_v11, %v878_v63  ;;  %v7092_v59 = vsel %vm9553_vm12, %v898_v49, %v9540_v18  ;;  %vm9554_vm9 = vmmov %vm9553_vm12  ;;  %v1404_v44 = vsel %vm9560_vm13, %v9559_v1, %v7014_v45  ;;  %v9564_v45 = vld [vmem:[#allocation74_spill] sm:$0xff]  ;;  %v9570_v63 = vld [vmem:[#allocation72_spill] sm:$0xff] }
 0x169   :  { %v900_v52 = vsel %vm9554_vm9, %v9550_v19, %v898_v49  ;;  %vm9555_vm0 = vmmov %vm9552_vm10  ;;  %v1212_v55 = vpop.permute.xlu1 %1211  ;;  %v1409_v57 = vsel %vm5832_vm14, %v1404_v44, %v9566_v25  ;;  %v9576_v49 = vld [vmem:[#allocation75_spill] sm:$0xff]  ;;  %v9588_v1 = vld [vmem:[#allocation64_spill] sm:$0xff] }
 0x16a   :  { %v1036_v62 = vsel %vm9555_vm0, %v1027_v0, %v893_v50  ;;  %vm9556_vm15 = vmmov %vm9555_vm0  ;;  %v9589_v44 = vld [vmem:[#allocation76_spill] sm:$0xff] }
 0x16b   :  { %v1040_v14 = vsel %vm9556_vm15, %v1028_v38, %v894_v23  ;;  %v1047_v8 = vsel %vm6662_vm6, %v1036_v62, %v900_v52  ;;  %v4944_v22 = vpop.permute.xlu0 %4943  ;;  %vm9558_vm8 = vmmov %vm9557_vm5  ;;  %vm9572_vm15 = vcmask 1042432   ;;  %v9578_v38 = vld [vmem:[#allocation69_spill] sm:$0xff] }
 0x16c   :  { %v1048_v7 = vsel %vm6662_vm6, %v1040_v14, %v7092_v59  ;;  %1232 = vmatprep.subr.bf16.mxu0 %v1047_v8  ;;  %vm9562_vm10 = vmmov %vm9560_vm13  ;;  %v1420_v50 = vsel %vm9572_vm15, %v1409_v57, %v9571_v9  ;;  %v4946_v52 = vunpack.i.h.bf16 %v4944_v22  ;;  %v9579_v14 = vld [vmem:[#allocation62_spill] sm:$0xff]  ;;  %v9581_v8 = vld [vmem:[#allocation73_spill] sm:$0xff] }
 0x16d   :  { %1274 = vmatpush1.bf16.msra.mxu1 %v1048_v7  ;;  %1233 = vmatpush1.bf16.msra.mxu0 %v1046_v28  ;;  %v4949_v39 = vpop.permute.xlu1 %4948  ;;  %v1401_v12 = vsel %vm9562_vm10, %v9561_v43, %v1328_v47  ;;  %vm9563_vm12 = vmmov %vm9557_vm5  ;;  %v1425_v53 = vsel %vm5885_vm1, %v1420_v50, %v9578_v38  ;;  %v4945_v28 = vunpack.i.l.bf16 %v4944_v22 }
 0x16e   :  { %vm9565_vm9 = vmmov %vm9562_vm10  ;;  %v1408_v41 = vsel %vm5832_vm14, %v1401_v12, %v9569_v24  ;;  %v4951_v19 = vunpack.i.h.bf16 %v4949_v39  ;;  %v4950_v62 = vunpack.i.l.bf16 %v4949_v39  ;;  %vm9582_vm10 = vcmask 900096  }
 0x16f   :  { %v1214_v16 = vpop.permute.xlu0 %1213  ;;  %v1395_v51 = vsel %vm9565_vm9, %v9564_v45, %v1326_v10  ;;  %vm9568_vm0 = vmmov %vm9565_vm9  ;;  %vm9586_vm9 = vcmask 1043456  }
 0x170   :  { %v1218_v46 = vsel %vm9557_vm5, %v1212_v55, %v1214_v16  ;;  %v1398_v21 = vsel %vm9568_vm0, %v9567_v36, %v1327_v30  ;;  %v1406_v37 = vsel %vm5832_vm14, %v1395_v51, %v9570_v63  ;;  %vm9575_vm5 = vmmov %vm9572_vm15  ;;  %v9597_v36 = vld [vmem:[#allocation66_spill] sm:$0xff] }
 0x171   :  { %v1210_v54 = vpop.permute.xlu1 %1209  ;;  %v1224_v58 = vand.u32 %v1218_v46, %v6731_v5  ;;  %v1407_v11 = vsel %vm5832_vm14, %v1398_v21, %v9573_v17  ;;  %v1417_v42 = vsel %vm9575_vm5, %v1408_v41, %v9574_v31  ;;  %vm9580_vm13 = vmmov %vm9575_vm5  ;;  %v1343_v46 = vsel %vm9582_vm10, %v4946_v52, %v4951_v19 }
 0x172   :  { %v1217_v40 = vsel %vm9558_vm8, %v1210_v54, %v1212_v55  ;;  %vm9577_vm8 = vmmov %vm9575_vm5  ;;  %v1414_v55 = vsel %vm9580_vm13, %v1407_v11, %v9579_v14  ;;  %v1424_v7 = vsel %vm5885_vm1, %v1417_v42, %v9581_v8  ;;  %v9583_v54 = vld [vmem:[#allocation77_spill] sm:$0xff] }
 0x173   :  { %v1221_v4 = vand.u32 %v1217_v40, %v6731_v5  ;;  %v1349_v15 = vpop.permute.xlu0 %1348  ;;  %1234 = vmatprep.subr.bf16.mxu0 %v1224_v58  ;;  %v1411_v0 = vsel %vm9577_vm8, %v1406_v37, %v9576_v49  ;;  %vm9587_vm0 = vmmov %vm9582_vm10  ;;  %v1423_v22 = vsel %vm5885_vm1, %v1414_v55, %v9588_v1  ;;  %vm9592_vm8 = vcmask 1044480  }
 0x174   :  { %v1422_v58 = vsel %vm5885_vm1, %v1411_v0, %v9583_v54  ;;  %v1341_v10 = vsel %vm9587_vm0, %v4950_v62, %v4945_v28  ;;  %vm9590_vm15 = vmmov %vm9586_vm9  ;;  %v1430_v21 = vsel %vm9586_vm9, %v1423_v22, %v9597_v36 }
 0x175   :  { %v7112_v35 = vpop.permute.xlu1 %1350  ;;  %1235 = vmatpush1.bf16.msra.mxu0 %v1221_v4  ;;  %v9585_v4 = vld [vmem:[#allocation51_spill] sm:$0xff]  ;;  %vm9591_vm5 = vmmov %vm9587_vm0  ;;  %vm9598_vm0 = vcmask 908288  }
 0x176   :  { %v1436_v39 = vsel %vm9586_vm9, %v1425_v53, %v9585_v4  ;;  %v1342_v43 = vsel %vm9591_vm5, %v4945_v28, %v4946_v52  ;;  %vm9594_vm13 = vmmov %vm9586_vm9  ;;  %vm9600_vm5 = vcmask 1045504   ;;  %v9610_v28 = vld [vmem:[#allocation28_spill] sm:$0xff] }
 0x177   :  { %v1216_v56 = vpop.permute.xlu0 %1215  ;;  %v1441_v30 = vsel %vm6542_vm3, %v1436_v39, %v4951_v19  ;;  %v1439_v63 = vsel %vm6542_vm3, %v1430_v21, %v1342_v43  ;;  %vm9605_vm9 = vmmov %vm9600_vm5 }
 0x178   :  { %v1219_v13 = vsel %vm9563_vm12, %v1214_v16, %v1216_v56  ;;  %v1230_v3 = vand.u32 %v1216_v56, %v6731_v5  ;;  %4572 = vmatmul.mubr.msk.bf16.vlgmr.msra.gmra.mrb[0].mxu0 %vm626_vm4, %v6793_v26  ;;  %vm9584_vm12 = vcmask 916480   ;;  %v1433_v56 = vsel %vm9590_vm15, %v1424_v7, %v9589_v44  ;;  %vm9599_vm15 = vmmov %vm9592_vm8 }
 0x179   :  { %v1227_v29 = vand.u32 %v1219_v13, %v6731_v5  ;;  %v1362_v6 = vpop.permute.xlu1 %1361  ;;  %1600 = vmatprep.mubr.bf16.mxu0 %v9492_v60  ;;  %v1353_v40 = vsel %vm9584_vm12, %v1349_v15, %v7112_v35  ;;  %v1440_v12 = vsel %vm6542_vm3, %v1433_v56, %v1343_v46  ;;  %v1456_v13 = vsel %vm9592_vm8, %v1441_v30, %v7112_v35  ;;  %vm9595_vm10 = vmmov %vm9584_vm12 }
 0x17a   :  { %1275 = vmatprep.subr.bf16.mxu1 %v1230_v3  ;;  %v1352_v51 = vsel %vm9595_vm10, %v9540_v18, %v1349_v15  ;;  %vm9596_vm12 = vmmov %vm9592_vm8  ;;  %v1461_v37 = vsel %vm6586_vm11, %v1456_v13, %v7112_v35 }
 0x17b   :  { %v1360_v33 = vpop.permute.xlu0 %1359  ;;  %1276 = vmatpush1.bf16.msra.mxu1 %v1227_v29  ;;  %v9593_v29 = vld [vmem:[#allocation78_spill] sm:$0xff]  ;;  %v1452_v25 = vsel %vm9596_vm12, %v1440_v12, %v1353_v40  ;;  %v1448_v18 = vsel %vm9599_vm15, %v1439_v63, %v1352_v51  ;;  %vm9601_vm8 = vmmov %vm9598_vm0  ;;  %vm9608_vm15 = vcmask 900096  }
 0x17c   :  { %v1427_v45 = vsel %vm9594_vm13, %v1422_v58, %v9593_v29  ;;  %v1460_v15 = vsel %vm6586_vm11, %v1452_v25, %v1353_v40  ;;  %v1366_v17 = vsel %vm9601_vm8, %v1360_v33, %v1362_v6  ;;  %vm9602_vm13 = vmmov %vm9600_vm5  ;;  %v1459_v35 = vsel %vm6586_vm11, %v1448_v18, %v1352_v51 }
 0x17d   :  { %v7146_v23 = vpop.permute.xlu1 %1658  ;;  %v1438_v57 = vsel %vm6542_vm3, %v1427_v45, %v1341_v10  ;;  %vm9603_vm10 = vmmov %vm9596_vm12  ;;  %v1468_v0 = vsel %vm9605_vm9, %v1459_v35, %v1366_v17  ;;  %vm9611_vm8 = vcmask 1046528  }
 0x17e   :  { %4573 = vmatmul.mubr.msk.bf16.vlgmr.msra.gmra.mrb[8].mxu1 %vm626_vm4, %v6793_v26  ;;  %v1444_v31 = vsel %vm9603_vm10, %v1438_v57, %v7092_v59  ;;  %vm9604_vm12 = vmmov %vm9598_vm0 }
 0x17f   :  { %v7155_v48 = vpop.permute.xlu0 %1656  ;;  %1641 = vmatprep.mubr.bf16.mxu1 %v9492_v60  ;;  %vm9612_vm10 = vmmov %vm9611_vm8 }
 0x180   :  { %vm9615_vm9 = vmmov %vm9611_vm8 }
 0x181   :  { %v1364_v16 = vpop.permute.xlu1 %1363 }
 0x182   :  { %v1367_v24 = vsel %vm9598_vm0, %v1362_v6, %v1364_v16  ;;  %v1476_v9 = vsel %vm9600_vm5, %v1461_v37, %v1364_v16  ;;  %v1458_v6 = vsel %vm6586_vm11, %v1444_v31, %v7092_v59  ;;  %vm9606_vm0 = vmmov %vm9600_vm5  ;;  %v1479_v59 = vsel %vm6639_vm2, %v1468_v0, %v1366_v17  ;;  %v9616_v31 = vld [vmem:[#allocation35_spill] sm:$0xff]  ;;  %v9618_v0 = vld [vmem:[#allocation50_spill] sm:$0xff] }
 0x183   :  { %v1358_v47 = vpop.permute.xlu0 %1357  ;;  %v1472_v11 = vsel %vm9602_vm13, %v1460_v15, %v1367_v24  ;;  %v1481_v49 = vsel %vm6639_vm2, %v1476_v9, %v1364_v16  ;;  %vm9609_vm5 = vmmov %vm9608_vm15  ;;  %vm1386_vm13 = vcmask 785408  }
 0x184   :  { %v1365_v42 = vsel %vm9604_vm12, %v1358_v47, %v1360_v33  ;;  %v1480_v53 = vsel %vm6639_vm2, %v1472_v11, %v1367_v24  ;;  %v9607_v33 = vld [vmem:[#allocation29_spill] sm:$0xff]  ;;  %v1495_v16 = vsel %vm9611_vm8, %v1481_v49, %v9610_v28  ;;  %v9613_v47 = vld [vmem:[#allocation48_spill] sm:$0xff]  ;;  %vm9614_vm12 = vmmov %vm9611_vm8 }
 0x185   :  { %v7189_v3 = vpop.permute.xlu1 %1660  ;;  %v1464_v52 = vsel %vm9606_vm0, %v1458_v6, %v1365_v42  ;;  %v1491_v10 = vsel %vm9614_vm12, %v1480_v53, %v9613_v47  ;;  %vm9617_vm0 = vcmask 1041408  }
 0x186   :  { %v1478_v40 = vsel %vm6639_vm2, %v1464_v52, %v1365_v42  ;;  %v9621_v52 = vld [vmem:[#allocation42_spill] sm:$0xff]  ;;  %vm9624_vm8 = vmmov %vm9617_vm0 }
 0x187   :  { %v7201_v41 = vpop.permute.xlu0 %1654 }
 0x188   :  { %v1662_v35 = vsel %vm100_vm7, %v7201_v41, %v7155_v48 }
 0x189   :  { %v1373_v50 = vpop.permute.xlu1 %1372 }
 0x18b   :  { %v1375_v19 = vpop.permute.xlu0 %1374 }
 0x18c   :  { %v1377_v62 = vsel %vm9608_vm15, %v1375_v19, %v9607_v33  ;;  %v1376_v8 = vsel %vm9609_vm5, %v1373_v50, %v1375_v19  ;;  %v1663_v50 = vsel %vm100_vm7, %v7155_v48, %v7146_v23  ;;  %v1664_v19 = vsel %vm100_vm7, %v7146_v23, %v7189_v3  ;;  %vm9619_vm15 = vmmov %vm9617_vm0 }
 0x18d   :  { %v4959_v38 = vpop.permute.xlu1 %4958  ;;  %v1488_v39 = vsel %vm9612_vm10, %v1479_v59, %v1377_v62  ;;  %v1484_v56 = vsel %vm9615_vm9, %v1478_v40, %v1376_v8  ;;  %v1751_v42 = vsel %vm9617_vm0, %v9616_v31, %v1663_v50  ;;  %v1757_v6 = vsel %vm9619_vm15, %v9618_v0, %v7189_v3  ;;  %vm9622_vm5 = vmmov %vm9617_vm0  ;;  %v9626_v8 = vld [vmem:[#allocation38_spill] sm:$0xff]  ;;  %v9628_v3 = vld [vmem:[#allocation39_spill] sm:$0xff] }
 0x18e   :  { %v4961_v14 = vunpack.i.h.bf16 %v4959_v38  ;;  %v4960_v55 = vunpack.i.l.bf16 %v4959_v38  ;;  %v9620_v38 = vld [vmem:[#allocation32_spill] sm:$0xff]  ;;  %v1754_v33 = vsel %vm9622_vm5, %v9621_v52, %v1664_v19  ;;  %vm9627_vm10 = vcmask 1042432   ;;  %v9632_v40 = vld [vmem:[#allocation45_spill] sm:$0xff]  ;;  %v9642_v50 = vld [vmem:[#allocation47_spill] sm:$0xff] }
 0x18f   :  { %v4954_v7 = vpop.permute.xlu0 %4953  ;;  %v1760_v53 = vsel %vm5832_vm14, %v1751_v42, %v9620_v38  ;;  %v1761_v28 = vsel %vm5832_vm14, %v1754_v33, %v9628_v3  ;;  %vm9631_vm12 = vmmov %vm9627_vm10  ;;  %vm9638_vm15 = vcmask 916480  }
 0x190   :  { %v4956_v46 = vunpack.i.h.bf16 %v4954_v7  ;;  %v4955_v54 = vunpack.i.l.bf16 %v4954_v7  ;;  %v1500_v58 = vsel %vm6662_vm6, %v1495_v16, %v4961_v14  ;;  %v1767_v7 = vsel %vm9627_vm10, %v1760_v53, %v9626_v8  ;;  %v9629_v16 = vld [vmem:[#allocation43_spill] sm:$0xff]  ;;  %vm9633_vm9 = vmmov %vm9627_vm10 }
 0x191   :  { %v1550_v4 = vpop.permute.xlu1 %1549  ;;  %1609 = vmatprep.subr.bf16.mxu1 %v1500_v58  ;;  %vm9635_vm0 = vmmov %vm9633_vm9 }
 0x192   :  { %v1388_v1 = vsel %vm1386_vm13, %v4955_v54, %v4956_v46  ;;  %v1389_v22 = vsel %vm1386_vm13, %v4956_v46, %v4961_v14  ;;  %v1387_v44 = vsel %vm1386_vm13, %v4960_v55, %v4955_v54  ;;  %v9623_v14 = vld [vmem:[#allocation44_spill] sm:$0xff]  ;;  %v9625_v55 = vld [vmem:[#allocation26_spill] sm:$0xff]  ;;  %v9630_v54 = vld [vmem:[#allocation27_spill] sm:$0xff] }
 0x193   :  { %v1548_v30 = vpop.permute.xlu0 %1547  ;;  %v1498_v43 = vsel %vm6662_vm6, %v1488_v39, %v1388_v1  ;;  %v1499_v12 = vsel %vm6662_vm6, %v1491_v10, %v1389_v22  ;;  %v1497_v13 = vsel %vm6662_vm6, %v1484_v56, %v1387_v44  ;;  %v1748_v23 = vsel %vm9624_vm8, %v9623_v14, %v1662_v35  ;;  %v9634_v1 = vld [vmem:[#allocation46_spill] sm:$0xff] }
 0x194   :  { %v1554_v29 = vsel %vm1386_vm13, %v1548_v30, %v1550_v4  ;;  %1568 = vmatprep.subr.bf16.mxu0 %v1498_v43  ;;  %1610 = vmatpush1.bf16.msra.mxu1 %v1499_v12  ;;  %v1762_v48 = vsel %vm5832_vm14, %v1757_v6, %v9625_v55  ;;  %v1759_v59 = vsel %vm5832_vm14, %v1748_v23, %v9629_v16  ;;  %v9636_v43 = vld [vmem:[#allocation41_spill] sm:$0xff]  ;;  %vm9637_vm14 = vcmask 1043456  }
 0x195   :  { %v7253_v45 = vpop.permute.xlu1 %1673  ;;  %1569 = vmatpush1.bf16.msra.mxu0 %v1497_v13  ;;  %v1560_v51 = vand.u32 %v1554_v29, %v6731_v5  ;;  %v1773_v58 = vsel %vm9631_vm12, %v1762_v48, %v9630_v54  ;;  %v1776_v39 = vsel %vm5885_vm1, %v1767_v7, %v9626_v8  ;;  %v1764_v22 = vsel %vm9635_vm0, %v1759_v59, %v9634_v1  ;;  %vm9640_vm5 = vmmov %vm9637_vm14 }
 0x196   :  { %v1778_v34 = vsel %vm5885_vm1, %v1773_v58, %v9630_v54  ;;  %v1783_v12 = vsel %vm9637_vm14, %v1776_v39, %v9636_v43  ;;  %vm9641_vm8 = vcmask 908288   ;;  %vm9643_vm10 = vmmov %vm9640_vm5  ;;  %vm9644_vm12 = vcmask 1044480  }
 0x197   :  { %1570 = vmatprep.subr.bf16.mxu0 %v1560_v51  ;;  %v1775_v51 = vsel %vm5885_vm1, %v1764_v22, %v9634_v1  ;;  %vm9647_vm0 = vmmov %vm9638_vm15 }
 0x198   :  { %v7256_v25 = vpop.permute.xlu0 %1671  ;;  %vm9648_vm14 = vmmov %vm9647_vm0 }
 0x199   :  { %v1552_v57 = vpop.permute.xlu1 %1551  ;;  %v1678_v29 = vsel %vm9638_vm15, %v7256_v25, %v7253_v45  ;;  %vm9649_vm15 = vcmask 900096  }
 0x19a   :  { %v1555_v36 = vsel %vm1386_vm13, %v1550_v4, %v1552_v57  ;;  %v1566_v21 = vand.u32 %v1552_v57, %v6731_v5  ;;  %v1770_v4 = vsel %vm9633_vm9, %v1761_v28, %v9632_v40  ;;  %vm9646_vm9 = vmmov %vm9641_vm8 }
 0x19b   :  { %v1563_v24 = vand.u32 %v1555_v36, %v6731_v5  ;;  %v1777_v13 = vsel %vm5885_vm1, %v1770_v4, %v9632_v40  ;;  %v9639_v36 = vld [vmem:[#allocation30_spill] sm:$0xff]  ;;  %vm9645_vm1 = vmmov %vm9640_vm5 }
 0x19c   :  { %v1546_v63 = vpop.permute.xlu0 %1545  ;;  %1611 = vmatprep.subr.bf16.mxu1 %v1566_v21  ;;  %v1789_v21 = vsel %vm9640_vm5, %v1778_v34, %v9639_v36  ;;  %v1780_v19 = vsel %vm9645_vm1, %v1775_v51, %v9613_v47  ;;  %vm9650_vm5 = vmmov %vm9644_vm12 }
 0x19d   :  { %v1553_v37 = vsel %vm1386_vm13, %v1546_v63, %v1548_v30  ;;  %v1676_v15 = vpop.permute.xlu1 %1675  ;;  %1612 = vmatpush1.bf16.msra.mxu1 %v1563_v24  ;;  %v1794_v35 = vsel %vm6542_vm3, %v1789_v21, %v9639_v36  ;;  %v1791_v55 = vsel %vm6542_vm3, %v1780_v19, %v9613_v47  ;;  %vm9653_vm1 = vmmov %vm9641_vm8 }
 0x19e   :  { %v1557_v18 = vand.u32 %v1553_v37, %v6731_v5  ;;  %v1679_v33 = vsel %vm9647_vm0, %v7253_v45, %v1676_v15  ;;  %vm9655_vm0 = vmmov %vm9650_vm5 }
 0x1a0   :  { %v1670_v9 = vpop.permute.xlu0 %1669  ;;  %1571 = vmatpush1.bf16.msra.mxu0 %v1557_v18  ;;  %4575 = vmatmul.mubr.msk.bf16.vlgmr.msra.gmra.mrb[12].mxu1 %vm626_vm4, %v6793_v26  ;;  %v1792_v18 = vsel %vm6542_vm3, %v1783_v12, %v9636_v43 }
 0x1a1   :  { %v7268_v17 = vpop.permute.xlu1 %4968  ;;  %2008 = vmatprep.mubr.bf16.mxu1 %v9492_v60  ;;  %v1801_v32 = vsel %vm9644_vm12, %v1792_v18, %v1678_v29  ;;  %v1677_v14 = vsel %vm9648_vm14, %v1670_v9, %v7256_v25  ;;  %vm9652_vm12 = vcmask 1045504   ;;  %vm9656_vm14 = vmmov %vm9649_vm15 }
 0x1a2   :  { %v4970_v31 = vunpack.i.l.bf16 %v7268_v17  ;;  %v4971_v0 = vunpack.i.h.bf16 %v7268_v17  ;;  %v1809_v17 = vsel %vm9650_vm5, %v1794_v35, %v1676_v15  ;;  %v1797_v9 = vsel %vm9655_vm0, %v1791_v55, %v1677_v14 }
 0x1a3   :  { %4574 = vmatmul.mubr.msk.bf16.vlgmr.msra.gmra.mrb[4].mxu0 %vm626_vm4, %v6793_v26 }
 0x1a4   :  { %v4964_v11 = vpop.permute.xlu0 %4963  ;;  %1967 = vmatprep.mubr.bf16.mxu0 %v9492_v60  ;;  %v1814_v54 = vsel %vm6586_vm11, %v1809_v17, %v4971_v0 }
 0x1a5   :  { %v1700_v49 = vpop.permute.xlu1 %1699  ;;  %v4966_v44 = vunpack.i.h.bf16 %v4964_v11  ;;  %v4965_v56 = vunpack.i.l.bf16 %v4964_v11  ;;  %v1786_v11 = vsel %vm9643_vm10, %v1777_v13, %v9642_v50  ;;  %vm9651_vm10 = vmmov %vm9641_vm8 }
 0x1a6   :  { %v1793_v52 = vsel %vm6542_vm3, %v1786_v11, %v9642_v50  ;;  %vm9657_vm3 = vmmov %vm9656_vm14 }
 0x1a7   :  { %v1689_v24 = vsel %vm9641_vm8, %v4965_v56, %v4966_v44  ;;  %v1688_v48 = vsel %vm9641_vm8, %v4970_v31, %v4965_v56  ;;  %v1690_v8 = vsel %vm9651_vm10, %v4966_v44, %v4971_v0  ;;  %vm9660_vm8 = vmmov %vm9653_vm1 }
 0x1a8   :  { %v1698_v62 = vpop.permute.xlu0 %1697  ;;  %v1812_v38 = vsel %vm6586_vm11, %v1801_v32, %v1689_v24  ;;  %vm9661_vm10 = vmmov %vm9657_vm3 }
 0x1a9   :  { %v1702_v41 = vpop.permute.xlu1 %1701  ;;  %v1704_v6 = vsel %vm9646_vm9, %v1698_v62, %v1700_v49  ;;  %vm9654_vm9 = vmmov %vm9650_vm5 }
 0x1aa   :  { %v1821_v3 = vsel %vm9652_vm12, %v1812_v38, %v1704_v6  ;;  %v1705_v45 = vsel %vm9653_vm1, %v1700_v49, %v1702_v41  ;;  %v1805_v25 = vsel %vm9654_vm9, %v1793_v52, %v1679_v33  ;;  %v1811_v49 = vsel %vm6586_vm11, %v1797_v9, %v1688_v48  ;;  %vm9659_vm5 = vmmov %vm9652_vm12 }
 0x1ab   :  { %v1813_v47 = vsel %vm6586_vm11, %v1805_v25, %v1690_v8  ;;  %v1829_v4 = vsel %vm9659_vm5, %v1814_v54, %v1702_v41  ;;  %vm9663_vm1 = vcmask 1046528   ;;  %vm9665_vm9 = vmmov %vm9657_vm3 }
 0x1ac   :  { %v1696_v46 = vpop.permute.xlu0 %1695  ;;  %vm9664_vm11 = vmmov %vm9663_vm1 }
 0x1ad   :  { %v4979_v10 = vpop.permute.xlu1 %4978  ;;  %v1703_v39 = vsel %vm9660_vm8, %v1696_v46, %v1698_v62  ;;  %vm9666_vm0 = vmmov %vm9659_vm5  ;;  %vm2087_vm5 = vcmask 1022976  }
 0x1ae   :  { %v4981_v28 = vunpack.i.h.bf16 %v4979_v10  ;;  %v4980_v16 = vunpack.i.l.bf16 %v4979_v10  ;;  %v1817_v46 = vsel %vm9666_vm0, %v1811_v49, %v1703_v39  ;;  %vm9671_vm8 = vmmov %vm9666_vm0  ;;  %vm9676_vm0 = vcmask 924672  }
 0x1b0   :  { %v4974_v30 = vpop.permute.xlu0 %4973  ;;  %v1834_v44 = vsel %vm6639_vm2, %v1829_v4, %v4981_v28 }
 0x1b1   :  { %v1726_v57 = vpop.permute.xlu1 %1725  ;;  %v4976_v63 = vunpack.i.h.bf16 %v4974_v30  ;;  %v4975_v37 = vunpack.i.l.bf16 %v4974_v30 }
 0x1b3   :  { %v1715_v23 = vsel %vm9649_vm15, %v4975_v37, %v4976_v63  ;;  %v1716_v58 = vsel %vm9657_vm3, %v4976_v63, %v4981_v28  ;;  %vm9658_vm15 = vmmov %vm9652_vm12 }
 0x1b4   :  { %v1724_v42 = vpop.permute.xlu0 %1723  ;;  %v1832_v20 = vsel %vm6639_vm2, %v1821_v3, %v1715_v23  ;;  %v1825_v40 = vsel %vm9658_vm15, %v1813_v47, %v1705_v45  ;;  %vm9662_vm12 = vmmov %vm9657_vm3  ;;  %vm1919_vm15 = vcmask 777216  }
 0x1b5   :  { %v1728_v53 = vpop.permute.xlu1 %1727  ;;  %v1730_v15 = vsel %vm9656_vm14, %v1724_v42, %v1726_v57  ;;  %v1714_v22 = vsel %vm9662_vm12, %v4980_v16, %v4975_v37  ;;  %v1833_v41 = vsel %vm6639_vm2, %v1825_v40, %v1716_v58  ;;  %vm9667_vm14 = vmmov %vm9663_vm1  ;;  %vm9672_vm12 = vcmask 908288  }
 0x1b6   :  { %v1731_v10 = vsel %vm9661_vm10, %v1726_v57, %v1728_v53  ;;  %v1841_v2 = vsel %vm9663_vm1, %v1832_v20, %v1730_v15  ;;  %v1849_v34 = vsel %vm9664_vm11, %v1834_v44, %v1728_v53  ;;  %v1831_v51 = vsel %vm6639_vm2, %v1817_v46, %v1714_v22  ;;  %vm9668_vm3 = vmmov %vm9663_vm1 }
 0x1b7   :  { %v1845_v29 = vsel %vm9667_vm14, %v1833_v41, %v1731_v10  ;;  %vm2160_vm2 = vcmask 891904   ;;  %vm2172_vm10 = vcmask 883712   ;;  %vm9673_vm1 = vcmask 916480   ;;  %vm9674_vm11 = vmmov %vm9665_vm9 }
 0x1b8   :  { %v1722_v7 = vpop.permute.xlu0 %1721  ;;  %vm9677_vm14 = vcmask 1044480  }
 0x1b9   :  { %v1737_v59 = vpop.permute.xlu1 %1736  ;;  %v1729_v30 = vsel %vm9665_vm9, %v1722_v7, %v1724_v42  ;;  %vm9675_vm9 = vcmask 1041408  }
 0x1ba   :  { %v1837_v21 = vsel %vm9668_vm3, %v1831_v51, %v1729_v30  ;;  %vm2230_vm3 = vcmask 752640  }
 0x1bc   :  { %v1735_v1 = vpop.permute.xlu0 %1734 }
 0x1bd   :  { %v1741_v56 = vsel %vm1386_vm13, %v1735_v1, %v1737_v59  ;;  %v1739_v43 = vpop.permute.xlu1 %1738 }
 0x1be   :  { %v1852_v62 = vsel %vm6662_vm6, %v1841_v2, %v1741_v56  ;;  %v1742_v12 = vsel %vm1386_vm13, %v1737_v59, %v1739_v43  ;;  %v1854_v13 = vsel %vm6662_vm6, %v1849_v34, %v1739_v43 }
 0x1bf   :  { %1935 = vmatprep.subr.bf16.mxu0 %v1852_v62  ;;  %1976 = vmatprep.subr.bf16.mxu1 %v1854_v13  ;;  %v1853_v36 = vsel %vm6662_vm6, %v1845_v29, %v1742_v12 }
 0x1c0   :  { %v1733_v57 = vpop.permute.xlu0 %1732  ;;  %1977 = vmatpush1.bf16.msra.mxu1 %v1853_v36 }
 0x1c1   :  { %v1740_v24 = vsel %vm1386_vm13, %v1733_v57, %v1735_v1  ;;  %v1916_v63 = vpop.permute.xlu1 %1915 }
 0x1c2   :  { %v1851_v37 = vsel %vm6662_vm6, %v1837_v21, %v1740_v24  ;;  %vm9669_vm6 = vcmask 1039360  }
 0x1c3   :  { %1936 = vmatpush1.bf16.msra.mxu0 %v1851_v37 }
 0x1c4   :  { %v1914_v18 = vpop.permute.xlu0 %1913 }
 0x1c5   :  { %v1921_v27 = vsel %vm1919_vm15, %v1914_v18, %v1916_v63  ;;  %v1918_v50 = vpop.permute.xlu1 %1917 }
 0x1c6   :  { %v1927_v11 = vand.u32 %v1921_v27, %v6731_v5  ;;  %v1922_v31 = vsel %vm1919_vm15, %v1916_v63, %v1918_v50  ;;  %v1933_v42 = vand.u32 %v1918_v50, %v6731_v5 }
 0x1c7   :  { %v1930_v32 = vand.u32 %v1922_v31, %v6731_v5 }
 0x1c8   :  { %v1912_v19 = vpop.permute.xlu0 %1911  ;;  %1937 = vmatprep.subr.bf16.mxu0 %v1927_v11  ;;  %1978 = vmatprep.subr.bf16.mxu1 %v1933_v42 }
 0x1c9   :  { %v1920_v35 = vsel %vm1919_vm15, %v1912_v19, %v1914_v18  ;;  %1979 = vmatpush1.bf16.msra.mxu1 %v1930_v32 }
 0x1ca   :  { %v1924_v61 = vand.u32 %v1920_v35, %v6731_v5 }
 0x1cc   :  { %1938 = vmatpush1.bf16.msra.mxu0 %v1924_v61  ;;  %4577 = vmatmul.mubr.msk.bf16.vlgmr.msra.gmra.mrb[16].mxu1 %vm626_vm4, %v6793_v26 }
 0x1cf   :  { %4576 = vmatmul.mubr.msk.bf16.vlgmr.msra.gmra.mrb[8].mxu0 %vm626_vm4, %v6793_v26  ;;  %vm9670_vm4 = vcmask 1042432  }
 0x1d9   :  { %v7422_v56 = vpop.permute.xlu0 %2024 }
 0x209   :  { %v678_v0 = vpop.f32.mrb[0].mxu1 }
 0x20a   :  { %v680_v6 = vpop.f32.mrb[1].mxu1 }
 0x20b   :  { %v682_v38 = vpop.f32.mrb[2].mxu1 }
 0x20c   :  { %v683_v53 = vpop.f32.mrb[3].mxu1 }
 0x219   :  { %v719_v52 = vpop.f32.mrb[4].mxu1 }
 0x21a   :  { %v721_v33 = vpop.f32.mrb[5].mxu1 }
 0x21b   :  { %v723_v14 = vpop.f32.mrb[6].mxu1 }
 0x21c   :  { %v724_v23 = vpop.f32.mrb[7].mxu1 }
 0x24b   :  { %v1266_v17 = vpop.f32.mrb[0].mxu0 }
 0x24c   :  { %v1268_v55 = vpop.f32.mrb[1].mxu0  ;;  %v1314_v48 = vmax.f32 %v678_v0, %v1266_v17 }
 0x24d   :  { %v1270_v5 = vpop.f32.mrb[2].mxu0  ;;  %v1315_v8 = vmax.f32 %v680_v6, %v1268_v55 }
 0x24e   :  { %v1271_v7 = vpop.f32.mrb[3].mxu0 }
 0x251   :  { %v1307_v3 = vpop.f32.mrb[8].mxu1 }
 0x252   :  { %v1316_v45 = vmax.f32 %v719_v52, %v1307_v3  ;;  %v1309_v28 = vpop.f32.mrb[9].mxu1 }
 0x253   :  { %v1317_v16 = vmax.f32 %v721_v33, %v1309_v28  ;;  %v1311_v25 = vpop.f32.mrb[10].mxu1 }
 0x254   :  { %v1312_v26 = vpop.f32.mrb[11].mxu1 }
 0x273   :  { %v1643_v9 = vpop.f32.mrb[12].mxu1 }
 0x274   :  { %v7412_v15 = vmax.f32 %v1316_v45, %v1643_v9  ;;  %v1645_v59 = vpop.f32.mrb[13].mxu1 }
 0x275   :  { %v7414_v47 = vmax.f32 %v1317_v16, %v1645_v59  ;;  %v1647_v54 = vpop.f32.mrb[14].mxu1 }
 0x276   :  { %v1602_v20 = vpop.f32.mrb[4].mxu0  ;;  %v1648_v40 = vpop.f32.mrb[15].mxu1 }
 0x277   :  { %v1650_v49 = vmax.f32 %v1314_v48, %v1602_v20  ;;  %v1604_v58 = vpop.f32.mrb[5].mxu0 }
 0x278   :  { %v1651_v4 = vmax.f32 %v1315_v8, %v1604_v58  ;;  %v1606_v39 = vpop.f32.mrb[6].mxu0 }
 0x279   :  { %v1607_v10 = vpop.f32.mrb[7].mxu0 }
 0x29f   :  { %v7416_v1 = vpop.f32.mrb[16].mxu1 }
 0x2a0   :  { %v2019_v22 = vmax.f32 %v7412_v15, %v7416_v1  ;;  %v7420_v44 = vpop.f32.mrb[17].mxu1 }
 0x2a1   :  { %v2020_v34 = vmax.f32 %v7414_v47, %v7420_v44  ;;  %v2014_v30 = vpop.f32.mrb[18].mxu1 }
 0x2a2   :  { %v1969_v2 = vpop.f32.mrb[8].mxu0  ;;  %v2015_v41 = vpop.f32.mrb[19].mxu1  ;;  %v2029_v38 = vadd.f32 %v7422_v56, %v2019_v22 }
 0x2a3   :  { %v2017_v43 = vmax.f32 %v1650_v49, %v1969_v2  ;;  %v1971_v62 = vpop.f32.mrb[9].mxu0  ;;  %v2030_v53 = vadd.f32 %v7422_v56, %v2020_v34 }
 0x2a4   :  { %v2018_v46 = vmax.f32 %v1651_v4, %v1971_v62  ;;  %v1973_v12 = vpop.f32.mrb[10].mxu0  ;;  %v2033_v52 = vmax.f32 %v2029_v38, 0.0 }
 0x2a5   :  { %v2027_v13 = vadd.f32 %v7422_v56, %v2017_v43  ;;  %v1974_v29 = vpop.f32.mrb[11].mxu0  ;;  %v2034_v33 = vmax.f32 %v2030_v53, 0.0 }
 0x2a6   :  { %v2028_v51 = vadd.f32 %v7422_v56, %v2018_v46  ;;  %v7486_v14 = vpack.c.bf16 %v2033_v52, %v2033_v52 }
 0x2a7   :  { %v2031_v57 = vmax.f32 %v2027_v13, 0.0  ;;  %v7491_v23 = vpack.c.bf16 %v2034_v33, %v2034_v33 }
 0x2a8   :  { %v2032_v36 = vmax.f32 %v2028_v51, 0.0  ;;  %v2109_v17 = vrot.slane %v7486_v14, 1  ;;  %v2047_v5 = vrot.slane %v7486_v14, 5  ;;  %v2062_v7 = vrot.slane %v7486_v14, 2 }
 0x2a9   :  { %v7428_v21 = vpack.c.bf16 %v2031_v57, %v2031_v57  ;;  %v2048_v55 = vrot.slane %v7491_v23, 5  ;;  %v2063_v48 = vrot.slane %v7491_v23, 2  ;;  %v2078_v8 = vrot.slane %v7491_v23, 7 }
 0x2aa   :  { %v7430_v24 = vpack.c.bf16 %v2032_v36, %v2032_v36  ;;  %v2094_v3 = vrot.slane %v7491_v23, 4  ;;  %v2077_v45 = vrot.slane %v7486_v14, 7  ;;  %v2125_v28 = vrot.slane %v7491_v23, 6 }
 0x2ab   :  { %2152 = vrot.lane.b32.xlu0 %v7428_v21, %s5294_s2  ;;  %v2091_v63 = vrot.slane %v7428_v21, 4  ;;  %v2045_v37 = vrot.slane %v7428_v21, 5  ;;  %v2060_v27 = vrot.slane %v7428_v21, 2  ;;  %v2075_v11 = vrot.slane %v7428_v21, 7 }
 0x2ac   :  { %2154 = vrot.lane.b32.xlu1 %v7430_v24, %s5294_s2  ;;  %v2061_v18 = vrot.slane %v7430_v24, 2  ;;  %v2076_v50 = vrot.slane %v7430_v24, 7  ;;  %v2092_v31 = vrot.slane %v7430_v24, 4  ;;  %v2107_v42 = vrot.slane %v7428_v21, 1 }
 0x2ad   :  { %v2123_v32 = vrot.slane %v7430_v24, 6  ;;  %v2122_v19 = vrot.slane %v7428_v21, 6  ;;  %v2138_v35 = vrot.slane %v7430_v24, 3  ;;  %v2137_v61 = vrot.slane %v7428_v21, 3 }
 0x2ae   :  { %v2046_v0 = vrot.slane %v7430_v24, 5  ;;  %v2108_v6 = vrot.slane %v7430_v24, 1  ;;  %v2093_v16 = vrot.slane %v7486_v14, 4  ;;  %v2140_v25 = vrot.slane %v7491_v23, 3 }
 0x2af   :  { %2390 = vrot.lane.b32.xlu0 %v2091_v63, %s5288_s23  ;;  %v2124_v26 = vrot.slane %v7486_v14, 6  ;;  %v2139_v9 = vrot.slane %v7486_v14, 3  ;;  %v2110_v15 = vrot.slane %v7491_v23, 1 }
 0x2b0   :  { %2049 = vrot.lane.b32.xlu1 %v2045_v37, %s5283_s0 }
 0x2b3   :  { %2066 = vrot.lane.b32.xlu0 %v2061_v18, %s5284_s19 }
 0x2b4   :  { %2064 = vrot.lane.b32.xlu1 %v2060_v27, %s5284_s19 }
 0x2b7   :  { %2081 = vrot.lane.b32.xlu0 %v2076_v50, %s5295_s30 }
 0x2b8   :  { %2079 = vrot.lane.b32.xlu1 %v2075_v11, %s5295_s30 }
 0x2bb   :  { %2392 = vrot.lane.b32.xlu0 %v2092_v31, %s5288_s23 }
 0x2bc   :  { %2111 = vrot.lane.b32.xlu1 %v2107_v42, %s5285_s20 }
 0x2bf   :  { %2128 = vrot.lane.b32.xlu0 %v2123_v32, %s5286_s21 }
 0x2c0   :  { %2126 = vrot.lane.b32.xlu1 %v2122_v19, %s5286_s21 }
 0x2c3   :  { %2143 = vrot.lane.b32.xlu0 %v2138_v35, %s5287_s22 }
 0x2c4   :  { %2141 = vrot.lane.b32.xlu1 %v2137_v61, %s5287_s22 }
 0x2c7   :  { %2097 = vrot.lane.b32.xlu0 %v2092_v31, %s5296_s12 }
 0x2c8   :  { %2095 = vrot.lane.b32.xlu1 %v2091_v63, %s5296_s12 }
 0x2cb   :  { %2166 = vrot.lane.b32.xlu0 %v2046_v0, %s5297_s13 }
 0x2cc   :  { %2164 = vrot.lane.b32.xlu1 %v2045_v37, %s5297_s13 }
 0x2cf   :  { %2178 = vrot.lane.b32.xlu0 %v2061_v18, %s5291_s25 }
 0x2d0   :  { %2176 = vrot.lane.b32.xlu1 %v2060_v27, %s5291_s25 }
 0x2d3   :  { %2189 = vrot.lane.b32.xlu0 %v2076_v50, %s5293_s1 }
 0x2d4   :  { %2187 = vrot.lane.b32.xlu1 %v2075_v11, %s5293_s1 }
 0x2d7   :  { %2200 = vrot.lane.b32.xlu0 %v2092_v31, %s5298_s14 }
 0x2d8   :  { %2198 = vrot.lane.b32.xlu1 %v2091_v63, %s5298_s14 }
 0x2db   :  { %2212 = vrot.lane.b32.xlu0 %v2108_v6, %s5299_s15 }
 0x2dc   :  { %2210 = vrot.lane.b32.xlu1 %v2107_v42, %s5299_s15 }
 0x2df   :  { %2224 = vrot.lane.b32.xlu0 %v2123_v32, %s5300_s16 }
 0x2e0   :  { %2222 = vrot.lane.b32.xlu1 %v2122_v19, %s5300_s16 }
 0x2e3   :  { %2236 = vrot.lane.b32.xlu0 %v2138_v35, %s5301_s17 }
 0x2e4   :  { %2234 = vrot.lane.b32.xlu1 %v2137_v61, %s5301_s17 }
 0x2e7   :  { %2156 = vrot.lane.b32.xlu0 %v7486_v14, %s5294_s2 }
 0x2e8   :  { %2051 = vrot.lane.b32.xlu1 %v2046_v0, %s5283_s0 }
 0x2eb   :  { %2115 = vrot.lane.b32.xlu0 %v2109_v17, %s5285_s20 }
 0x2ec   :  { %2113 = vrot.lane.b32.xlu1 %v2108_v6, %s5285_s20 }
 0x2ef   :  { %2055 = vrot.lane.b32.xlu0 %v2048_v55, %s5283_s0 }
 0x2f0   :  { %2158 = vrot.lane.b32.xlu1 %v7491_v23, %s5294_s2  ;;  %s5305_s2 = smov 59  }
 0x2f3   :  { %2070 = vrot.lane.b32.xlu0 %v2063_v48, %s5284_s19 }
 0x2f4   :  { %2053 = vrot.lane.b32.xlu1 %v2047_v5, %s5283_s0 }
 0x2f7   :  { %2085 = vrot.lane.b32.xlu0 %v2078_v8, %s5295_s30 }
 0x2f8   :  { %2068 = vrot.lane.b32.xlu1 %v2062_v7, %s5284_s19 }
 0x2fb   :  { %2396 = vrot.lane.b32.xlu0 %v2094_v3, %s5288_s23 }
 0x2fc   :  { %2083 = vrot.lane.b32.xlu1 %v2077_v45, %s5295_s30 }
 0x2ff   :  { %2132 = vrot.lane.b32.xlu0 %v2125_v28, %s5286_s21 }
 0x300   :  { %2394 = vrot.lane.b32.xlu1 %v2093_v16, %s5288_s23  ;;  %s5310_s23 = smov 65  }
 0x303   :  { %2147 = vrot.lane.b32.xlu0 %v2140_v25, %s5287_s22 }
 0x304   :  { %2130 = vrot.lane.b32.xlu1 %v2124_v26, %s5286_s21 }
 0x307   :  { %2101 = vrot.lane.b32.xlu0 %v2094_v3, %s5296_s12 }
 0x308   :  { %2145 = vrot.lane.b32.xlu1 %v2139_v9, %s5287_s22  ;;  %s5309_s22 = smov 29  }
 0x30b   :  { %2170 = vrot.lane.b32.xlu0 %v2048_v55, %s5297_s13 }
 0x30c   :  { %2099 = vrot.lane.b32.xlu1 %v2093_v16, %s5296_s12 }
 0x30f   :  { %2182 = vrot.lane.b32.xlu0 %v2063_v48, %s5291_s25 }
 0x310   :  { %2168 = vrot.lane.b32.xlu1 %v2047_v5, %s5297_s13  ;;  %s5306_s13 = smov 89  }
 0x313   :  { %2193 = vrot.lane.b32.xlu0 %v2078_v8, %s5293_s1 }
 0x314   :  { %2180 = vrot.lane.b32.xlu1 %v2062_v7, %s5291_s25 }
 0x317   :  { %2204 = vrot.lane.b32.xlu0 %v2094_v3, %s5298_s14 }
 0x318   :  { %2191 = vrot.lane.b32.xlu1 %v2077_v45, %s5293_s1 }
 0x31b   :  { %2216 = vrot.lane.b32.xlu0 %v2110_v15, %s5299_s15 }
 0x31c   :  { %2202 = vrot.lane.b32.xlu1 %v2093_v16, %s5298_s14 }
 0x31d   :  { %v2153_v59 = vpop.permute.xlu0 %2152 }
 0x31e   :  { %v7534_v20 = vpop.permute.xlu1 %2154 }
 0x31f   :  { %2228 = vrot.lane.b32.xlu0 %v2125_v28, %s5300_s16  ;;  %v2161_v40 = vsel %vm2160_vm2, %v2153_v59, %v7534_v20 }
 0x320   :  { %2214 = vrot.lane.b32.xlu1 %v2109_v17, %s5299_s15 }
 0x321   :  { %v2391_v47 = vpop.permute.xlu0 %2390 }
 0x322   :  { %v2050_v54 = vpop.permute.xlu1 %2049 }
 0x323   :  { %2240 = vrot.lane.b32.xlu0 %v2140_v25, %s5301_s17 }
 0x324   :  { %2226 = vrot.lane.b32.xlu1 %v2124_v26, %s5300_s16 }
 0x325   :  { %v7540_v49 = vpop.permute.xlu0 %2066 }
 0x326   :  { %v2065_v58 = vpop.permute.xlu1 %2064 }
 0x327   :  { %2449 = vrot.lane.b32.xlu0 %v2161_v40, %s5302_s18  ;;  %v2072_v42 = vsel %vm100_vm7, %v2065_v58, %v7540_v49 }
 0x328   :  { %2238 = vrot.lane.b32.xlu1 %v2139_v9, %s5301_s17  ;;  %s5307_s17 = smov 97  }
 0x329   :  { %v7546_v4 = vpop.permute.xlu0 %2081 }
 0x32a   :  { %v2080_v39 = vpop.permute.xlu1 %2079 }
 0x32b   :  { %v2088_v6 = vsel %vm2087_vm5, %v2080_v39, %v7546_v4 }
 0x32c   :  { %2117 = vrot.lane.b32.xlu1 %v2110_v15, %s5285_s20 }
 0x32d   :  { %v7549_v10 = vpop.permute.xlu0 %2392 }
 0x32e   :  { %v2112_v1 = vpop.permute.xlu1 %2111  ;;  %v2398_v52 = vsel %vm9676_vm0, %v2391_v47, %v7549_v10  ;;  %vm9683_vm0 = vcmask 1045504  }
 0x331   :  { %v7551_v22 = vpop.permute.xlu0 %2128 }
 0x332   :  { %v2127_v44 = vpop.permute.xlu1 %2126 }
 0x333   :  { %v2134_v0 = vsel %vm9672_vm12, %v2127_v44, %v7551_v22  ;;  %vm2218_vm12 = vcmask 760832  }
 0x335   :  { %v7553_v56 = vpop.permute.xlu0 %2143 }
 0x336   :  { %v2142_v2 = vpop.permute.xlu1 %2141 }
 0x337   :  { %v2149_v38 = vsel %vm9674_vm11, %v2142_v2, %v7553_v56 }
 0x339   :  { %v7555_v34 = vpop.permute.xlu0 %2097 }
 0x33a   :  { %v7557_v30 = vpop.permute.xlu1 %2095 }
 0x33d   :  { %v7559_v43 = vpop.permute.xlu0 %2166 }
 0x33e   :  { %v2165_v62 = vpop.permute.xlu1 %2164 }
 0x33f   :  { %v2173_v33 = vsel %vm2172_vm10, %v2165_v62, %v7559_v43 }
 0x341   :  { %v7561_v41 = vpop.permute.xlu0 %2178 }
 0x342   :  { %v2177_v46 = vpop.permute.xlu1 %2176 }
 0x343   :  { %v7616_v48 = vsel %vm1386_vm13, %v2177_v46, %v7561_v41 }
 0x345   :  { %v7563_v12 = vpop.permute.xlu0 %2189 }
 0x346   :  { %v7565_v13 = vpop.permute.xlu1 %2187 }
 0x349   :  { %v7567_v29 = vpop.permute.xlu0 %2200 }
 0x34a   :  { %v7569_v51 = vpop.permute.xlu1 %2198 }
 0x34d   :  { %v7571_v57 = vpop.permute.xlu0 %2212 }
 0x34e   :  { %v2211_v36 = vpop.permute.xlu1 %2210 }
 0x34f   :  { %v2219_v59 = vsel %vm2218_vm12, %v2211_v36, %v7571_v57 }
 0x351   :  { %v7573_v63 = vpop.permute.xlu0 %2224 }
 0x352   :  { %v2223_v37 = vpop.permute.xlu1 %2222 }
 0x353   :  { %v2231_v45 = vsel %vm2230_vm3, %v2223_v37, %v7573_v63 }
 0x355   :  { %v7575_v18 = vpop.permute.xlu0 %2236 }
 0x356   :  { %v2235_v27 = vpop.permute.xlu1 %2234 }
 0x359   :  { %v7577_v50 = vpop.permute.xlu0 %2156 }
 0x35a   :  { %v2052_v11 = vpop.permute.xlu1 %2051  ;;  %v7659_v39 = vsel %vm2160_vm2, %v7534_v20, %v7577_v50 }
 0x35b   :  { %v2057_v31 = vsel %vm9669_vm6, %v2050_v54, %v2052_v11  ;;  %vm9678_vm6 = vcmask 1040384  }
 0x35c   :  { %v2248_v32 = vsel %vm9670_vm4, %v7428_v21, %v2057_v31  ;;  %v2271_v8 = vsel %vm9678_vm6, %v2072_v42, %v2088_v6  ;;  %vm2242_vm4 = vcmask 654336   ;;  %vm9685_vm6 = vcmask 1041408  }
 0x35d   :  { %v7584_v19 = vpop.permute.xlu0 %2115  ;;  %v7587_v35 = vsel %vm9671_vm8, %v2248_v32, %v2072_v42  ;;  %vm9679_vm8 = vcmask 1042432   ;;  %v2243_v9 = vsel %vm2242_vm4, %v2235_v27, %v7575_v18  ;;  %v2371_v47 = vsel %vm9685_vm6, %v2219_v59, %v2231_v45 }
 0x35e   :  { %v7589_v61 = vpop.permute.xlu1 %2113  ;;  %2425 = vrot.lane.b32.xlu1 %v7587_v35, %s5302_s18  ;;  %2609 = vrot.lane.b32.xlu0 %v7587_v35, %s5283_s0  ;;  %v2320_v7 = vsel %vm9679_vm8, %v2161_v40, %v2173_v33  ;;  %vm9681_vm11 = vmmov %vm9679_vm8  ;;  %vm9686_vm8 = vcmask 1039360   ;;  %v2195_v33 = vsel %vm1919_vm15, %v7565_v13, %v7563_v12 }
 0x35f   :  { %v7599_v21 = vsel %vm9673_vm1, %v2112_v1, %v7589_v61  ;;  %vm9680_vm1 = vcmask 1043456   ;;  %v7637_v26 = vsel %vm9683_vm0, %v2320_v7, %v7616_v48 }
 0x360   :  { %v2299_v53 = vsel %vm9675_vm9, %v7599_v21, %v2134_v0  ;;  %v2402_v3 = vsel %vm9680_vm1, %v2271_v8, %v2398_v52  ;;  %vm9682_vm9 = vcmask 1046528   ;;  %vm9687_vm1 = vmmov %vm9686_vm8 }
 0x361   :  { %v2056_v17 = vpop.permute.xlu0 %2055  ;;  %v7612_v55 = vsel %vm9677_vm14, %v2299_v53, %v2149_v38  ;;  %v2409_v25 = vsel %vm9682_vm9, %v2402_v3, %v7599_v21  ;;  %vm9684_vm14 = vmmov %vm9683_vm0  ;;  %vm9689_vm9 = vcmask 1042432  }
 0x362   :  { %v7618_v5 = vpop.permute.xlu1 %2158  ;;  %2441 = vrot.lane.b32.xlu1 %v7612_v55, %s5302_s18  ;;  %2625 = vrot.lane.b32.xlu0 %v7612_v55, %s5283_s0  ;;  %v2257_v28 = vsel %vm9681_vm11, %v7491_v23, %v2056_v17  ;;  %vm9688_vm11 = vcmask 1044480   ;;  %vm9690_vm0 = vmmov %vm9689_vm9 }
 0x363   :  { %v7662_v1 = vsel %vm9688_vm11, %v2371_v47, %v2243_v9  ;;  %vm9691_vm6 = vmmov %vm9684_vm14  ;;  %vm9695_vm11 = vcmask 1043456  }
 0x365   :  { %v7631_v16 = vpop.permute.xlu0 %2070 }
 0x366   :  { %v2054_v15 = vpop.permute.xlu1 %2053  ;;  %2433 = vrot.lane.b32.xlu1 %v2409_v25, %s5302_s18  ;;  %2633 = vrot.lane.b32.xlu0 %v7637_v26, %s5283_s0  ;;  %v7646_v23 = vsel %vm9684_vm14, %v2257_v28, %v7631_v16 }
 0x367   :  { %2550 = vmatprep.subr.bf16.mxu1 %v7646_v23  ;;  %v2058_v54 = vsel %vm9686_vm8, %v2052_v11, %v2054_v15  ;;  %v2059_v58 = vsel %vm9687_vm1, %v2054_v15, %v2056_v17  ;;  %vm9693_vm8 = vcmask 924672   ;;  %vm9694_vm1 = vcmask 916480  }
 0x368   :  { %v2251_v2 = vsel %vm9689_vm9, %v7430_v24, %v2058_v54  ;;  %v2254_v62 = vsel %vm9690_vm0, %v7486_v14, %v2059_v58  ;;  %vm9696_vm9 = vcmask 1046528   ;;  %vm2103_vm0 = vcmask 1014784  }
 0x369   :  { %v7654_v40 = vpop.permute.xlu0 %2085 }
 0x36a   :  { %v2069_v44 = vpop.permute.xlu1 %2068  ;;  %2451 = vrot.lane.b32.xlu1 %v7659_v39, %s5302_s18  ;;  %2649 = vrot.lane.b32.xlu0 %v7662_v1, %s5283_s0 }
 0x36b   :  { %v2073_v20 = vsel %vm100_vm7, %v7540_v49, %v2069_v44  ;;  %v7676_v46 = vsel %vm100_vm7, %v2069_v44, %v7631_v16  ;;  %vm9692_vm7 = vcmask 1040384  }
 0x36c   :  { %v7679_v36 = vsel %vm9684_vm14, %v2251_v2, %v2073_v20  ;;  %v7683_v37 = vsel %vm9691_vm6, %v2254_v62, %v7676_v46  ;;  %vm2206_vm14 = vcmask 769024   ;;  %vm9697_vm6 = vmmov %vm9695_vm11 }
 0x36d   :  { %2507 = vmatprep.subr.bf16.mxu0 %v7679_v36  ;;  %2551 = vmatpush1.bf16.msra.mxu1 %v7683_v37  ;;  %v7687_v24 = vpop.permute.xlu0 %2396  ;;  %v2207_v17 = vsel %vm2206_vm14, %v7569_v51, %v7567_v29 }
 0x36e   :  { %2508 = vmatpush1.bf16.msra.mxu0 %v7587_v35  ;;  %v7690_v14 = vpop.permute.xlu1 %2083  ;;  %2455 = vrot.lane.b32.xlu1 %v7618_v5, %s5302_s18 }
 0x36f   :  { %2861 = vrot.lane.b32.xlu0 %v7587_v35, %s5285_s20  ;;  %v2089_v49 = vsel %vm2087_vm5, %v7546_v4, %v7690_v14  ;;  %v2120_v4 = vsel %vm9694_vm1, %v7589_v61, %v7584_v19  ;;  %vm9700_vm1 = vcmask 1040384  }
 0x370   :  { %v2273_v31 = vsel %vm9692_vm7, %v2073_v20, %v2089_v49  ;;  %vm9698_vm7 = vmmov %vm9696_vm9  ;;  %v2343_v13 = vsel %vm9700_vm1, %v7616_v48, %v2195_v33 }
 0x371   :  { %v7699_v27 = vpop.permute.xlu0 %2132  ;;  %v2351_v45 = vsel %vm9697_vm6, %v2343_v13, %v2207_v17  ;;  %vm9704_vm1 = vmmov %vm9698_vm7 }
 0x372   :  { %v7701_v11 = vpop.permute.xlu1 %2394  ;;  %2615 = vrot.lane.b32.xlu1 %v7646_v23, %s5283_s0  ;;  %v7768_v48 = vsel %vm9704_vm1, %v2351_v45, %v2219_v59 }
 0x373   :  { %v2399_v42 = vsel %vm9693_vm8, %v7549_v10, %v7701_v11  ;;  %2877 = vrot.lane.b32.xlu0 %v7612_v55, %s5285_s20  ;;  %v2104_v10 = vsel %vm2103_vm0, %v7557_v30, %v7555_v34  ;;  %vm9699_vm8 = vcmask 908288  }
 0x374   :  { %v2404_v32 = vsel %vm9695_vm11, %v2273_v31, %v2399_v42  ;;  %v2279_v52 = vsel %vm9697_vm6, %v2271_v8, %v2104_v10  ;;  %vm9701_vm11 = vcmask 900096  }
 0x375   :  { %v7715_v0 = vpop.permute.xlu0 %2147  ;;  %v7718_v6 = vsel %vm9696_vm9, %v2404_v32, %v2120_v4  ;;  %v7742_v30 = vsel %vm9698_vm7, %v2279_v52, %v7599_v21  ;;  %vm9702_vm9 = vmmov %vm9697_vm6  ;;  %vm9707_vm6 = vcmask 1045504   ;;  %v2090_v32 = vsel %vm2087_vm5, %v7690_v14, %v7654_v40 }
 0x376   :  { %v7720_v38 = vpop.permute.xlu1 %2130 }
 0x377   :  { %2885 = vrot.lane.b32.xlu0 %v7637_v26, %s5285_s20  ;;  %v2135_v3 = vsel %vm9699_vm8, %v7551_v22, %v7720_v38  ;;  %vm9703_vm8 = vcmask 1041408  }
 0x379   :  { %v7729_v61 = vpop.permute.xlu0 %2101 }
 0x37a   :  { %v7727_v53 = vpop.permute.xlu1 %2145 }
 0x37b   :  { %2901 = vrot.lane.b32.xlu0 %v7662_v1, %s5285_s20  ;;  %v2150_v51 = vsel %vm9701_vm11, %v7553_v56, %v7727_v53  ;;  %vm9705_vm11 = vcmask 1044480  }
 0x37d   :  { %v7758_v28 = vpop.permute.xlu0 %2170 }
 0x37e   :  { %v2100_v7 = vpop.permute.xlu1 %2099 }
 0x37f   :  { %v2105_v8 = vsel %vm2103_vm0, %v7555_v34, %v2100_v7  ;;  %2617 = vrot.lane.b32.xlu0 %v7742_v30, %s5283_s0  ;;  %v2301_v34 = vsel %vm9703_vm8, %v2120_v4, %v2135_v3  ;;  %vm9710_vm8 = vmmov %vm9704_vm1  ;;  %vm9711_vm1 = vcmask 924672  }
 0x380   :  { %v2281_v21 = vsel %vm9702_vm9, %v2273_v31, %v2105_v8  ;;  %v7774_v56 = vsel %vm9705_vm11, %v2301_v34, %v2150_v51  ;;  %vm9706_vm9 = vcmask 1042432   ;;  %v2400_v52 = vsel %vm9711_vm1, %v7701_v11, %v7687_v24 }
 0x381   :  { %v7761_v22 = vsel %vm9698_vm7, %v2281_v21, %v2120_v4  ;;  %v7782_v47 = vpop.permute.xlu0 %2182  ;;  %vm9708_vm7 = vcmask 1040384   ;;  %vm9712_vm11 = vcmask 1041408   ;;  %vm9720_vm1 = vcmask 916480  }
 0x382   :  { %2509 = vmatprep.subr.bf16.mxu0 %v7761_v22  ;;  %v7765_v25 = vpop.permute.xlu1 %2168  ;;  %vm9714_vm5 = vmmov %vm9708_vm7 }
 0x383   :  { %2641 = vrot.lane.b32.xlu0 %v7768_v48, %s5283_s0  ;;  %2510 = vmatpush1.bf16.msra.mxu0 %v7742_v30  ;;  %v2174_v9 = vsel %vm2172_vm10, %v7559_v43, %v7765_v25  ;;  %v7852_v14 = vsel %vm9714_vm5, %v7631_v16, %v7654_v40 }
 0x384   :  { %2511 = vmatprep.subr.bf16.mxu0 %v7774_v56  ;;  %v2323_v54 = vsel %vm9706_vm9, %v7659_v39, %v2174_v9  ;;  %v2163_v39 = vsel %vm2160_vm2, %v7577_v50, %v7618_v5  ;;  %vm9709_vm2 = vcmask 1043456   ;;  %vm9713_vm9 = vcmask 1044480  }
 0x386   :  { %v7780_v15 = vpop.permute.xlu1 %2180 }
 0x387   :  { %v2185_v59 = vsel %vm1386_vm13, %v7561_v41, %v7780_v15  ;;  %2869 = vrot.lane.b32.xlu0 %v7742_v30, %s5285_s20  ;;  %2512 = vmatpush1.bf16.msra.mxu0 %v7612_v55  ;;  %v7801_v41 = vpop.permute.xlu0 %2193 }
 0x388   :  { %v7793_v43 = vsel %vm9707_vm6, %v2323_v54, %v2185_v59  ;;  %vm9715_vm6 = vmmov %vm9714_vm5 }
 0x389   :  { %2513 = vmatprep.subr.bf16.mxu0 %v7793_v43  ;;  %v2275_v11 = vsel %vm9715_vm6, %v7676_v46, %v2090_v32 }
 0x38a   :  { %v7796_v58 = vpop.permute.xlu1 %2191 }
 0x38b   :  { %2893 = vrot.lane.b32.xlu0 %v7768_v48, %s5285_s20  ;;  %2514 = vmatpush1.bf16.msra.mxu0 %v7637_v26  ;;  %v2196_v2 = vsel %vm1919_vm15, %v7563_v12, %v7796_v58  ;;  %v2205_v31 = vpop.permute.xlu0 %2204 }
 0x38c   :  { %v2345_v20 = vsel %vm9708_vm7, %v2185_v59, %v2196_v2  ;;  %vm9716_vm7 = vmmov %vm9709_vm2  ;;  %v2175_v59 = vsel %vm2172_vm10, %v7765_v25, %v7758_v28  ;;  %vm9731_vm10 = vcmask 1040384   ;;  %v2197_v25 = vsel %vm1919_vm15, %v7796_v58, %v7801_v41 }
 0x38d   :  { %vm9737_vm15 = vcmask 1046528  }
 0x38e   :  { %v7803_v44 = vpop.permute.xlu1 %2202 }
 0x38f   :  { %2453 = vrot.lane.b32.xlu0 %v2163_v39, %s5302_s18  ;;  %v2208_v62 = vsel %vm2206_vm14, %v7567_v29, %v7803_v44 }
 0x390   :  { %v2353_v12 = vsel %vm9709_vm2, %v2345_v20, %v2208_v62  ;;  %v2209_v20 = vsel %vm2206_vm14, %v7803_v44, %v2205_v31 }
 0x392   :  { %v7816_v49 = vpop.permute.xlu1 %2214 }
 0x393   :  { %v2220_v42 = vsel %vm2218_vm12, %v7571_v57, %v7816_v49  ;;  %2427 = vrot.lane.b32.xlu0 %v7679_v36, %s5302_s18  ;;  %v2217_v57 = vpop.permute.xlu0 %2216 }
 0x394   :  { %v7825_v50 = vsel %vm9710_vm8, %v2353_v12, %v2220_v42 }
 0x395   :  { %2515 = vmatprep.subr.bf16.mxu0 %v7825_v50 }
 0x396   :  { %2516 = vmatpush1.bf16.msra.mxu0 %v7768_v48  ;;  %v2227_v29 = vpop.permute.xlu1 %2226 }
 0x397   :  { %2431 = vrot.lane.b32.xlu0 %v7646_v23, %s5302_s18  ;;  %v2232_v4 = vsel %vm2230_vm3, %v7573_v63, %v2227_v29  ;;  %v2106_v63 = vsel %vm2103_vm0, %v2100_v7, %v7729_v61  ;;  %vm9717_vm0 = vmmov %vm9709_vm2  ;;  %v2229_v13 = vpop.permute.xlu0 %2228 }
 0x398   :  { %v2373_v17 = vsel %vm9712_vm11, %v2220_v42, %v2232_v4  ;;  %v2406_v8 = vsel %vm9717_vm0, %v2275_v11, %v2400_v52  ;;  %vm9718_vm2 = vmmov %vm9710_vm8 }
 0x399   :  { %vm9719_vm8 = vmmov %vm9712_vm11 }
 0x39a   :  { %v2239_v10 = vpop.permute.xlu1 %2238  ;;  %vm9721_vm11 = vmmov %vm9717_vm0 }
 0x39b   :  { %v2244_v33 = vsel %vm2242_vm4, %v7575_v18, %v2239_v10  ;;  %2443 = vrot.lane.b32.xlu0 %v7774_v56, %s5302_s18  ;;  %v2285_v18 = vsel %vm9716_vm7, %v7852_v14, %v7729_v61  ;;  %v2283_v61 = vsel %vm9721_vm11, %v2275_v11, %v2106_v63  ;;  %vm9722_vm5 = vmmov %vm9718_vm2  ;;  %vm9724_vm7 = vcmask 908288   ;;  %v2241_v54 = vpop.permute.xlu0 %2240 }
 0x39c   :  { %v7847_v3 = vsel %vm9713_vm9, %v2373_v17, %v2244_v33  ;;  %vm9723_vm6 = vmmov %vm9718_vm2  ;;  %v2136_v34 = vsel %vm9724_vm7, %v7720_v38, %v7699_v27 }
 0x39d   :  { %2517 = vmatprep.subr.bf16.mxu0 %v7847_v3  ;;  %vm9725_vm0 = vmmov %vm9719_vm8 }
 0x39e   :  { %2518 = vmatpush1.bf16.msra.mxu0 %v7662_v1  ;;  %v7861_v7 = vpop.permute.xlu1 %2117  ;;  %vm9729_vm11 = vmmov %vm9713_vm9 }
 0x39f   :  { %v7866_v16 = vsel %vm9718_vm2, %v2285_v18, %v7861_v7  ;;  %v2305_v40 = vsel %vm9719_vm8, %v7861_v7, %v7699_v27  ;;  %v2121_v46 = vsel %vm9720_vm1, %v7584_v19, %v7861_v7  ;;  %vm9726_vm2 = vcmask 1042432   ;;  %v2450_v32 = vpop.permute.xlu0 %2449 }
 0x3a0   :  { %2552 = vmatprep.subr.bf16.mxu1 %v7866_v16  ;;  %v7878_v51 = vsel %vm9713_vm9, %v2305_v40, %v7715_v0  ;;  %v7881_v21 = vsel %vm9722_vm5, %v2283_v61, %v2121_v46  ;;  %v7884_v45 = vsel %vm9723_vm6, %v2406_v8, %v2121_v46  ;;  %v2303_v19 = vsel %vm9725_vm0, %v2121_v46, %v2136_v34  ;;  %vm9730_vm9 = vmmov %vm9725_vm0  ;;  %v8061_v61 = vld [vmem:[%s9144_s3 + $0x4] ss:$8 sps:$4 sm:$0xff]  }
 0x3a1   :  { %2631 = vrot.lane.b32.xlu1 %v7878_v51, %s5283_s0  ;;  %2447 = vrot.lane.b32.xlu0 %v7878_v51, %s5302_s18  ;;  %v2329_v9 = vsel %vm9726_vm2, %v7618_v5, %v7758_v28  ;;  %vm9727_vm8 = vcmask 900096   ;;  %vm9728_vm1 = vcmask 1045504   ;;  %v2349_v28 = vsel %vm9731_vm10, %v7782_v47, %v7801_v41  ;;  %vm9732_vm5 = vmmov %vm9726_vm2 }
 0x3a2   :  { %2553 = vmatpush1.bf16.msra.mxu1 %v7881_v21  ;;  %v2151_v27 = vsel %vm9727_vm8, %v7727_v53, %v7715_v0  ;;  %v7904_v38 = vsel %vm9728_vm1, %v2329_v9, %v7782_v47  ;;  %v2186_v0 = vsel %vm1386_vm13, %v7780_v15, %v7782_v47  ;;  %v2377_v53 = vsel %vm9730_vm9, %v2217_v57, %v2229_v13  ;;  %vm9733_vm6 = vmmov %vm9729_vm11 }
 0x3a3   :  { %2554 = vmatprep.subr.bf16.mxu1 %v7878_v51  ;;  %v7912_v5 = vsel %vm9729_vm11, %v2303_v19, %v2151_v27  ;;  %v2326_v2 = vsel %vm9732_vm5, %v2163_v39, %v2175_v59  ;;  %v7930_v62 = vsel %vm9733_vm6, %v2377_v53, %v2241_v54  ;;  %vm9735_vm13 = vcmask 1043456   ;;  %vm9736_vm7 = vmmov %vm9728_vm1 }
 0x3a4   :  { %9734 = vst [vmem:[#allocation14_spill] sm:$0xff] %v7930_v62  ;;  %v2357_v15 = vsel %vm9735_vm13, %v2349_v28, %v2205_v31  ;;  %v7938_v42 = vsel %vm9736_vm7, %v2326_v2, %v2186_v0  ;;  %v2221_v47 = vsel %vm2218_vm12, %v7816_v49, %v2217_v57  ;;  %vm9738_vm0 = vmmov %vm9731_vm10  ;;  %v2233_v39 = vsel %vm2230_vm3, %v2227_v29, %v2229_v13 }
 0x3a5   :  { %2611 = vrot.lane.b32.xlu0 %v7679_v36, %s5283_s0  ;;  %2639 = vrot.lane.b32.xlu1 %v7904_v38, %s5283_s0  ;;  %v7946_v58 = vsel %vm9737_vm15, %v2357_v15, %v2217_v57  ;;  %v2347_v41 = vsel %vm9738_vm0, %v2186_v0, %v2197_v25  ;;  %vm9739_vm14 = vmmov %vm9735_vm13  ;;  %v2245_v49 = vsel %vm2242_vm4, %v2239_v10, %v2241_v54  ;;  %vm2457_vm1 = vcmask 646144  }
 0x3a6   :  { %2555 = vmatpush1.bf16.msra.mxu1 %v7912_v5  ;;  %v2355_v44 = vsel %vm9739_vm14, %v2347_v41, %v2209_v20  ;;  %vm9740_vm2 = vmmov %vm9737_vm15  ;;  %vm2491_vm11 = vcmask 179200  }
 0x3a7   :  { %2556 = vmatprep.subr.bf16.mxu1 %v7904_v38  ;;  %v7955_v31 = vsel %vm9740_vm2, %v2355_v44, %v2221_v47  ;;  %vm9741_vm12 = vmmov %vm9730_vm9  ;;  %4583 = vmatprep.mubr.msk.bf16.mxu1 %vm2491_vm11, %v8061_v61 }
 0x3a8   :  { %v2375_v12 = vsel %vm9741_vm12, %v2221_v47, %v2233_v39  ;;  %vm9742_vm3 = vmmov %vm9733_vm6  ;;  %4581 = vmatprep.mubr.msk.bf16.mxu0 %vm2491_vm11, %v8061_v61 }
 0x3a9   :  { %2627 = vrot.lane.b32.xlu0 %v7774_v56, %s5283_s0  ;;  %2655 = vrot.lane.b32.xlu1 %v7930_v62, %s5283_s0  ;;  %v7968_v29 = vsel %vm9742_vm3, %v2375_v12, %v2245_v49  ;;  %vm9743_vm4 = vmmov %vm9735_vm13  ;;  %vm9770_vm13 = vcmask 1039360  }
 0x3aa   :  { %2557 = vmatpush1.bf16.msra.mxu1 %v7938_v42  ;;  %v2408_v4 = vsel %vm9743_vm4, %v7852_v14, %v7687_v24  ;;  %vm9744_vm8 = vmmov %vm9740_vm2 }
 0x3ab   :  { %2558 = vmatprep.subr.bf16.mxu1 %v7946_v58  ;;  %v2412_v57 = vsel %vm9744_vm8, %v2408_v4, %v7861_v7  ;;  %vm9767_vm9 = vmmov %vm9732_vm5 }
 0x3ac   :  { %vm9768_vm10 = vmmov %vm9732_vm5 }
 0x3ad   :  { %2635 = vrot.lane.b32.xlu0 %v7793_v43, %s5283_s0  ;;  %2867 = vrot.lane.b32.xlu1 %v7646_v23, %s5285_s20  ;;  %vm9769_vm6 = vmmov %vm9732_vm5 }
 0x3ae   :  { %2559 = vmatpush1.bf16.msra.mxu1 %v7955_v31  ;;  %vm9771_vm7 = vmmov %vm9770_vm13 }
 0x3af   :  { %2560 = vmatprep.subr.bf16.mxu1 %v7930_v62  ;;  %vm9772_vm15 = vmmov %vm9771_vm7 }
 0x3b0   :  { %vm9773_vm0 = vmmov %vm9771_vm7 }
 0x3b1   :  { %2651 = vrot.lane.b32.xlu0 %v7847_v3, %s5283_s0  ;;  %2883 = vrot.lane.b32.xlu1 %v7878_v51, %s5285_s20  ;;  %vm9774_vm14 = vmmov %vm9773_vm0 }
 0x3b2   :  { %2561 = vmatpush1.bf16.msra.mxu1 %v7968_v29  ;;  %vm9775_vm2 = vmmov %vm9773_vm0 }
 0x3b3   :  { %vm9776_vm12 = vmmov %vm9773_vm0 }
 0x3b4   :  { %vm9777_vm3 = vmmov %vm9773_vm0 }
 0x3b5   :  { %2863 = vrot.lane.b32.xlu0 %v7679_v36, %s5285_s20  ;;  %2891 = vrot.lane.b32.xlu1 %v7904_v38, %s5285_s20  ;;  %vm9778_vm4 = vmmov %vm9773_vm0 }
 0x3b6   :  { %vm9779_vm8 = vmmov %vm9773_vm0 }
 0x3b9   :  { %2879 = vrot.lane.b32.xlu0 %v7774_v56, %s5285_s20  ;;  %2907 = vrot.lane.b32.xlu1 %v7930_v62, %s5285_s20 }
 0x3bd   :  { %2887 = vrot.lane.b32.xlu0 %v7793_v43, %s5285_s20  ;;  %2429 = vrot.lane.b32.xlu1 %v7683_v37, %s5302_s18 }
 0x3c1   :  { %2903 = vrot.lane.b32.xlu0 %v7847_v3, %s5285_s20  ;;  %2445 = vrot.lane.b32.xlu1 %v7912_v5, %s5302_s18 }
 0x3c5   :  { %2435 = vrot.lane.b32.xlu0 %v7718_v6, %s5302_s18  ;;  %2613 = vrot.lane.b32.xlu1 %v7683_v37, %s5283_s0 }
 0x3c9   :  { %2439 = vrot.lane.b32.xlu0 %v2412_v57, %s5302_s18  ;;  %2623 = vrot.lane.b32.xlu1 %v7866_v16, %s5283_s0 }
 0x3cd   :  { %2619 = vrot.lane.b32.xlu0 %v7761_v22, %s5283_s0  ;;  %2629 = vrot.lane.b32.xlu1 %v7912_v5, %s5283_s0 }
 0x3d0   :  { %v2426_v6 = vpop.permute.xlu1 %2425  ;;  %v8003_v10 = vpop.permute.xlu0 %2609 }
 0x3d1   :  { %2643 = vrot.lane.b32.xlu0 %v7825_v50, %s5283_s0  ;;  %2637 = vrot.lane.b32.xlu1 %v7938_v42, %s5283_s0 }
 0x3d4   :  { %v2442_v24 = vpop.permute.xlu1 %2441  ;;  %v8009_v52 = vpop.permute.xlu0 %2625 }
 0x3d5   :  { %2871 = vrot.lane.b32.xlu0 %v7761_v22, %s5285_s20  ;;  %2647 = vrot.lane.b32.xlu1 %v7946_v58, %s5283_s0 }
 0x3d8   :  { %v8015_v33 = vpop.permute.xlu1 %2433  ;;  %v8017_v17 = vpop.permute.xlu0 %2633 }
 0x3d9   :  { %2895 = vrot.lane.b32.xlu0 %v7825_v50, %s5285_s20  ;;  %2653 = vrot.lane.b32.xlu1 %v7968_v29, %s5283_s0 }
 0x3dc   :  { %v2452_v63 = vpop.permute.xlu1 %2451  ;;  %v8023_v14 = vpop.permute.xlu0 %2649 }
 0x3dd   :  { %2865 = vrot.lane.b32.xlu1 %v7683_v37, %s5285_s20  ;;  %v8028_v11 = vsel %vm2457_vm1, %v2450_v32, %v2452_v63 }
 0x3de   :  { %2681 = vrot.lane.b32.xlu0 %v8028_v11, %s5283_s0 }
 0x3e1   :  { %v8032_v18 = vpop.permute.xlu0 %2861  ;;  %2875 = vrot.lane.b32.xlu1 %v7866_v16, %s5285_s20 }
 0x3e2   :  { %9745 = vst [vmem:[#allocation4_spill] sm:$0xff] %v8032_v18  ;;  %2933 = vrot.lane.b32.xlu0 %v8028_v11, %s5285_s20 }
 0x3e5   :  { %v8038_v7 = vpop.permute.xlu0 %2877  ;;  %2881 = vrot.lane.b32.xlu1 %v7912_v5, %s5285_s20 }
 0x3e6   :  { %9746 = vst [vmem:[#allocation36_spill] sm:$0xff] %v8038_v7 }
 0x3e9   :  { %v8042_v8 = vpop.permute.xlu0 %2885  ;;  %2889 = vrot.lane.b32.xlu1 %v7938_v42, %s5285_s20 }
 0x3ea   :  { %9747 = vst [vmem:[#allocation55_spill] sm:$0xff] %v8042_v8 }
 0x3ed   :  { %v8046_v13 = vpop.permute.xlu0 %2901  ;;  %2899 = vrot.lane.b32.xlu1 %v7946_v58, %s5285_s20 }
 0x3ee   :  { %9748 = vst [vmem:[#allocation31_spill] sm:$0xff] %v8046_v13 }
 0x3f1   :  { %v8050_v40 = vpop.permute.xlu0 %2617  ;;  %2905 = vrot.lane.b32.xlu1 %v7968_v29, %s5285_s20 }
 0x3f5   :  { %v8054_v46 = vpop.permute.xlu0 %2641  ;;  %2437 = vrot.lane.b32.xlu1 %v7884_v45, %s5302_s18  ;;  %v8075_v45 = vpop.permute.xlu1 %2455  ;;  %s5308_s18 = smov 57  }
 0x3f9   :  { %v8067_v34 = vpop.permute.xlu0 %2869  ;;  %2621 = vrot.lane.b32.xlu1 %v7881_v21, %s5283_s0  ;;  %v8105_v2 = vpop.permute.xlu1 %2615 }
 0x3fa   :  { %9749 = vst [vmem:[#allocation6_spill] sm:$0xff] %v8067_v34 }
 0x3fd   :  { %v8071_v19 = vpop.permute.xlu0 %2893  ;;  %2645 = vrot.lane.b32.xlu1 %v7955_v31, %s5283_s0 }
 0x3fe   :  { %9750 = vst [vmem:[#allocation59_spill] sm:$0xff] %v8071_v19 }
 0x401   :  { %v2454_v9 = vpop.permute.xlu0 %2453  ;;  %2873 = vrot.lane.b32.xlu1 %v7881_v21, %s5285_s20 }
 0x402   :  { %v8081_v27 = vsel %vm2457_vm1, %v2454_v9, %v8075_v45  ;;  %v8098_v53 = vsel %vm2457_vm1, %v2452_v63, %v2454_v9 }
 0x403   :  { %2685 = vrot.lane.b32.xlu0 %v8081_v27, %s5283_s0 }
 0x405   :  { %v2428_v59 = vpop.permute.xlu0 %2427  ;;  %2897 = vrot.lane.b32.xlu1 %v7955_v31, %s5285_s20 }
 0x406   :  { %v8088_v54 = vsel %vm2457_vm1, %v2426_v6, %v2428_v59 }
 0x407   :  { %9751 = vst [vmem:[#allocation56_spill] sm:$0xff] %v8088_v54  ;;  %2657 = vrot.lane.b32.xlu0 %v8088_v54, %s5283_s0 }
 0x409   :  { %v8092_v0 = vpop.permute.xlu0 %2431  ;;  %2687 = vrot.lane.b32.xlu1 %v8075_v45, %s5283_s0 }
 0x40a   :  { %9752 = vst [vmem:[#allocation22_spill] sm:$0xff] %v8092_v0  ;;  %2562 = vmatprep.subr.bf16.mxu1 %v8092_v0 }
 0x40d   :  { %v2444_v28 = vpop.permute.xlu0 %2443  ;;  %2683 = vrot.lane.b32.xlu1 %v8098_v53, %s5283_s0 }
 0x40e   :  { %v8103_v25 = vsel %vm2457_vm1, %v2442_v24, %v2444_v28 }
 0x40f   :  { %2673 = vrot.lane.b32.xlu0 %v8103_v25, %s5283_s0 }
 0x411   :  { %2935 = vrot.lane.b32.xlu1 %v8098_v53, %s5285_s20 }
 0x413   :  { %2909 = vrot.lane.b32.xlu0 %v8088_v54, %s5285_s20  ;;  %v8113_v15 = vpop.permute.xlu1 %2631  ;;  %v8115_v20 = vpop.permute.xlu0 %2447 }
 0x415   :  { %2663 = vrot.lane.b32.xlu1 %v8092_v0, %s5283_s0 }
 0x417   :  { %2925 = vrot.lane.b32.xlu0 %v8103_v25, %s5285_s20  ;;  %v8121_v47 = vpop.permute.xlu1 %2639  ;;  %v8123_v41 = vpop.permute.xlu0 %2611 }
 0x419   :  { %2679 = vrot.lane.b32.xlu1 %v8115_v20, %s5283_s0 }
 0x41b   :  { %v8127_v44 = vpop.permute.xlu1 %2655  ;;  %v8129_v39 = vpop.permute.xlu0 %2627 }
 0x41d   :  { %2915 = vrot.lane.b32.xlu1 %v8092_v0, %s5285_s20 }
 0x41f   :  { %v8133_v49 = vpop.permute.xlu1 %2867  ;;  %v8135_v12 = vpop.permute.xlu0 %2635 }
 0x420   :  { %9753 = vst [vmem:[#allocation57_spill] sm:$0xff] %v8133_v49 }
 0x421   :  { %2931 = vrot.lane.b32.xlu1 %v8115_v20, %s5285_s20 }
 0x423   :  { %v8139_v4 = vpop.permute.xlu1 %2883  ;;  %v8141_v57 = vpop.permute.xlu0 %2651 }
 0x424   :  { %9754 = vst [vmem:[#allocation5_spill] sm:$0xff] %v8139_v4 }
 0x427   :  { %v8143_v32 = vpop.permute.xlu1 %2891  ;;  %v8145_v6 = vpop.permute.xlu0 %2863 }
 0x428   :  { %9755 = vst [vmem:[#allocation63_spill] sm:$0xff] %v8143_v32  ;;  %9756 = vst [vmem:[#allocation33_spill] sm:$0xff] %v8145_v6 }
 0x42b   :  { %v8147_v24 = vpop.permute.xlu1 %2907  ;;  %v8149_v63 = vpop.permute.xlu0 %2879 }
 0x42c   :  { %9757 = vst [vmem:[#allocation54_spill] sm:$0xff] %v8147_v24  ;;  %9758 = vst [vmem:[#allocation58_spill] sm:$0xff] %v8149_v63 }
 0x42f   :  { %v2430_v9 = vpop.permute.xlu1 %2429  ;;  %v8151_v60 = vpop.permute.xlu0 %2887 }
 0x430   :  { %9759 = vst [vmem:[#allocation16_spill] sm:$0xff] %v8151_v60  ;;  %v8154_v13 = vsel %vm2457_vm1, %v2428_v59, %v2430_v9  ;;  %v8158_v19 = vsel %vm2457_vm1, %v2430_v9, %v8092_v0 }
 0x431   :  { %9760 = vst [vmem:[#allocation19_spill] sm:$0xff] %v8154_v13  ;;  %2519 = vmatprep.subr.bf16.mxu0 %v8154_v13  ;;  %2563 = vmatpush1.bf16.msra.mxu1 %v8158_v19 }
 0x432   :  { %2659 = vrot.lane.b32.xlu0 %v8154_v13, %s5283_s0  ;;  %2520 = vmatpush1.bf16.msra.mxu0 %v8088_v54 }
 0x433   :  { %v2446_v24 = vpop.permute.xlu1 %2445  ;;  %v8165_v8 = vpop.permute.xlu0 %2903 }
 0x434   :  { %9761 = vst [vmem:[#allocation11_spill] sm:$0xff] %v8165_v8  ;;  %v8181_v8 = vsel %vm2457_vm1, %v2444_v28, %v2446_v24  ;;  %v8201_v4 = vsel %vm2457_vm1, %v2446_v24, %v8115_v20 }
 0x437   :  { %v2614_v60 = vpop.permute.xlu1 %2613  ;;  %v2436_v32 = vpop.permute.xlu0 %2435 }
 0x438   :  { %v8169_v59 = vsel %vm2457_vm1, %v8015_v33, %v2436_v32 }
 0x439   :  { %2665 = vrot.lane.b32.xlu0 %v8169_v59, %s5283_s0 }
 0x43b   :  { %v8173_v9 = vpop.permute.xlu1 %2623  ;;  %v8175_v7 = vpop.permute.xlu0 %2439 }
 0x43c   :  { %2564 = vmatprep.subr.bf16.mxu1 %v8175_v7  ;;  %2671 = vrot.lane.b32.xlu1 %v8175_v7, %s5283_s0 }
 0x43d   :  { %2675 = vrot.lane.b32.xlu0 %v8181_v8, %s5283_s0 }
 0x43f   :  { %v8185_v33 = vpop.permute.xlu1 %2629 }
 0x440   :  { %2923 = vrot.lane.b32.xlu1 %v8175_v7, %s5285_s20 }
 0x441   :  { %2911 = vrot.lane.b32.xlu0 %v8154_v13, %s5285_s20 }
 0x443   :  { %v8191_v63 = vpop.permute.xlu1 %2637 }
 0x444   :  { %2661 = vrot.lane.b32.xlu1 %v8158_v19, %s5283_s0 }
 0x445   :  { %2917 = vrot.lane.b32.xlu0 %v8169_v59, %s5285_s20 }
 0x447   :  { %v8197_v28 = vpop.permute.xlu1 %2647 }
 0x448   :  { %2677 = vrot.lane.b32.xlu1 %v8201_v4, %s5283_s0 }
 0x449   :  { %2927 = vrot.lane.b32.xlu0 %v8181_v8, %s5285_s20 }
 0x44b   :  { %v8207_v34 = vpop.permute.xlu1 %2653 }
 0x44c   :  { %2913 = vrot.lane.b32.xlu1 %v8158_v19, %s5285_s20 }
 0x44f   :  { %v8211_v18 = vpop.permute.xlu1 %2865 }
 0x450   :  { %9762 = vst [vmem:[#allocation9_spill] sm:$0xff] %v8211_v18  ;;  %2929 = vrot.lane.b32.xlu1 %v8201_v4, %s5285_s20 }
 0x453   :  { %v8215_v6 = vpop.permute.xlu1 %2875 }
 0x457   :  { %v8217_v24 = vpop.permute.xlu1 %2881 }
 0x458   :  { %9763 = vst [vmem:[#allocation52_spill] sm:$0xff] %v8217_v24 }
 0x45b   :  { %v8219_v49 = vpop.permute.xlu1 %2889 }
 0x45c   :  { %9764 = vst [vmem:[#allocation53_spill] sm:$0xff] %v8219_v49  ;;  %v2496_v49 = vsel %vm9769_vm6, %v8028_v11, 0  ;;  %vm9784_vm6 = vmmov %vm9773_vm0 }
 0x45f   :  { %v8221_v0 = vpop.permute.xlu1 %2899 }
 0x460   :  { %9765 = vst [vmem:[#allocation65_spill] sm:$0xff] %v8221_v0  ;;  %v8258_v0 = vld [vmem:[%s9144_s3] ss:$8 sps:$4 sm:$0xff]   ;;  %s5314_s3 = smov 63  }
 0x463   :  { %v8223_v54 = vpop.permute.xlu1 %2905 }
 0x464   :  { %9766 = vst [vmem:[#allocation67_spill] sm:$0xff] %v8223_v54  ;;  %v2502_v54 = vsel %vm9732_vm5, %v8081_v27, 0  ;;  %vm9783_vm5 = vmmov %vm9773_vm0 }
 0x467   :  { %v2438_v13 = vpop.permute.xlu1 %2437 }
 0x468   :  { %v8226_v62 = vsel %vm2457_vm1, %v2436_v32, %v2438_v13  ;;  %v8230_v18 = vsel %vm2457_vm1, %v2438_v13, %v8175_v7  ;;  %vm9780_vm1 = vmmov %vm9773_vm0 }
 0x469   :  { %2521 = vmatprep.subr.bf16.mxu0 %v8226_v62  ;;  %2667 = vrot.lane.b32.xlu0 %v8226_v62, %s5283_s0 }
 0x46a   :  { %2565 = vmatpush1.bf16.msra.mxu1 %v8230_v18  ;;  %2669 = vrot.lane.b32.xlu1 %v8230_v18, %s5283_s0 }
 0x46b   :  { %2522 = vmatpush1.bf16.msra.mxu0 %v8169_v59  ;;  %2566 = vmatprep.subr.bf16.mxu1 %v8115_v20  ;;  %v2622_v32 = vpop.permute.xlu1 %2621 }
 0x46c   :  { %2523 = vmatprep.subr.bf16.mxu0 %v8181_v8 }
 0x46d   :  { %2937 = vrot.lane.b32.xlu0 %v8081_v27, %s5285_s20 }
 0x46e   :  { %2567 = vmatpush1.bf16.msra.mxu1 %v8201_v4  ;;  %2939 = vrot.lane.b32.xlu1 %v8075_v45, %s5285_s20 }
 0x46f   :  { %2524 = vmatpush1.bf16.msra.mxu0 %v8103_v25  ;;  %4582 = vmatprep.subr.msk.bf16.mxu1 %vm9767_vm9, %v8075_v45  ;;  %v2646_v13 = vpop.permute.xlu1 %2645  ;;  %vm9781_vm9 = vmmov %vm9773_vm0 }
 0x470   :  { %4580 = vmatprep.subr.msk.bf16.mxu0 %vm9768_vm10, %v8098_v53  ;;  %vm9782_vm10 = vmmov %vm9773_vm0 }
 0x471   :  { %3115 = vrot.lane.b32.xlu0 %v7679_v36, %s5286_s21  ;;  %v2690_v36 = vsel %vm9770_vm13, %v8123_v41, %v2614_v60  ;;  %vm9785_vm13 = vmmov %vm9773_vm0 }
 0x472   :  { %2569 = vmatpush1.bf16.msra.mxu1 %v2502_v54  ;;  %3117 = vrot.lane.b32.xlu1 %v7683_v37, %s5286_s21  ;;  %v2691_v37 = vsel %vm9771_vm7, %v2614_v60, %v8105_v2  ;;  %v2620_v54 = vpop.permute.xlu0 %2619  ;;  %v2694_v60 = vsel %vm9774_vm14, %v2622_v32, %v8173_v9  ;;  %vm9786_vm7 = vmmov %vm9773_vm0 }
 0x473   :  { %2526 = vmatpush1.bf16.msra.mxu0 %v2496_v49  ;;  %2810 = vmatprep.subr.bf16.mxu1 %v8105_v2  ;;  %v8265_v24 = vpop.permute.xlu1 %2873  ;;  %v2689_v49 = vsel %vm9772_vm15, %v8003_v10, %v8123_v41  ;;  %v2695_v2 = vsel %vm9778_vm4, %v8009_v52, %v8129_v39  ;;  %v2698_v52 = vsel %vm9781_vm9, %v8017_v17, %v8135_v12  ;;  %vm9787_vm15 = vmmov %vm9773_vm0 }
 0x474   :  { %2767 = vmatprep.subr.bf16.mxu0 %v2690_v36  ;;  %vm9792_vm14 = vmmov %vm9773_vm0 }
 0x475   :  { %3113 = vrot.lane.b32.xlu0 %v7587_v35, %s5286_s21  ;;  %2583 = vmatmul.mubr.bf16.vlgmr.msra.gmra.mrb[20].mxu1 %v8258_v0  ;;  %v2693_v35 = vsel %vm9773_vm0, %v2620_v54, %v2622_v32  ;;  %vm9796_vm4 = vmmov %vm9773_vm0 }
 0x476   :  { %2811 = vmatpush1.bf16.msra.mxu1 %v2691_v37  ;;  %3119 = vrot.lane.b32.xlu1 %v7646_v23, %s5286_s21  ;;  %v2692_v23 = vsel %vm9775_vm2, %v8050_v40, %v2620_v54  ;;  %v2644_v40 = vpop.permute.xlu0 %2643  ;;  %vm9793_vm2 = vmmov %vm9773_vm0 }
 0x477   :  { %2540 = vmatmul.mubr.bf16.vlgmr.msra.gmra.mrb[12].mxu0 %v8258_v0  ;;  %2812 = vmatprep.subr.bf16.mxu1 %v8173_v9  ;;  %v8281_v36 = vpop.permute.xlu1 %2897  ;;  %v2701_v17 = vsel %vm9784_vm6, %v8054_v46, %v2644_v40  ;;  %v2704_v46 = vsel %vm9787_vm15, %v8023_v14, %v8141_v57  ;;  %v9789_v14 = vld [vmem:[#allocation19_spill] sm:$0xff]  ;;  %vm9799_vm9 = vmmov %vm9773_vm0  ;;  %vm9802_vm6 = vcmask 1042432  }
 0x478   :  { %2768 = vmatpush1.bf16.msra.mxu0 %v2689_v49  ;;  %4587 = vmatprep.mubr.msk.bf16.mxu1 %vm2491_vm11, %v8061_v61  ;;  %vm9805_vm15 = vmmov %vm9802_vm6 }
 0x479   :  { %2769 = vmatprep.subr.bf16.mxu0 %v2693_v35  ;;  %3123 = vrot.lane.b32.xlu0 %v7761_v22, %s5286_s21  ;;  %v2696_v22 = vsel %vm9776_vm12, %v8129_v39, %v8185_v33  ;;  %v2702_v39 = vsel %vm9782_vm10, %v2644_v40, %v2646_v13  ;;  %vm9794_vm12 = vmmov %vm9773_vm0 }
 0x47a   :  { %2813 = vmatpush1.bf16.msra.mxu1 %v2694_v60  ;;  %3125 = vrot.lane.b32.xlu1 %v7881_v21, %s5286_s21  ;;  %v2697_v21 = vsel %vm9777_vm3, %v8185_v33, %v8113_v15  ;;  %vm9795_vm3 = vmmov %vm9773_vm0 }
 0x47b   :  { %2814 = vmatprep.subr.bf16.mxu1 %v8113_v15  ;;  %v8295_v10 = vpop.permute.xlu1 %2687  ;;  %4585 = vmatprep.mubr.msk.bf16.mxu0 %vm2491_vm11, %v8061_v61  ;;  %vm9800_vm10 = vmmov %vm9773_vm0 }
 0x47c   :  { %2770 = vmatpush1.bf16.msra.mxu0 %v2692_v23 }
 0x47d   :  { %2771 = vmatprep.subr.bf16.mxu0 %v2696_v22  ;;  %3121 = vrot.lane.b32.xlu0 %v7742_v30, %s5286_s21  ;;  %v2699_v30 = vsel %vm9779_vm8, %v8135_v12, %v8191_v63  ;;  %vm9797_vm8 = vmmov %vm9773_vm0 }
 0x47e   :  { %2815 = vmatpush1.bf16.msra.mxu1 %v2697_v21  ;;  %3127 = vrot.lane.b32.xlu1 %v7866_v16, %s5286_s21  ;;  %v2700_v16 = vsel %vm9780_vm1, %v8191_v63, %v8121_v47  ;;  %vm9798_vm1 = vmmov %vm9773_vm0 }
 0x47f   :  { %2816 = vmatprep.subr.bf16.mxu1 %v8121_v47  ;;  %v8313_v41 = vpop.permute.xlu1 %2683  ;;  %v2705_v47 = vsel %vm9785_vm13, %v8141_v57, %v8207_v34  ;;  %vm9803_vm13 = vmmov %vm9773_vm0 }
 0x480   :  { %2772 = vmatpush1.bf16.msra.mxu0 %v2695_v2 }
 0x481   :  { %2773 = vmatprep.subr.bf16.mxu0 %v2699_v30  ;;  %3131 = vrot.lane.b32.xlu0 %v7774_v56, %s5286_s21  ;;  %v8332_v56 = vpop.permute.xlu0 %2871 }
 0x482   :  { %2817 = vmatpush1.bf16.msra.mxu1 %v2700_v16  ;;  %3133 = vrot.lane.b32.xlu1 %v7912_v5, %s5286_s21  ;;  %v2703_v5 = vsel %vm9783_vm5, %v2646_v13, %v8197_v28  ;;  %vm9801_vm5 = vmmov %vm9773_vm0 }
 0x483   :  { %2818 = vmatprep.subr.bf16.mxu1 %v8197_v28  ;;  %v8329_v15 = vpop.permute.xlu1 %2935 }
 0x484   :  { %2774 = vmatpush1.bf16.msra.mxu0 %v2698_v52 }
 0x485   :  { %2775 = vmatprep.subr.bf16.mxu0 %v2702_v39  ;;  %3129 = vrot.lane.b32.xlu0 %v7612_v55, %s5286_s21  ;;  %v2706_v55 = vsel %vm9786_vm7, %v8207_v34, %v8127_v44  ;;  %v9791_v34 = vld [vmem:[#allocation22_spill] sm:$0xff]  ;;  %vm9804_vm7 = vmmov %vm9802_vm6 }
 0x486   :  { %2819 = vmatpush1.bf16.msra.mxu1 %v2703_v5  ;;  %3135 = vrot.lane.b32.xlu1 %v7878_v51, %s5286_s21  ;;  %v8353_v51 = vpop.permute.xlu0 %2895  ;;  %v9807_v5 = vld [vmem:[#allocation57_spill] sm:$0xff] }
 0x487   :  { %2820 = vmatprep.subr.bf16.mxu1 %v8127_v44  ;;  %v2664_v12 = vpop.permute.xlu1 %2663 }
 0x488   :  { %2776 = vmatpush1.bf16.msra.mxu0 %v2701_v17  ;;  %v9808_v17 = vld [vmem:[#allocation9_spill] sm:$0xff] }
 0x489   :  { %2777 = vmatprep.subr.bf16.mxu0 %v2705_v47  ;;  %3139 = vrot.lane.b32.xlu0 %v7793_v43, %s5286_s21 }
 0x48a   :  { %2821 = vmatpush1.bf16.msra.mxu1 %v2706_v55  ;;  %3141 = vrot.lane.b32.xlu1 %v7938_v42, %s5286_s21  ;;  %v8362_v43 = vpop.permute.xlu0 %2681 }
 0x48b   :  { %2822 = vmatprep.subr.bf16.mxu1 %v2664_v12  ;;  %v2716_v40 = vsel %vm9801_vm5, %v8362_v43, %v8313_v41 }
 0x48c   :  { %2778 = vmatpush1.bf16.msra.mxu0 %v2704_v46  ;;  %v9812_v46 = vld [vmem:[#allocation4_spill] sm:$0xff] }
 0x48d   :  { %3137 = vrot.lane.b32.xlu0 %v7637_v26, %s5286_s21 }
 0x48e   :  { %3143 = vrot.lane.b32.xlu1 %v7904_v38, %s5286_s21  ;;  %v8372_v42 = vpop.permute.xlu0 %2933  ;;  %v8382_v38 = vpop.permute.xlu1 %2679 }
 0x491   :  { %2919 = vrot.lane.b32.xlu0 %v8226_v62, %s5285_s20 }
 0x492   :  { %2921 = vrot.lane.b32.xlu1 %v8230_v18, %s5285_s20  ;;  %v8378_v26 = vpop.permute.xlu0 %2685  ;;  %s5315_s20 = smov 88  }
 0x493   :  { %v2718_v22 = vsel %vm9799_vm9, %v8378_v26, %v8295_v10  ;;  %v2717_v2 = vsel %vm9803_vm13, %v8313_v41, %v8378_v26 }
 0x494   :  { %v2762_v52 = vsel %vm9805_vm15, %v2718_v22, 0  ;;  %v9835_v22 = vld [vmem:[#allocation59_spill] sm:$0xff] }
 0x495   :  { %3147 = vrot.lane.b32.xlu0 %v7825_v50, %s5286_s21 }
 0x496   :  { %3149 = vrot.lane.b32.xlu1 %v7955_v31, %s5286_s21  ;;  %v2658_v50 = vpop.permute.xlu0 %2657  ;;  %v9788_v31 = vld [vmem:[#allocation14_spill] sm:$0xff] }
 0x499   :  { %3145 = vrot.lane.b32.xlu0 %v7768_v48, %s5286_s21  ;;  %v8390_v48 = vpop.permute.xlu1 %2915 }
 0x49a   :  { %3151 = vrot.lane.b32.xlu1 %v7946_v58, %s5286_s21  ;;  %v2674_v58 = vpop.permute.xlu0 %2673 }
 0x49d   :  { %3155 = vrot.lane.b32.xlu0 %v7847_v3, %s5286_s21  ;;  %v9790_v3 = vld [vmem:[#allocation56_spill] sm:$0xff] }
 0x49e   :  { %3157 = vrot.lane.b32.xlu1 %v7968_v29, %s5286_s21  ;;  %v8398_v29 = vpop.permute.xlu1 %2931 }
 0x4a1   :  { %3153 = vrot.lane.b32.xlu0 %v7662_v1, %s5286_s21  ;;  %v8402_v1 = vpop.permute.xlu0 %2909 }
 0x4a2   :  { %3159 = vrot.lane.b32.xlu1 %v9788_v31, %s5286_s21 }
 0x4a5   :  { %3163 = vrot.lane.b32.xlu0 %v9789_v14, %s5286_s21  ;;  %v8408_v57 = vpop.permute.xlu0 %2925 }
 0x4a6   :  { %3165 = vrot.lane.b32.xlu1 %v8158_v19, %s5286_s21 }
 0x4a9   :  { %3161 = vrot.lane.b32.xlu0 %v9790_v3, %s5286_s21  ;;  %v2660_v63 = vpop.permute.xlu0 %2659  ;;  %v9818_v3 = vld [vmem:[#allocation5_spill] sm:$0xff] }
 0x4aa   :  { %3167 = vrot.lane.b32.xlu1 %v9791_v34, %s5286_s21  ;;  %v9819_v34 = vld [vmem:[#allocation52_spill] sm:$0xff] }
 0x4ad   :  { %3169 = vrot.lane.b32.xlu0 %v8169_v59, %s5286_s21 }
 0x4ae   :  { %3175 = vrot.lane.b32.xlu1 %v8175_v7, %s5286_s21  ;;  %v2672_v44 = vpop.permute.xlu1 %2671 }
 0x4b1   :  { %3179 = vrot.lane.b32.xlu0 %v8181_v8, %s5286_s21  ;;  %v2707_v8 = vsel %vm9793_vm2, %v2658_v50, %v2660_v63 }
 0x4b2   :  { %3181 = vrot.lane.b32.xlu1 %v8201_v4, %s5286_s21  ;;  %v8414_v19 = vpop.permute.xlu1 %2923 }
 0x4b5   :  { %3177 = vrot.lane.b32.xlu0 %v8103_v25, %s5286_s21  ;;  %v2666_v25 = vpop.permute.xlu0 %2665 }
 0x4b6   :  { %3183 = vrot.lane.b32.xlu1 %v8115_v20, %s5286_s21  ;;  %v2662_v59 = vpop.permute.xlu1 %2661 }
 0x4b7   :  { %v2708_v7 = vsel %vm9773_vm0, %v2660_v63, %v2662_v59  ;;  %v2709_v9 = vsel %vm9792_vm14, %v2662_v59, %v2664_v12  ;;  %vm9806_vm0 = vmmov %vm9802_vm6  ;;  %vm9810_vm14 = vcmask 916480  }
 0x4b8   :  { %2779 = vmatprep.subr.bf16.mxu0 %v2708_v7  ;;  %2823 = vmatpush1.bf16.msra.mxu1 %v2709_v9  ;;  %v2756_v39 = vsel %vm9806_vm0, %v2716_v40, 0  ;;  %vm9811_vm2 = vmmov %vm9810_vm14  ;;  %v9825_v9 = vld [vmem:[#allocation63_spill] sm:$0xff]  ;;  %v9837_v40 = vld [vmem:[#allocation54_spill] sm:$0xff] }
 0x4b9   :  { %3171 = vrot.lane.b32.xlu0 %v8226_v62, %s5286_s21  ;;  %2780 = vmatpush1.bf16.msra.mxu0 %v2707_v8  ;;  %v3365_v62 = vld [vmem:[%s9145_s4] sm:$0xff]  ;;  %v2676_v20 = vpop.permute.xlu0 %2675  ;;  %v2943_v12 = vsel %vm9811_vm2, %v9808_v17, %v9807_v5  ;;  %v9826_v8 = vld [vmem:[#allocation53_spill] sm:$0xff] }
 0x4ba   :  { %3173 = vrot.lane.b32.xlu1 %v8230_v18, %s5286_s21  ;;  %2824 = vmatprep.subr.bf16.mxu1 %v2672_v44  ;;  %v3366_v18 = vld [vmem:[%s9145_s4 + $0x8] sm:$0xff]  ;;  %v2713_v21 = vsel %vm9800_vm10, %v2674_v58, %v2676_v20  ;;  %v9816_v58 = vld [vmem:[#allocation6_spill] sm:$0xff]  ;;  %s5303_s4 = smov 91  }
 0x4bd   :  { %3185 = vrot.lane.b32.xlu0 %v8028_v11, %s5286_s21  ;;  %v8441_v11 = vpop.permute.xlu0 %2911 }
 0x4be   :  { %3187 = vrot.lane.b32.xlu1 %v8098_v53, %s5286_s21  ;;  %v2678_v53 = vpop.permute.xlu1 %2677 }
 0x4bf   :  { %v2714_v49 = vsel %vm9797_vm8, %v2676_v20, %v2678_v53  ;;  %v2715_v23 = vsel %vm9798_vm1, %v2678_v53, %v8382_v38  ;;  %vm9817_vm8 = vmmov %vm9811_vm2 }
 0x4c0   :  { %v2944_v14 = vsel %vm9817_vm8, %v9816_v58, %v8332_v56  ;;  %vm9821_vm1 = vmmov %vm9811_vm2 }
 0x4c1   :  { %3189 = vrot.lane.b32.xlu0 %v8081_v27, %s5286_s21  ;;  %v8443_v4 = vpop.permute.xlu0 %2917  ;;  %vm9822_vm9 = vmmov %vm9821_vm1 }
 0x4c2   :  { %3191 = vrot.lane.b32.xlu1 %v8075_v45, %s5286_s21  ;;  %v8445_v27 = vpop.permute.xlu1 %2913  ;;  %vm9824_vm10 = vmmov %vm9821_vm1  ;;  %s5304_s21 = smov 31  }
 0x4c3   :  { %vm9828_vm5 = vmmov %vm9821_vm1 }
 0x4c4   :  { %vm9831_vm13 = vmmov %vm9821_vm1 }
 0x4c5   :  { %3369 = vperm.xlu0 %4982, %v3365_v62   ;;  %v8447_v33 = vpop.permute.xlu0 %2927  ;;  %vm9834_vm15 = vmmov %vm9821_vm1 }
 0x4c6   :  { %3374 = vperm.xlu1 %4983, %v3366_v18   ;;  %v8449_v45 = vpop.permute.xlu1 %2929  ;;  %vm9836_vm0 = vmmov %vm9821_vm1 }
 0x4c7   :  { %vm9846_vm8 = vmmov %vm9836_vm0 }
 0x4db   :  { %v2668_v28 = vpop.permute.xlu0 %2667 }
 0x4dc   :  { %v2670_v32 = vpop.permute.xlu1 %2669  ;;  %v2710_v13 = vsel %vm9794_vm12, %v2666_v25, %v2668_v28  ;;  %vm9813_vm12 = vmmov %vm9811_vm2  ;;  %v9827_v25 = vld [vmem:[#allocation16_spill] sm:$0xff] }
 0x4dd   :  { %v2711_v37 = vsel %vm9795_vm3, %v2668_v28, %v2670_v32  ;;  %v2712_v54 = vsel %vm9796_vm4, %v2670_v32, %v2672_v44  ;;  %vm9814_vm3 = vmmov %vm9811_vm2  ;;  %v9820_v44 = vld [vmem:[#allocation58_spill] sm:$0xff]  ;;  %v2951_v62 = vsel %vm9828_vm5, %v9827_v25, %v9826_v8  ;;  %v9830_v28 = vld [vmem:[#allocation55_spill] sm:$0xff] }
 0x4de   :  { %2781 = vmatprep.subr.bf16.mxu0 %v2711_v37  ;;  %2825 = vmatpush1.bf16.msra.mxu1 %v2712_v54  ;;  %v2945_v26 = vsel %vm9814_vm3, %v8332_v56, %v8265_v24  ;;  %vm9815_vm4 = vmmov %vm9811_vm2  ;;  %v2948_v63 = vsel %vm9821_vm1, %v9820_v44, %v9819_v34  ;;  %v2950_v32 = vsel %vm9831_vm13, %v9830_v28, %v9827_v25 }
 0x4df   :  { %2782 = vmatpush1.bf16.msra.mxu0 %v2710_v13  ;;  %2826 = vmatprep.subr.bf16.mxu1 %v8382_v38  ;;  %v8456_v35 = vpop.permute.xlu0 %2937  ;;  %v2946_v31 = vsel %vm9815_vm4, %v8265_v24, %v8215_v6  ;;  %v9823_v24 = vld [vmem:[#allocation36_spill] sm:$0xff]  ;;  %v9832_v13 = vld [vmem:[#allocation65_spill] sm:$0xff]  ;;  %vm9841_vm2 = vmmov %vm9836_vm0 }
 0x4e0   :  { %v8458_v60 = vpop.permute.xlu1 %2939  ;;  %2783 = vmatprep.subr.bf16.mxu0 %v2714_v49  ;;  %v2947_v56 = vsel %vm9824_vm10, %v9823_v24, %v9820_v44  ;;  %vm9844_vm3 = vmmov %vm9836_vm0 }
 0x4e1   :  { %vm9845_vm4 = vmmov %vm9836_vm0 }
 0x4e2   :  { %2827 = vmatpush1.bf16.msra.mxu1 %v2715_v23  ;;  %v2955_v23 = vsel %vm9834_vm15, %v8281_v36, %v9832_v13  ;;  %vm9849_vm10 = vmmov %vm9836_vm0 }
 0x4e3   :  { %2784 = vmatpush1.bf16.msra.mxu0 %v2713_v21  ;;  %4586 = vmatprep.subr.msk.bf16.mxu1 %vm9802_vm6, %v8295_v10  ;;  %v8474_v30 = vpop.permute.xlu0 %3115  ;;  %v9809_v10 = vld [vmem:[#allocation33_spill] sm:$0xff]  ;;  %vm9829_vm6 = vmmov %vm9821_vm1  ;;  %v2953_v21 = vsel %vm9836_vm0, %v9835_v22, %v8353_v51 }
 0x4e4   :  { %v8476_v16 = vpop.permute.xlu1 %3117  ;;  %4584 = vmatprep.subr.msk.bf16.mxu0 %vm9804_vm7, %v2717_v2  ;;  %v2942_v47 = vsel %vm9810_vm14, %v9809_v10, %v9808_v17  ;;  %v2941_v43 = vsel %vm9813_vm12, %v9812_v46, %v9809_v10  ;;  %v2952_v53 = vsel %vm9829_vm6, %v9826_v8, %v9825_v9  ;;  %vm9833_vm7 = vmmov %vm9821_vm1  ;;  %v9838_v2 = vld [vmem:[#allocation67_spill] sm:$0xff] }
 0x4e5   :  { %v2954_v37 = vsel %vm9833_vm7, %v8353_v51, %v8281_v36  ;;  %vm9840_vm14 = vmmov %vm9836_vm0  ;;  %v2958_v36 = vsel %vm9841_vm2, %v9838_v2, %v9837_v40  ;;  %v9842_v10 = vld [vmem:[#allocation31_spill] sm:$0xff] }
 0x4e6   :  { %2829 = vmatpush1.bf16.msra.mxu1 %v2762_v52  ;;  %v9839_v52 = vld [vmem:[#allocation11_spill] sm:$0xff]  ;;  %vm9843_vm12 = vmmov %vm9836_vm0 }
 0x4e7   :  { %2786 = vmatpush1.bf16.msra.mxu0 %v2756_v39  ;;  %3062 = vmatprep.subr.bf16.mxu1 %v9807_v5  ;;  %v8485_v55 = vpop.permute.xlu0 %3113  ;;  %v2957_v39 = vsel %vm9840_vm14, %v9839_v52, %v9838_v2  ;;  %v2956_v51 = vsel %vm9843_vm12, %v9842_v10, %v9839_v52  ;;  %vm9847_vm1 = vmmov %vm9836_vm0 }
 0x4e8   :  { %v8487_v41 = vpop.permute.xlu1 %3119  ;;  %3019 = vmatprep.subr.bf16.mxu0 %v2942_v47  ;;  %v2960_v47 = vsel %vm9844_vm3, %v8441_v11, %v8445_v27  ;;  %vm9850_vm5 = vmmov %vm9836_vm0 }
 0x4e9   :  { %2843 = vmatmul.mubr.bf16.vlgmr.msra.gmra.mrb[24].mxu1 %v8258_v0  ;;  %vm9851_vm6 = vmmov %vm9836_vm0 }
 0x4ea   :  { %2800 = vmatmul.mubr.bf16.vlgmr.msra.gmra.mrb[16].mxu0 %v8258_v0  ;;  %3063 = vmatpush1.bf16.msra.mxu1 %v2943_v12  ;;  %vm9852_vm13 = vmmov %vm9836_vm0 }
 0x4eb   :  { %3020 = vmatpush1.bf16.msra.mxu0 %v2941_v43  ;;  %3064 = vmatprep.subr.bf16.mxu1 %v8215_v6  ;;  %v8501_v38 = vpop.permute.xlu0 %3123  ;;  %v2949_v6 = vsel %vm9822_vm9, %v9819_v34, %v9818_v3  ;;  %v2961_v43 = vsel %vm9845_vm4, %v8445_v27, %v8390_v48  ;;  %vm9848_vm9 = vmmov %vm9836_vm0  ;;  %vm9860_vm4 = vcmask 908288  }
 0x4ec   :  { %v8503_v50 = vpop.permute.xlu1 %3125  ;;  %3021 = vmatprep.subr.bf16.mxu0 %v2945_v26  ;;  %4591 = vmatprep.mubr.msk.bf16.mxu1 %vm2491_vm11, %v8061_v61  ;;  %v2959_v26 = vsel %vm9846_vm8, %v8402_v1, %v8441_v11  ;;  %vm9853_vm7 = vmmov %vm9836_vm0 }
 0x4ed   :  { %4589 = vmatprep.mubr.msk.bf16.mxu0 %vm2491_vm11, %v8061_v61  ;;  %v2965_v27 = vsel %vm9853_vm7, %v8408_v57, %v8447_v33  ;;  %vm9854_vm15 = vmmov %vm9836_vm0  ;;  %vm9855_vm0 = vcmask 1042432  }
 0x4ee   :  { %3065 = vmatpush1.bf16.msra.mxu1 %v2946_v31  ;;  %v2968_v44 = vsel %vm9854_vm15, %v8372_v42, %v8329_v15  ;;  %vm9856_vm14 = vmmov %vm9847_vm1  ;;  %v3194_v42 = vsel %vm9860_vm4, %v8474_v30, %v8476_v16 }
 0x4ef   :  { %3022 = vmatpush1.bf16.msra.mxu0 %v2944_v14  ;;  %3066 = vmatprep.subr.bf16.mxu1 %v9818_v3  ;;  %v8519_v59 = vpop.permute.xlu0 %3121  ;;  %vm9857_vm2 = vmmov %vm9855_vm0 }
 0x4f0   :  { %v8521_v7 = vpop.permute.xlu1 %3127  ;;  %3023 = vmatprep.subr.bf16.mxu0 %v2948_v63  ;;  %vm9858_vm12 = vmmov %vm9855_vm0 }
 0x4f1   :  { %vm9859_vm3 = vmmov %vm9855_vm0 }
 0x4f2   :  { %3067 = vmatpush1.bf16.msra.mxu1 %v2949_v6  ;;  %v3008_v57 = vsel %vm9859_vm3, %v2968_v44, 0  ;;  %vm9861_vm8 = vmmov %vm9860_vm4 }
 0x4f3   :  { %3024 = vmatpush1.bf16.msra.mxu0 %v2947_v56  ;;  %3068 = vmatprep.subr.bf16.mxu1 %v9825_v9  ;;  %v8533_v18 = vpop.permute.xlu0 %3131 }
 0x4f4   :  { %v8535_v20 = vpop.permute.xlu1 %3133  ;;  %3025 = vmatprep.subr.bf16.mxu0 %v2951_v62 }
 0x4f6   :  { %3069 = vmatpush1.bf16.msra.mxu1 %v2952_v53 }
 0x4f7   :  { %3026 = vmatpush1.bf16.msra.mxu0 %v2950_v32  ;;  %3070 = vmatprep.subr.bf16.mxu1 %v9832_v13  ;;  %v8547_v54 = vpop.permute.xlu0 %3129 }
 0x4f8   :  { %v8549_v49 = vpop.permute.xlu1 %3135  ;;  %3027 = vmatprep.subr.bf16.mxu0 %v2954_v37 }
 0x4fa   :  { %3071 = vmatpush1.bf16.msra.mxu1 %v2955_v23 }
 0x4fb   :  { %3028 = vmatpush1.bf16.msra.mxu0 %v2953_v21  ;;  %3072 = vmatprep.subr.bf16.mxu1 %v9837_v40  ;;  %v8561_v5 = vpop.permute.xlu0 %3139 }
 0x4fc   :  { %v8563_v17 = vpop.permute.xlu1 %3141  ;;  %3029 = vmatprep.subr.bf16.mxu0 %v2957_v39 }
 0x4fe   :  { %3073 = vmatpush1.bf16.msra.mxu1 %v2958_v36 }
 0x4ff   :  { %3030 = vmatpush1.bf16.msra.mxu0 %v2956_v51  ;;  %3074 = vmatprep.subr.bf16.mxu1 %v8390_v48  ;;  %v8575_v12 = vpop.permute.xlu0 %3137  ;;  %v2966_v48 = vsel %vm9850_vm5, %v8447_v33, %v8449_v45 }
 0x500   :  { %v8577_v46 = vpop.permute.xlu1 %3143  ;;  %3031 = vmatprep.subr.bf16.mxu0 %v2960_v47 }
 0x502   :  { %3075 = vmatpush1.bf16.msra.mxu1 %v2961_v43 }
 0x503   :  { %3032 = vmatpush1.bf16.msra.mxu0 %v2959_v26  ;;  %3076 = vmatprep.subr.bf16.mxu1 %v8414_v19  ;;  %v2920_v31 = vpop.permute.xlu0 %2919 }
 0x504   :  { %v2922_v58 = vpop.permute.xlu1 %2921  ;;  %v2962_v14 = vsel %vm9847_vm1, %v8443_v4, %v2920_v31  ;;  %v2967_v4 = vsel %vm9851_vm6, %v8449_v45, %v8398_v29  ;;  %vm9862_vm1 = vmmov %vm9860_vm4 }
 0x505   :  { %v2963_v3 = vsel %vm9848_vm9, %v2920_v31, %v2922_v58  ;;  %v2964_v34 = vsel %vm9849_vm10, %v2922_v58, %v8414_v19  ;;  %v2970_v19 = vsel %vm9852_vm13, %v8456_v35, %v8458_v60  ;;  %vm9863_vm9 = vmmov %vm9862_vm1 }
 0x506   :  { %3033 = vmatprep.subr.bf16.mxu0 %v2963_v3  ;;  %3077 = vmatpush1.bf16.msra.mxu1 %v2964_v34  ;;  %v3014_v6 = vsel %vm9858_vm12, %v2970_v19, 0  ;;  %v3197_v24 = vsel %vm9863_vm9, %v8501_v38, %v8503_v50  ;;  %vm9864_vm10 = vmmov %vm9862_vm1 }
 0x507   :  { %3034 = vmatpush1.bf16.msra.mxu0 %v2962_v14  ;;  %3078 = vmatprep.subr.bf16.mxu1 %v8398_v29  ;;  %v8595_v1 = vpop.permute.xlu0 %3147  ;;  %v2969_v29 = vsel %vm9856_vm14, %v8329_v15, %v8456_v35  ;;  %v3195_v15 = vsel %vm9861_vm8, %v8476_v16, %v8487_v41  ;;  %v3193_v35 = vsel %vm9862_vm1, %v8485_v55, %v8474_v30  ;;  %vm9865_vm5 = vmmov %vm9862_vm1 }
 0x508   :  { %v8597_v11 = vpop.permute.xlu1 %3149  ;;  %3035 = vmatprep.subr.bf16.mxu0 %v2966_v48  ;;  %v3198_v30 = vsel %vm9864_vm10, %v8503_v50, %v8521_v7  ;;  %v3196_v16 = vsel %vm9865_vm5, %v8519_v59, %v8501_v38  ;;  %vm9866_vm6 = vmmov %vm9862_vm1 }
 0x509   :  { %v3200_v55 = vsel %vm9866_vm6, %v8533_v18, %v8535_v20  ;;  %vm9867_vm13 = vmmov %vm9862_vm1 }
 0x50a   :  { %3079 = vmatpush1.bf16.msra.mxu1 %v2967_v4  ;;  %v3201_v50 = vsel %vm9867_vm13, %v8535_v20, %v8549_v49  ;;  %vm9869_vm7 = vmmov %vm9862_vm1 }
 0x50b   :  { %3036 = vmatpush1.bf16.msra.mxu0 %v2965_v27  ;;  %4590 = vmatprep.subr.msk.bf16.mxu1 %vm9855_vm0, %v8458_v60  ;;  %v3146_v45 = vpop.permute.xlu0 %3145  ;;  %v3203_v38 = vsel %vm9869_vm7, %v8561_v5, %v8563_v17  ;;  %vm9870_vm15 = vmmov %vm9862_vm1 }
 0x50c   :  { %v3152_v63 = vpop.permute.xlu1 %3151  ;;  %4588 = vmatprep.subr.msk.bf16.mxu0 %vm9857_vm2, %v2969_v29  ;;  %v3204_v25 = vsel %vm9870_vm15, %v8563_v17, %v8577_v46  ;;  %vm9871_vm0 = vmmov %vm9862_vm1 }
 0x50d   :  { %v3202_v62 = vsel %vm9871_vm0, %v8575_v12, %v8561_v5  ;;  %vm9872_vm14 = vmmov %vm9871_vm0 }
 0x50e   :  { %3081 = vmatpush1.bf16.msra.mxu1 %v3014_v6  ;;  %vm9873_vm2 = vmmov %vm9871_vm0 }
 0x50f   :  { %3038 = vmatpush1.bf16.msra.mxu0 %v3008_v57  ;;  %3314 = vmatprep.subr.bf16.mxu1 %v8487_v41  ;;  %v3156_v33 = vpop.permute.xlu0 %3155  ;;  %v3207_v28 = vsel %vm9873_vm2, %v8597_v11, %v3152_v63  ;;  %vm9874_vm12 = vmmov %vm9871_vm0 }
 0x510   :  { %v3158_v60 = vpop.permute.xlu1 %3157  ;;  %3271 = vmatprep.subr.bf16.mxu0 %v3194_v42  ;;  %v3205_v32 = vsel %vm9874_vm12, %v3146_v45, %v8595_v1  ;;  %vm9875_vm3 = vmmov %vm9871_vm0  ;;  %vm9889_vm12 = vcmask 1042432  }
 0x511   :  { %3095 = vmatmul.mubr.bf16.vlgmr.msra.gmra.mrb[28].mxu1 %v8258_v0  ;;  %v3209_v13 = vsel %vm9875_vm3, %v3156_v33, %v3158_v60  ;;  %vm9876_vm4 = vmmov %vm9871_vm0 }
 0x512   :  { %3052 = vmatmul.mubr.bf16.vlgmr.msra.gmra.mrb[20].mxu0 %v8258_v0  ;;  %3315 = vmatpush1.bf16.msra.mxu1 %v3195_v15  ;;  %vm9877_vm8 = vmmov %vm9871_vm0 }
 0x513   :  { %3272 = vmatpush1.bf16.msra.mxu0 %v3193_v35  ;;  %3316 = vmatprep.subr.bf16.mxu1 %v8521_v7  ;;  %v3154_v56 = vpop.permute.xlu0 %3153  ;;  %vm9879_vm9 = vmmov %vm9871_vm0 }
 0x514   :  { %v3160_v9 = vpop.permute.xlu1 %3159  ;;  %3273 = vmatprep.subr.bf16.mxu0 %v3197_v24  ;;  %4593 = vmatprep.mubr.msk.bf16.mxu0 %vm2491_vm11, %v8061_v61  ;;  %v3208_v23 = vsel %vm9877_vm8, %v3154_v56, %v3156_v33  ;;  %vm9880_vm10 = vmmov %vm9871_vm0 }
 0x515   :  { %4595 = vmatprep.mubr.msk.bf16.mxu1 %vm2491_vm11, %v8061_v61  ;;  %vm9868_vm11 = vmmov %vm9862_vm1 }
 0x516   :  { %3317 = vmatpush1.bf16.msra.mxu1 %v3198_v30  ;;  %v3199_v61 = vsel %vm9868_vm11, %v8547_v54, %v8533_v18  ;;  %v3206_v18 = vsel %vm9872_vm14, %v8595_v1, %v8597_v11  ;;  %vm9878_vm1 = vmmov %vm9871_vm0  ;;  %v9893_v1 = vmov 0  }
 0x517   :  { %3274 = vmatpush1.bf16.msra.mxu0 %v3196_v16  ;;  %3318 = vmatprep.subr.bf16.mxu1 %v8549_v49  ;;  %v3164_v41 = vpop.permute.xlu0 %3163  ;;  %v3210_v49 = vsel %vm9876_vm4, %v3158_v60, %v3160_v9  ;;  %vm9881_vm5 = vmmov %vm9871_vm0 }
 0x518   :  { %v3166_v8 = vpop.permute.xlu1 %3165  ;;  %3275 = vmatprep.subr.bf16.mxu0 %v3200_v55  ;;  %vm9882_vm6 = vmmov %vm9871_vm0 }
 0x519   :  { %v3212_v22 = vsel %vm9878_vm1, %v3164_v41, %v3166_v8  ;;  %vm9883_vm13 = vmmov %vm9871_vm0  ;;  %vm4031_vm1 = vcmask 130048  }
 0x51a   :  { %3319 = vmatpush1.bf16.msra.mxu1 %v3201_v50  ;;  %vm9884_vm11 = vmmov %vm9871_vm0 }
 0x51b   :  { %3276 = vmatpush1.bf16.msra.mxu0 %v3199_v61  ;;  %3320 = vmatprep.subr.bf16.mxu1 %v8577_v46  ;;  %v3162_v59 = vpop.permute.xlu0 %3161  ;;  %vm9885_vm7 = vmmov %vm9871_vm0 }
 0x51c   :  { %v3168_v7 = vpop.permute.xlu1 %3167  ;;  %3277 = vmatprep.subr.bf16.mxu0 %v3203_v38  ;;  %v3211_v52 = vsel %vm9880_vm10, %v3162_v59, %v3164_v41  ;;  %vm9886_vm15 = vmmov %vm9871_vm0 }
 0x51d   :  { %v3213_v2 = vsel %vm9879_vm9, %v3166_v8, %v3168_v7  ;;  %vm9887_vm14 = vmmov %vm9871_vm0  ;;  %vm9894_vm9 = vcmask 7168  }
 0x51e   :  { %3321 = vmatpush1.bf16.msra.mxu1 %v3204_v25  ;;  %vm9888_vm2 = vmmov %vm9871_vm0 }
 0x51f   :  { %3278 = vmatpush1.bf16.msra.mxu0 %v3202_v62  ;;  %3322 = vmatprep.subr.bf16.mxu1 %v3152_v63  ;;  %v3170_v20 = vpop.permute.xlu0 %3169  ;;  %vm9890_vm3 = vmmov %vm9889_vm12 }
 0x520   :  { %v3176_v53 = vpop.permute.xlu1 %3175  ;;  %3279 = vmatprep.subr.bf16.mxu0 %v3206_v18  ;;  %vm9891_vm4 = vmmov %vm9890_vm3 }
 0x521   :  { %vm9892_vm8 = vmmov %vm9890_vm3 }
 0x522   :  { %3323 = vmatpush1.bf16.msra.mxu1 %v3207_v28  ;;  %vm9895_vm10 = vmmov %vm9894_vm9 }
 0x523   :  { %3280 = vmatpush1.bf16.msra.mxu0 %v3205_v32  ;;  %3324 = vmatprep.subr.bf16.mxu1 %v3160_v9  ;;  %v3180_v37 = vpop.permute.xlu0 %3179 }
 0x524   :  { %v3182_v54 = vpop.permute.xlu1 %3181  ;;  %3281 = vmatprep.subr.bf16.mxu0 %v3209_v13 }
 0x525   :  { %v3218_v51 = vsel %vm9884_vm11, %v3180_v37, %v3182_v54 }
 0x526   :  { %3325 = vmatpush1.bf16.msra.mxu1 %v3210_v49 }
 0x527   :  { %3282 = vmatpush1.bf16.msra.mxu0 %v3208_v23  ;;  %3326 = vmatprep.subr.bf16.mxu1 %v3168_v7  ;;  %v3178_v21 = vpop.permute.xlu0 %3177 }
 0x528   :  { %v3184_v40 = vpop.permute.xlu1 %3183  ;;  %3283 = vmatprep.subr.bf16.mxu0 %v3212_v22  ;;  %v3217_v43 = vsel %vm9886_vm15, %v3178_v21, %v3180_v37 }
 0x529   :  { %v3219_v46 = vsel %vm9885_vm7, %v3182_v54, %v3184_v40 }
 0x52a   :  { %3327 = vmatpush1.bf16.msra.mxu1 %v3213_v2 }
 0x52b   :  { %3284 = vmatpush1.bf16.msra.mxu0 %v3211_v52  ;;  %3328 = vmatprep.subr.bf16.mxu1 %v3176_v53  ;;  %v3172_v39 = vpop.permute.xlu0 %3171 }
 0x52c   :  { %v3174_v5 = vpop.permute.xlu1 %3173  ;;  %v3214_v17 = vsel %vm9881_vm5, %v3170_v20, %v3172_v39  ;;  %vm9896_vm5 = vmmov %vm9894_vm9 }
 0x52d   :  { %v3216_v36 = vsel %vm9882_vm6, %v3174_v5, %v3176_v53  ;;  %v3215_v10 = vsel %vm9883_vm13, %v3172_v39, %v3174_v5  ;;  %vm9897_vm6 = vmmov %vm9896_vm5 }
 0x52e   :  { %3285 = vmatprep.subr.bf16.mxu0 %v3215_v10  ;;  %3329 = vmatpush1.bf16.msra.mxu1 %v3216_v36  ;;  %vm9898_vm13 = vmmov %vm9896_vm5 }
 0x52f   :  { %3286 = vmatpush1.bf16.msra.mxu0 %v3214_v17  ;;  %3330 = vmatprep.subr.bf16.mxu1 %v3184_v40  ;;  %v3186_v47 = vpop.permute.xlu0 %3185  ;;  %vm9899_vm11 = vmmov %vm9896_vm5 }
 0x530   :  { %v3188_v12 = vpop.permute.xlu1 %3187  ;;  %3287 = vmatprep.subr.bf16.mxu0 %v3218_v51  ;;  %vm9900_vm7 = vmmov %vm9896_vm5 }
 0x531   :  { %v3220_v26 = vsel %vm9871_vm0, %v3186_v47, %v3188_v12  ;;  %vm9901_vm15 = vmmov %vm9896_vm5 }
 0x532   :  { %3331 = vmatpush1.bf16.msra.mxu1 %v3219_v46  ;;  %v3260_v34 = vsel %vm9891_vm4, %v3220_v26, 0  ;;  %vm9902_vm0 = vmmov %vm9896_vm5 }
 0x533   :  { %3288 = vmatpush1.bf16.msra.mxu0 %v3217_v43  ;;  %v3190_v31 = vpop.permute.xlu0 %3189  ;;  %vm9907_vm4 = vmmov %vm9902_vm0 }
 0x534   :  { %v3192_v58 = vpop.permute.xlu1 %3191  ;;  %v3221_v14 = vsel %vm9887_vm14, %v3188_v12, %v3190_v31  ;;  %vm9903_vm14 = vmmov %vm9902_vm0 }
 0x535   :  { %v3222_v3 = vsel %vm9888_vm2, %v3190_v31, %v3192_v58  ;;  %4594 = vmatprep.subr.msk.bf16.mxu1 %vm9889_vm12, %v3192_v58  ;;  %4592 = vmatprep.subr.msk.bf16.mxu0 %vm9890_vm3, %v3221_v14  ;;  %vm9904_vm2 = vmmov %vm9902_vm0 }
 0x536   :  { %v3266_v48 = vsel %vm9892_vm8, %v3222_v3, 0  ;;  %vm9905_vm12 = vmmov %vm9902_vm0 }
 0x537   :  { %3290 = vmatpush1.bf16.msra.mxu0 %v3260_v34  ;;  %3333 = vmatpush1.bf16.msra.mxu1 %v3266_v48  ;;  %vm9906_vm3 = vmmov %vm9902_vm0 }
 0x538   :  { %4152 = vmatprep.subr.bf16.mxu1 %v9893_v1  ;;  %vm9908_vm8 = vmmov %vm9902_vm0 }
 0x53a   :  { %3304 = vmatmul.mubr.bf16.vlgmr.msra.gmra.mrb[24].mxu0 %v8258_v0  ;;  %3347 = vmatmul.mubr.bf16.vlgmr.msra.gmra.mrb[32].mxu1 %v8258_v0 }
 0x544   :  { %v8698_v23 = vpop.permute.xlu0 %3369 }
 0x545   :  { %v8700_v22 = vpop.permute.xlu1 %3374 }
 0x548   :  { %v2584_v11 = vpop.f32.mrb[20].mxu1 }
 0x549   :  { %v2586_v4 = vpop.f32.mrb[21].mxu1 }
 0x54a   :  { %v2588_v19 = vpop.f32.mrb[22].mxu1  ;;  %v2541_v27 = vpop.f32.mrb[12].mxu0 }
 0x54b   :  { %v2590_v44 = vpop.f32.mrb[23].mxu1  ;;  %v2543_v29 = vpop.f32.mrb[13].mxu0 }
 0x54c   :  { %v2545_v45 = vpop.f32.mrb[14].mxu0 }
 0x54d   :  { %v2547_v63 = vpop.f32.mrb[15].mxu0 }
 0x5bc   :  { %v2844_v6 = vpop.f32.mrb[24].mxu1 }
 0x5bd   :  { %v2855_v57 = vmax.f32 %v2584_v11, %v2844_v6  ;;  %v2801_v42 = vpop.f32.mrb[16].mxu0  ;;  %v2846_v33 = vpop.f32.mrb[25].mxu1 }
 0x5be   :  { %v2853_v60 = vmax.f32 %v2541_v27, %v2801_v42  ;;  %v2856_v15 = vmax.f32 %v2586_v4, %v2846_v33  ;;  %v2803_v35 = vpop.f32.mrb[17].mxu0  ;;  %v2848_v24 = vpop.f32.mrb[26].mxu1 }
 0x5bf   :  { %v2854_v56 = vmax.f32 %v2543_v29, %v2803_v35  ;;  %v2859_v9 = vmax.f32 %v2588_v19, %v2848_v24  ;;  %v2805_v30 = vpop.f32.mrb[18].mxu0  ;;  %v2850_v0 = vpop.f32.mrb[27].mxu1  ;;  %v5231_v24 = vld [vmem:[%s9146_s5 + $0x4] ss:$16 sps:$4 sm:$0xff]  }
 0x5c0   :  { %v2857_v16 = vmax.f32 %v2545_v45, %v2805_v30  ;;  %v2860_v55 = vmax.f32 %v2590_v44, %v2850_v0  ;;  %v2807_v41 = vpop.f32.mrb[19].mxu0  ;;  %4088 = vmatprep.mubr.bf16.mxu0 %v5231_v24  ;;  %v3796_v30 = vld [vmem:[%s9147_s6 + $0x8] sm:$0xff]  ;;  %v3797_v0 = vld [vmem:[%s9147_s6 + $0x10] sm:$0xff] }
 0x5c1   :  { %v2858_v8 = vmax.f32 %v2547_v63, %v2807_v41  ;;  %v3800_v41 = vld [vmem:[%s9147_s6 + $0x28] sm:$0xff] }
 0x5e4   :  { %v3096_v50 = vpop.f32.mrb[28].mxu1 }
 0x5e5   :  { %v3107_v61 = vmax.f32 %v2855_v57, %v3096_v50  ;;  %v3053_v38 = vpop.f32.mrb[20].mxu0  ;;  %v3098_v59 = vpop.f32.mrb[29].mxu1  ;;  %v3802_v50 = vld [vmem:[%s9147_s6 + $0x38] sm:$0xff] }
 0x5e6   :  { %v3105_v7 = vmax.f32 %v2853_v60, %v3053_v38  ;;  %v3108_v25 = vmax.f32 %v2856_v15, %v3098_v59  ;;  %v3055_v62 = vpop.f32.mrb[21].mxu0  ;;  %v3100_v18 = vpop.f32.mrb[30].mxu1  ;;  %v3804_v38 = vld [vmem:[%s9147_s6 + $0x48] sm:$0xff]  ;;  %v3805_v59 = vld [vmem:[%s9147_s6 + $0x50] sm:$0xff] }
 0x5e7   :  { %v8694_v20 = vmax.f32 %v2854_v56, %v3055_v62  ;;  %v3111_v53 = vmax.f32 %v2859_v9, %v3100_v18  ;;  %v3057_v28 = vpop.f32.mrb[22].mxu0  ;;  %v3102_v32 = vpop.f32.mrb[31].mxu1  ;;  %v5234_v56 = vld [vmem:[%s9146_s5 + $0xc] ss:$16 sps:$4 sm:$0xff]   ;;  %v3795_v9 = vld [vmem:[%s9147_s6] sm:$0xff] }
 0x5e8   :  { %v3109_v13 = vmax.f32 %v2857_v16, %v3057_v28  ;;  %v3112_v37 = vmax.f32 %v2860_v55, %v3102_v32  ;;  %v3059_v54 = vpop.f32.mrb[23].mxu0  ;;  %4628 = vmatprep.mubr.msk.bf16.mxu1 %vm4031_vm1, %v5234_v56  ;;  %v3798_v16 = vld [vmem:[%s9147_s6 + $0x18] sm:$0xff]  ;;  %v3799_v55 = vld [vmem:[%s9147_s6 + $0x20] sm:$0xff]  ;;  %v3809_v32 = vld [vmem:[%s9147_s6 + $0x70] sm:$0xff] }
 0x5e9   :  { %v8696_v49 = vmax.f32 %v2858_v8, %v3059_v54  ;;  %v3801_v8 = vld [vmem:[%s9147_s6 + $0x30] sm:$0xff]  ;;  %v3807_v18 = vld [vmem:[%s9147_s6 + $0x60] sm:$0xff] }
 0x60d   :  { %v3305_v21 = vpop.f32.mrb[24].mxu0  ;;  %v3348_v40 = vpop.f32.mrb[32].mxu1 }
 0x60e   :  { %v3357_v2 = vmax.f32 %v3105_v7, %v3305_v21  ;;  %v3359_v52 = vmax.f32 %v3107_v61, %v3348_v40  ;;  %v8702_v39 = vpop.f32.mrb[25].mxu0  ;;  %v3350_v5 = vpop.f32.mrb[33].mxu1  ;;  %v3803_v61 = vld [vmem:[%s9147_s6 + $0x40] sm:$0xff]  ;;  %v3806_v7 = vld [vmem:[%s9147_s6 + $0x58] sm:$0xff] }
 0x60f   :  { %v3358_v17 = vmax.f32 %v8694_v20, %v8702_v39  ;;  %v3360_v36 = vmax.f32 %v3108_v25, %v3350_v5  ;;  %v3309_v10 = vpop.f32.mrb[26].mxu0  ;;  %v3352_v51 = vpop.f32.mrb[34].mxu1  ;;  %v3808_v20 = vld [vmem:[%s9147_s6 + $0x68] sm:$0xff]  ;;  %v4285_v40 = vld [vmem:[%s9148_s8 + $0x18] sm:$0xff] }
 0x610   :  { %v3379_v47 = vadd.f32 %v8698_v23, %v3359_v52  ;;  %v3361_v12 = vmax.f32 %v3109_v13, %v3309_v10  ;;  %v3363_v46 = vmax.f32 %v3111_v53, %v3352_v51  ;;  %v8707_v43 = vpop.f32.mrb[27].mxu0  ;;  %v3354_v26 = vpop.f32.mrb[35].mxu1  ;;  %v8723_v45 = vadd.f32 %v8698_v23, %v3357_v2  ;;  %v4282_v13 = vld [vmem:[%s9148_s8] sm:$0xff]  ;;  %v4287_v5 = vld [vmem:[%s9148_s8 + $0x28] sm:$0xff]  ;;  %v4289_v51 = vld [vmem:[%s9148_s8 + $0x38] sm:$0xff] }
 0x611   :  { %v3362_v31 = vmax.f32 %v8696_v49, %v8707_v43  ;;  %v3364_v58 = vmax.f32 %v3112_v37, %v3354_v26  ;;  %v3380_v4 = vadd.f32 %v8698_v23, %v3360_v36  ;;  %v8749_v33 = vadd.f32 %v8698_v23, %v3358_v17  ;;  %v4283_v49 = vld [vmem:[%s9148_s8 + $0x8] sm:$0xff]  ;;  %v4284_v23 = vld [vmem:[%s9148_s8 + $0x10] sm:$0xff]  ;;  %v4286_v2 = vld [vmem:[%s9148_s8 + $0x20] sm:$0xff] }
 0x612   :  { %v3383_v14 = vadd.f32 %v8700_v22, %v3363_v46  ;;  %v3387_v3 = vmax.f32 %v3379_v47, 0.0  ;;  %v8720_v29 = vadd.f32 %v8700_v22, %v3361_v12  ;;  %v3385_v6 = vmax.f32 %v8723_v45, 0.0  ;;  %v4288_v17 = vld [vmem:[%s9148_s8 + $0x30] sm:$0xff]  ;;  %v4290_v47 = vld [vmem:[%s9148_s8 + $0x40] sm:$0xff]  ;;  %v4291_v43 = vld [vmem:[%s9148_s8 + $0x48] sm:$0xff] }
 0x613   :  { %v3384_v48 = vadd.f32 %v8700_v22, %v3364_v58  ;;  %v3388_v27 = vmax.f32 %v3380_v4, 0.0  ;;  %v8743_v42 = vadd.f32 %v8700_v22, %v3362_v31  ;;  %v3386_v15 = vmax.f32 %v8749_v33, 0.0  ;;  %v4292_v26 = vld [vmem:[%s9148_s8 + $0x50] sm:$0xf] }
 0x614   :  { %v3391_v34 = vmax.f32 %v3383_v14, 0.0  ;;  %v3389_v63 = vmax.f32 %v8720_v29, 0.0 }
 0x615   :  { %v3392_v19 = vmax.f32 %v3384_v48, 0.0  ;;  %v3390_v60 = vmax.f32 %v8743_v42, 0.0 }
 0x616   :  { %v4989_v11 = vpack.i.bf16 %v3391_v34, %v3387_v3  ;;  %v5089_v57 = vpack.i.bf16 %v3389_v63, %v3385_v6 }
 0x617   :  { %v8715_v44 = vpack.i.bf16 %v3392_v19, %v3388_v27  ;;  %v5199_v35 = vpack.i.bf16 %v3390_v60, %v3386_v15  ;;  %v4497_v19 = vld [vmem:[%s9149_s10] sm:$0xff] }
 0x618   :  { %4990 = vrot.lane.b32.xlu0 %v4989_v11, %s5289_s24  ;;  %4985 = vrot.lane.b32.xlu1 %v4989_v11, %s5303_s4  ;;  %s5319_s4 = smov 61  }
 0x61c   :  { %4995 = vrot.lane.b32.xlu0 %v4989_v11, %s5304_s21  ;;  %5055 = vrot.lane.b32.xlu1 %v4989_v11, %s5305_s2  ;;  %s5320_s21 = smov 64   ;;  %s5321_s2 = smov 121  }
 0x620   :  { %5000 = vrot.lane.b32.xlu0 %v4989_v11, %s5306_s13  ;;  %5060 = vrot.lane.b32.xlu1 %v4989_v11, %s5307_s17  ;;  %s5322_s13 = smov 90   ;;  %s5323_s17 = smov 26  }
 0x624   :  { %5005 = vrot.lane.b32.xlu0 %v4989_v11, %s5283_s0  ;;  %5065 = vrot.lane.b32.xlu1 %v4989_v11, %s5308_s18  ;;  %s5324_s18 = smov 58  }
 0x628   :  { %5010 = vrot.lane.b32.xlu0 %v4989_v11, %s5309_s22  ;;  %5070 = vrot.lane.b32.xlu1 %v4989_v11, %s5293_s1  ;;  %s5312_s1 = smov 27   ;;  %s5325_s22 = smov 62  }
 0x62c   :  { %5015 = vrot.lane.b32.xlu0 %v4989_v11, %s5310_s23  ;;  %5075 = vrot.lane.b32.xlu1 %v4989_v11, %s5311_s26  ;;  %s5326_s23 = smov 122   ;;  %s5327_s26 = smov 56  }
 0x630   :  { %5020 = vrot.lane.b32.xlu0 %v4989_v11, %s5295_s30  ;;  %5080 = vrot.lane.b32.xlu1 %v4989_v11, %s5299_s15  ;;  %s5318_s15 = smov 28  }
 0x634   :  { %5025 = vrot.lane.b32.xlu0 %v4989_v11, %s5312_s1  ;;  %5090 = vrot.lane.b32.xlu1 %v5089_v57, %s5313_s27  ;;  %s5328_s1 = smov 24   ;;  %s5329_s27 = smov 60  }
 0x638   :  { %5030 = vrot.lane.b32.xlu0 %v4989_v11, %s5314_s3  ;;  %5095 = vrot.lane.b32.xlu1 %v5089_v57, %s5315_s20  ;;  %s5331_s3 = smov 120  }
 0x63c   :  { %5035 = vrot.lane.b32.xlu0 %v4989_v11, %s5316_s28  ;;  %5100 = vrot.lane.b32.xlu1 %v5089_v57, %s5284_s19 }
 0x640   :  { %5040 = vrot.lane.b32.xlu0 %v4989_v11, %s5317_s29  ;;  %5105 = vrot.lane.b32.xlu1 %v5089_v57, %s5318_s15 }
 0x644   :  { %5045 = vrot.lane.b32.xlu0 %v4989_v11, %s5319_s4  ;;  %5110 = vrot.lane.b32.xlu1 %v5089_v57, %s5320_s21 }
 0x648   :  { %5050 = vrot.lane.b32.xlu0 %v4989_v11, %s5321_s2  ;;  %5115 = vrot.lane.b32.xlu1 %v5089_v57, %s5296_s12 }
 0x64c   :  { %5085 = vrot.lane.b32.xlu0 %v5089_v57, %s5322_s13  ;;  %5120 = vrot.lane.b32.xlu1 %v5089_v57, %s5323_s17 }
 0x650   :  { %5155 = vrot.lane.b32.xlu0 %v5089_v57, %s5324_s18  ;;  %5125 = vrot.lane.b32.xlu1 %v5089_v57, %s5325_s22 }
 0x654   :  { %5160 = vrot.lane.b32.xlu0 %v5089_v57, %s5291_s25  ;;  %5130 = vrot.lane.b32.xlu1 %v5089_v57, %s5326_s23  ;;  %s5330_s25 = smov 32  }
 0x658   :  { %5170 = vrot.lane.b32.xlu0 %v5089_v57, %s5327_s26  ;;  %5135 = vrot.lane.b32.xlu1 %v5089_v57, %s5328_s1 }
 0x65c   :  { %5175 = vrot.lane.b32.xlu0 %v5089_v57, %s5298_s14  ;;  %5140 = vrot.lane.b32.xlu1 %v5089_v57, %s5329_s27 }
 0x660   :  { %5185 = vrot.lane.b32.xlu0 %v5089_v57, %s5330_s25  ;;  %5145 = vrot.lane.b32.xlu1 %v5089_v57, %s5331_s3 }
 0x664   :  { %5190 = vrot.lane.b32.xlu0 %v5089_v57, %s5300_s16  ;;  %5150 = vrot.lane.b32.xlu1 %v8715_v44, %s5289_s24 }
 0x668   :  { %5200 = vrot.lane.b32.xlu0 %v5199_v35, %s5284_s19  ;;  %5165 = vrot.lane.b32.xlu1 %v8715_v44, %s5283_s0 }
 0x66c   :  { %5205 = vrot.lane.b32.xlu0 %v5199_v35, %s5296_s12  ;;  %5180 = vrot.lane.b32.xlu1 %v8715_v44, %s5295_s30 }
 0x670   :  { %5210 = vrot.lane.b32.xlu0 %v5199_v35, %s5326_s23  ;;  %5195 = vrot.lane.b32.xlu1 %v8715_v44, %s5316_s28 }
 0x674   :  { %5215 = vrot.lane.b32.xlu0 %v5199_v35, %s5331_s3  ;;  %5220 = vrot.lane.b32.xlu1 %v8715_v44, %s5321_s2  ;;  %v4498_v35 = vld [vmem:[%s9149_s10 + $0x8] sm:$0x3] }
 0x678   :  { %3812 = vperm.xlu0 %4982, %v3795_v9   ;;  %3817 = vperm.xlu1 %4983, %v3796_v30  }
 0x67c   :  { %3822 = vperm.xlu0 %4982, %v3797_v0   ;;  %3827 = vperm.xlu1 %4983, %v3798_v16  }
 0x680   :  { %3832 = vperm.xlu0 %4982, %v3799_v55   ;;  %3837 = vperm.xlu1 %4983, %v3800_v41  }
 0x684   :  { %3842 = vperm.xlu0 %4982, %v3801_v8   ;;  %3847 = vperm.xlu1 %4983, %v3802_v50  }
 0x688   :  { %3852 = vperm.xlu0 %4982, %v3803_v61   ;;  %3857 = vperm.xlu1 %4983, %v3804_v38  }
 0x68a   :  { %v8813_v25 = vpop.permute.xlu0 %4990  ;;  %v8815_v62 = vpop.permute.xlu1 %4985 }
 0x68c   :  { %3862 = vperm.xlu0 %4982, %v3805_v59   ;;  %3867 = vperm.xlu1 %4983, %v3806_v7   ;;  %v4993_v7 = vunpack.i.h.bf16 %v8813_v25 }
 0x68e   :  { %v4996_v53 = vpop.permute.xlu0 %4995  ;;  %v8823_v28 = vpop.permute.xlu1 %5055 }
 0x68f   :  { %v4998_v14 = vunpack.i.h.bf16 %v4996_v53  ;;  %v4997_v3 = vunpack.i.l.bf16 %v4996_v53 }
 0x690   :  { %3872 = vperm.xlu0 %4982, %v3807_v18   ;;  %3877 = vperm.xlu1 %4983, %v3808_v20   ;;  %v4992_v18 = vunpack.i.l.bf16 %v8813_v25 }
 0x692   :  { %v8831_v37 = vpop.permute.xlu0 %5000  ;;  %v8833_v54 = vpop.permute.xlu1 %5060 }
 0x694   :  { %3882 = vperm.xlu0 %4982, %v3809_v32   ;;  %4295 = vperm.xlu1 %4983, %v4282_v13   ;;  %v4988_v32 = vunpack.i.h.bf16 %v8815_v62  ;;  %v4987_v13 = vunpack.i.l.bf16 %v8815_v62 }
 0x696   :  { %v8841_v22 = vpop.permute.xlu0 %5005  ;;  %v8843_v21 = vpop.permute.xlu1 %5065 }
 0x698   :  { %4300 = vperm.xlu0 %4982, %v4283_v49   ;;  %4305 = vperm.xlu1 %4983, %v4284_v23   ;;  %v3403_v49 = vsel %vm9898_vm13, %v3389_v63, %v4993_v7  ;;  %v3402_v23 = vsel %vm9899_vm11, %v3385_v6, %v4992_v18  ;;  %vm9913_vm13 = vmmov %vm9902_vm0 }
 0x699   :  { %vm9914_vm11 = vmmov %vm9902_vm0 }
 0x69a   :  { %v5011_v52 = vpop.permute.xlu0 %5010  ;;  %v8851_v39 = vpop.permute.xlu1 %5070 }
 0x69b   :  { %v5013_v0 = vunpack.i.h.bf16 %v5011_v52  ;;  %v5012_v16 = vunpack.i.l.bf16 %v5011_v52  ;;  %v5002_v52 = vunpack.i.l.bf16 %v8831_v37 }
 0x69c   :  { %4310 = vperm.xlu0 %4982, %v4285_v40   ;;  %4315 = vperm.xlu1 %4983, %v4286_v2   ;;  %v5003_v2 = vunpack.i.h.bf16 %v8831_v37 }
 0x69e   :  { %v8859_v36 = vpop.permute.xlu0 %5015  ;;  %v8861_v10 = vpop.permute.xlu1 %5075 }
 0x6a0   :  { %4320 = vperm.xlu0 %4982, %v4287_v5   ;;  %4325 = vperm.xlu1 %4983, %v4288_v17   ;;  %v5008_v5 = vunpack.i.h.bf16 %v8841_v22  ;;  %v5007_v17 = vunpack.i.l.bf16 %v8841_v22 }
 0x6a2   :  { %v8869_v12 = vpop.permute.xlu0 %5020  ;;  %v8871_v46 = vpop.permute.xlu1 %5080 }
 0x6a3   :  { %v5023_v7 = vunpack.i.h.bf16 %v8869_v12  ;;  %v5022_v18 = vunpack.i.l.bf16 %v8869_v12  ;;  %v5082_v33 = vunpack.i.l.bf16 %v8871_v46 }
 0x6a4   :  { %4330 = vperm.xlu0 %4982, %v4289_v51   ;;  %4335 = vperm.xlu1 %4983, %v4290_v47  }
 0x6a6   :  { %v8879_v31 = vpop.permute.xlu0 %5025  ;;  %v5091_v58 = vpop.permute.xlu1 %5090 }
 0x6a7   :  { %v5093_v34 = vunpack.i.h.bf16 %v5091_v58  ;;  %v5092_v48 = vunpack.i.l.bf16 %v5091_v58  ;;  %v5028_v62 = vunpack.i.h.bf16 %v8879_v31  ;;  %v5027_v29 = vunpack.i.l.bf16 %v8879_v31 }
 0x6a8   :  { %4340 = vperm.xlu0 %4982, %v4291_v43   ;;  %4345 = vperm.xlu1 %4983, %v4292_v26  }
 0x6a9   :  { %v3629_v11 = vsel %vm9894_vm9, %v5093_v34, %v4998_v14  ;;  %v3628_v4 = vsel %vm9895_vm10, %v5092_v48, %v4997_v3  ;;  %vm9909_vm9 = vmmov %vm9902_vm0 }
 0x6aa   :  { %v3756_v27 = vpack.c.bf16 %v3629_v11, %v3628_v4  ;;  %v8886_v44 = vpop.permute.xlu0 %5030  ;;  %v5096_v57 = vpop.permute.xlu1 %5095  ;;  %v5018_v4 = vunpack.i.h.bf16 %v8859_v36  ;;  %vm9910_vm10 = vmmov %vm9902_vm0 }
 0x6ab   :  { %v5098_v40 = vunpack.i.h.bf16 %v5096_v57  ;;  %v5097_v25 = vunpack.i.l.bf16 %v5096_v57 }
 0x6ac   :  { %4501 = vperm.xlu0 %4982, %v4497_v19   ;;  %4153 = vmatpush1.bf16.msra.mxu1 %v3756_v27  ;;  %v5017_v19 = vunpack.i.l.bf16 %v8859_v36 }
 0x6ad   :  { %4506 = vperm.xlu1 %4983, %v4498_v35   ;;  %4154 = vmatprep.subr.bf16.mxu1 %v9893_v1  ;;  %v3530_v37 = vsel %vm9900_vm7, %v5097_v25, %v5002_v52  ;;  %v3531_v34 = vsel %vm9901_vm15, %v5098_v40, %v5003_v2  ;;  %vm9915_vm7 = vmmov %vm9902_vm0 }
 0x6ae   :  { %v8892_v24 = vpop.permute.xlu0 %5035  ;;  %v5101_v56 = vpop.permute.xlu1 %5100  ;;  %vm9916_vm15 = vmmov %vm9902_vm0 }
 0x6af   :  { %v5103_v51 = vunpack.i.h.bf16 %v5101_v56  ;;  %v5102_v63 = vunpack.i.l.bf16 %v5101_v56 }
 0x6b2   :  { %v8894_v9 = vpop.permute.xlu0 %5040  ;;  %v5106_v30 = vpop.permute.xlu1 %5105 }
 0x6b3   :  { %v5108_v55 = vunpack.i.h.bf16 %v5106_v30  ;;  %v5107_v41 = vunpack.i.l.bf16 %v5106_v30  ;;  %v3740_v30 = vpack.c.bf16 %v3403_v49, %v3402_v23  ;;  %v5032_v49 = vunpack.i.l.bf16 %v8886_v44 }
 0x6b5   :  { %v3643_v8 = vsel %vm9896_vm5, %v5108_v55, %v5013_v0  ;;  %v3642_v50 = vsel %vm9897_vm6, %v5107_v41, %v5012_v16  ;;  %v3419_v0 = vsel %vm9906_vm3, %v5103_v51, %v5008_v5  ;;  %v3418_v16 = vsel %vm9907_vm4, %v5102_v63, %v5007_v17  ;;  %vm9911_vm5 = vmmov %vm9902_vm0 }
 0x6b6   :  { %v3757_v61 = vpack.c.bf16 %v3643_v8, %v3642_v50  ;;  %v8898_v38 = vpop.permute.xlu0 %5045  ;;  %v5111_v59 = vpop.permute.xlu1 %5110  ;;  %v3749_v55 = vpack.c.bf16 %v3531_v34, %v3530_v37  ;;  %v3741_v23 = vpack.c.bf16 %v3419_v0, %v3418_v16  ;;  %vm9912_vm6 = vmmov %vm9902_vm0  ;;  %v5037_v51 = vunpack.i.l.bf16 %v8892_v24 }
 0x6b7   :  { %v5113_v14 = vunpack.i.h.bf16 %v5111_v59  ;;  %v5112_v3 = vunpack.i.l.bf16 %v5111_v59  ;;  %v5063_v34 = vunpack.i.h.bf16 %v8833_v54  ;;  %v5062_v0 = vunpack.i.l.bf16 %v8833_v54  ;;  %vm9920_vm3 = vmmov %vm9902_vm0 }
 0x6b8   :  { %4155 = vmatpush1.bf16.msra.mxu1 %v3757_v61  ;;  %vm9921_vm4 = vmmov %vm9902_vm0 }
 0x6b9   :  { %4156 = vmatprep.subr.bf16.mxu1 %v9893_v1  ;;  %v3544_v50 = vsel %vm9908_vm8, %v5112_v3, %v5017_v19  ;;  %v3545_v61 = vsel %vm9909_vm9, %v5113_v14, %v5018_v4  ;;  %vm9922_vm8 = vmmov %vm9902_vm0 }
 0x6ba   :  { %v8903_v20 = vpop.permute.xlu0 %5050  ;;  %v5116_v53 = vpop.permute.xlu1 %5115  ;;  %v3750_v40 = vpack.c.bf16 %v3545_v61, %v3544_v50  ;;  %vm9923_vm9 = vmmov %vm9902_vm0 }
 0x6bb   :  { %v5118_v41 = vunpack.i.h.bf16 %v5116_v53  ;;  %v5117_v8 = vunpack.i.l.bf16 %v5116_v53  ;;  %v5033_v53 = vunpack.i.h.bf16 %v8886_v44  ;;  %v5043_v44 = vunpack.i.h.bf16 %v8894_v9 }
 0x6bc   :  { %v5053_v61 = vunpack.i.h.bf16 %v8903_v20 }
 0x6bd   :  { %v3433_v25 = vsel %vm9910_vm10, %v5118_v41, %v5023_v7  ;;  %v3432_v2 = vsel %vm9911_vm5, %v5117_v8, %v5022_v18  ;;  %vm9924_vm10 = vmmov %vm9902_vm0 }
 0x6be   :  { %v5086_v47 = vpop.permute.xlu0 %5085  ;;  %v5121_v45 = vpop.permute.xlu1 %5120  ;;  %vm9925_vm5 = vmmov %vm9902_vm0 }
 0x6bf   :  { %v5088_v43 = vunpack.i.h.bf16 %v5086_v47  ;;  %v5087_v6 = vunpack.i.l.bf16 %v5086_v47  ;;  %v5123_v26 = vunpack.i.h.bf16 %v5121_v45  ;;  %v5122_v58 = vunpack.i.l.bf16 %v5121_v45 }
 0x6c0   :  { %v5042_v45 = vunpack.i.l.bf16 %v8894_v9  ;;  %v5047_v9 = vunpack.i.l.bf16 %v8898_v38 }
 0x6c1   :  { %v3657_v22 = vsel %vm9902_vm0, %v5123_v26, %v5028_v62  ;;  %v3656_v48 = vsel %vm9903_vm14, %v5122_v58, %v5027_v29  ;;  %v3516_v31 = vsel %vm9904_vm2, %v5087_v6, %v4987_v13  ;;  %v3517_v11 = vsel %vm9905_vm12, %v5088_v43, %v4988_v32  ;;  %vm9917_vm14 = vmmov %vm9902_vm0 }
 0x6c2   :  { %v3758_v27 = vpack.c.bf16 %v3657_v22, %v3656_v48  ;;  %v8927_v57 = vpop.permute.xlu0 %5155  ;;  %v5126_v35 = vpop.permute.xlu1 %5125  ;;  %v3748_v56 = vpack.c.bf16 %v3517_v11, %v3516_v31  ;;  %v5058_v62 = vunpack.i.h.bf16 %v8823_v28  ;;  %v5038_v29 = vunpack.i.h.bf16 %v8892_v24  ;;  %vm9918_vm2 = vmmov %vm9902_vm0 }
 0x6c3   :  { %v5128_v36 = vunpack.i.h.bf16 %v5126_v35  ;;  %v5127_v59 = vunpack.i.l.bf16 %v5126_v35  ;;  %v3742_v43 = vpack.c.bf16 %v3433_v25, %v3432_v2  ;;  %v5057_v58 = vunpack.i.l.bf16 %v8823_v28  ;;  %vm9919_vm12 = vmmov %vm9902_vm0 }
 0x6c4   :  { %4650 = vmatprep.subr.bf16.mxu0 %v3748_v56  ;;  %4157 = vmatpush1.bf16.msra.mxu1 %v3758_v27  ;;  %v5048_v24 = vunpack.i.h.bf16 %v8898_v38  ;;  %v5158_v31 = vunpack.i.h.bf16 %v8927_v57  ;;  %v5157_v28 = vunpack.i.l.bf16 %v8927_v57  ;;  %v5068_v38 = vunpack.i.h.bf16 %v8843_v21 }
 0x6c5   :  { %4651 = vmatpush3.bf16.msra.mxu0 %v3740_v30  ;;  %4158 = vmatprep.subr.bf16.mxu1 %v9893_v1  ;;  %v3558_v17 = vsel %vm9912_vm6, %v5127_v59, %v5032_v49  ;;  %v3559_v12 = vsel %vm9913_vm13, %v5128_v36, %v5033_v53  ;;  %v5067_v57 = vunpack.i.l.bf16 %v8843_v21  ;;  %v5052_v36 = vunpack.i.l.bf16 %v8903_v20  ;;  %vm9926_vm6 = vmmov %vm9902_vm0 }
 0x6c6   :  { %v8936_v32 = vpop.permute.xlu0 %5160  ;;  %v5131_v13 = vpop.permute.xlu1 %5130  ;;  %4652 = vmatprep.subr.bf16.mxu0 %v3749_v55  ;;  %v3751_v37 = vpack.c.bf16 %v3559_v12, %v3558_v17  ;;  %v3586_v18 = vsel %vm9919_vm12, %v5157_v28, %v5057_v58  ;;  %v3587_v53 = vsel %vm9921_vm4, %v5158_v31, %v5058_v62  ;;  %v5073_v17 = vunpack.i.h.bf16 %v8851_v39  ;;  %vm9927_vm13 = vmmov %vm9902_vm0 }
 0x6c7   :  { %v5133_v52 = vunpack.i.h.bf16 %v5131_v13  ;;  %v5132_v5 = vunpack.i.l.bf16 %v5131_v13  ;;  %v5162_v27 = vunpack.i.l.bf16 %v8936_v32  ;;  %v5163_v16 = vunpack.i.h.bf16 %v8936_v32  ;;  %vm9933_vm12 = vmmov %vm9902_vm0 }
 0x6c8   :  { %v5072_v12 = vunpack.i.l.bf16 %v8851_v39  ;;  %vm9935_vm4 = vmmov %vm9902_vm0 }
 0x6c9   :  { %4653 = vmatpush3.bf16.msra.mxu0 %v3741_v23  ;;  %v3447_v14 = vsel %vm9914_vm11, %v5133_v52, %v5038_v29  ;;  %v3446_v3 = vsel %vm9915_vm7, %v5132_v5, %v5037_v51  ;;  %v3474_v32 = vsel %vm9920_vm3, %v5162_v27, %v5062_v0  ;;  %v3475_v49 = vsel %vm9922_vm8, %v5163_v16, %v5063_v34  ;;  %vm9928_vm11 = vmmov %vm9902_vm0 }
 0x6ca   :  { %v5171_v63 = vpop.permute.xlu0 %5170  ;;  %v5136_v47 = vpop.permute.xlu1 %5135  ;;  %4654 = vmatprep.subr.bf16.mxu0 %v3750_v40  ;;  %v3743_v35 = vpack.c.bf16 %v3447_v14, %v3446_v3  ;;  %vm9929_vm7 = vmmov %vm9902_vm0 }
 0x6cb   :  { %v5138_v6 = vunpack.i.h.bf16 %v5136_v47  ;;  %v5137_v26 = vunpack.i.l.bf16 %v5136_v47  ;;  %v5173_v55 = vunpack.i.h.bf16 %v5171_v63  ;;  %v5172_v41 = vunpack.i.l.bf16 %v5171_v63  ;;  %vm9934_vm3 = vmmov %vm9902_vm0 }
 0x6cc   :  { %v5077_v63 = vunpack.i.l.bf16 %v8861_v10  ;;  %vm9936_vm8 = vmmov %vm9902_vm0 }
 0x6cd   :  { %v3671_v22 = vsel %vm9916_vm15, %v5138_v6, %v5043_v44  ;;  %v3670_v48 = vsel %vm9902_vm0, %v5137_v26, %v5042_v45  ;;  %4655 = vmatpush3.bf16.msra.mxu0 %v3742_v43  ;;  %v3600_v40 = vsel %vm9923_vm9, %v5172_v41, %v5067_v57  ;;  %v3601_v20 = vsel %vm9924_vm10, %v5173_v55, %v5068_v38  ;;  %vm9930_vm15 = vmmov %vm9902_vm0 }
 0x6ce   :  { %v3759_v11 = vpack.c.bf16 %v3671_v22, %v3670_v48  ;;  %v5176_v4 = vpop.permute.xlu0 %5175  ;;  %v5141_v19 = vpop.permute.xlu1 %5140  ;;  %4656 = vmatprep.subr.bf16.mxu0 %v3751_v37  ;;  %v3753_v43 = vpack.c.bf16 %v3587_v53, %v3586_v18  ;;  %v5078_v6 = vunpack.i.h.bf16 %v8861_v10  ;;  %v3745_v26 = vpack.c.bf16 %v3475_v49, %v3474_v32  ;;  %vm9937_vm9 = vmmov %vm9902_vm0  ;;  %v5232_v53 = vld [vmem:[%s9146_s5 + $0x24] ss:$16 sps:$4 sm:$0xff]  }
 0x6cf   :  { %v5143_v56 = vunpack.i.h.bf16 %v5141_v19  ;;  %v5142_v30 = vunpack.i.l.bf16 %v5141_v19  ;;  %v5177_v23 = vunpack.i.l.bf16 %v5176_v4  ;;  %v5178_v25 = vunpack.i.h.bf16 %v5176_v4  ;;  %vm9938_vm10 = vmmov %vm9902_vm0 }
 0x6d0   :  { %4159 = vmatpush1.bf16.msra.mxu1 %v3759_v11  ;;  %v3754_v14 = vpack.c.bf16 %v3601_v20, %v3600_v40 }
 0x6d1   :  { %4657 = vmatpush3.bf16.msra.mxu0 %v3743_v35  ;;  %v3572_v8 = vsel %vm9917_vm14, %v5142_v30, %v5047_v9  ;;  %v3573_v50 = vsel %vm9918_vm2, %v5143_v56, %v5048_v24  ;;  %4160 = vmatprep.subr.bf16.mxu1 %v9893_v1  ;;  %v3488_v58 = vsel %vm9927_vm13, %v5177_v23, %v5072_v12  ;;  %vm9931_vm14 = vmmov %vm9902_vm0 }
 0x6d2   :  { %v5186_v59 = vpop.permute.xlu0 %5185  ;;  %v5146_v54 = vpop.permute.xlu1 %5145  ;;  %v3752_v7 = vpack.c.bf16 %v3573_v50, %v3572_v8  ;;  %v3489_v3 = vsel %vm9928_vm11, %v5178_v25, %v5073_v17  ;;  %vm9932_vm2 = vmmov %vm9902_vm0  ;;  %vm4376_vm11 = vcmask 982016  }
 0x6d3   :  { %v5148_v13 = vunpack.i.h.bf16 %v5146_v54  ;;  %v5147_v21 = vunpack.i.l.bf16 %v5146_v54  ;;  %v5187_v2 = vunpack.i.l.bf16 %v5186_v59  ;;  %v5188_v29 = vunpack.i.h.bf16 %v5186_v59  ;;  %vm9941_vm13 = vmmov %vm9902_vm0 }
 0x6d4   :  { %4658 = vmatprep.subr.bf16.mxu0 %v3752_v7 }
 0x6d5   :  { %v3461_v52 = vsel %vm9925_vm5, %v5148_v13, %v5053_v61  ;;  %v3460_v5 = vsel %vm9926_vm6, %v5147_v21, %v5052_v36  ;;  %v3614_v34 = vsel %vm9902_vm0, %v5187_v2, %v5077_v63  ;;  %v3615_v31 = vsel %vm9931_vm14, %v5188_v29, %v5078_v6  ;;  %v5229_v21 = vld [vmem:[%s9146_s5] ss:$16 sps:$4 sm:$0xff]   ;;  %vm9939_vm5 = vmmov %vm9902_vm0  ;;  %v5238_v63 = vld [vmem:[%s9146_s5 + $0x44] ss:$16 sps:$4 sm:$0xff]  }
 0x6d6   :  { %v3744_v62 = vpack.c.bf16 %v3461_v52, %v3460_v5  ;;  %v5191_v51 = vpop.permute.xlu0 %5190  ;;  %v5151_v44 = vpop.permute.xlu1 %5150  ;;  %v3755_v55 = vpack.c.bf16 %v3615_v31, %v3614_v34  ;;  %vm9940_vm6 = vmmov %vm9902_vm0  ;;  %v5246_v6 = vld [vmem:[%s9146_s5 + $0x4c] ss:$16 sps:$4 sm:$0xff]   ;;  %v5256_v34 = vld [vmem:[%s9146_s5 + $0xa4] ss:$16 sps:$4 sm:$0xff]   ;;  %vm9944_vm0 = vcmask 1041408   ;;  %vm4514_vm14 = vcmask 687104  }
 0x6d7   :  { %v5153_v47 = vunpack.i.h.bf16 %v5151_v44  ;;  %v5152_v45 = vunpack.i.l.bf16 %v5151_v44  ;;  %v5193_v24 = vunpack.i.h.bf16 %v5191_v51  ;;  %v5192_v10 = vunpack.i.l.bf16 %v5191_v51  ;;  %v5236_v51 = vld [vmem:[%s9146_s5 + $0x20] ss:$16 sps:$4 sm:$0xff]   ;;  %v5237_v44 = vld [vmem:[%s9146_s5 + $0x8] ss:$16 sps:$4 sm:$0xff]  }
 0x6d8   :  { %4659 = vmatpush3.bf16.msra.mxu0 %v3744_v62  ;;  %v3793_v31 = vld [vmem:[%s9146_s5 + $0xe0] sm:$0xff] }
 0x6d9   :  { %v3681_v39 = vsel %vm9929_vm7, %v3390_v60, %v5153_v47  ;;  %v3680_v37 = vsel %vm9930_vm15, %v3386_v15, %v5152_v45  ;;  %4660 = vmatprep.subr.bf16.mxu0 %v3753_v43  ;;  %v5083_v60 = vunpack.i.h.bf16 %v8871_v46  ;;  %v3746_v15 = vpack.c.bf16 %v3489_v3, %v3488_v58  ;;  %v5240_v47 = vld [vmem:[%s9146_s5 + $0x2c] ss:$16 sps:$4 sm:$0xff]   ;;  %v5243_v45 = vld [vmem:[%s9146_s5 + $0x28] ss:$16 sps:$4 sm:$0xff]   ;;  %v5244_v43 = vld [vmem:[%s9146_s5 + $0x64] ss:$16 sps:$4 sm:$0xff]  }
 0x6da   :  { %v3760_v22 = vpack.c.bf16 %v3681_v39, %v3680_v37  ;;  %v5201_v48 = vpop.permute.xlu0 %5200  ;;  %v5166_v9 = vpop.permute.xlu1 %5165  ;;  %v3502_v35 = vsel %vm9934_vm3, %v5192_v10, %v5082_v33  ;;  %v5249_v58 = vld [vmem:[%s9146_s5 + $0x48] ss:$16 sps:$4 sm:$0xff]   ;;  %v5252_v3 = vld [vmem:[%s9146_s5 + $0x6c] ss:$16 sps:$4 sm:$0xff]   ;;  %v5254_v39 = vld [vmem:[%s9146_s5 + $0x80] ss:$16 sps:$4 sm:$0xff]   ;;  %v4624_v33 = vcombine.low %v3793_v31, %v3793_v31 }
 0x6db   :  { %v5203_v28 = vunpack.i.h.bf16 %v5201_v48  ;;  %v5202_v11 = vunpack.i.l.bf16 %v5201_v48  ;;  %v5168_v4 = vunpack.i.h.bf16 %v5166_v9  ;;  %v5167_v42 = vunpack.i.l.bf16 %v5166_v9  ;;  %v5255_v37 = vld [vmem:[%s9146_s5 + $0x68] ss:$16 sps:$4 sm:$0xff]   ;;  %v5260_v10 = vld [vmem:[%s9146_s5 + $0xa0] ss:$16 sps:$4 sm:$0xff]   ;;  %v5262_v48 = vld [vmem:[%s9146_s5 + $0xc4] ss:$16 sps:$4 sm:$0xff]  }
 0x6dc   :  { %4661 = vmatpush3.bf16.msra.mxu0 %v3745_v26  ;;  %4161 = vmatpush1.bf16.msra.mxu1 %v3760_v22  ;;  %v3503_v56 = vsel %vm9935_vm4, %v5193_v24, %v5083_v60  ;;  %v5248_v26 = vld [vmem:[%s9146_s5 + $0x60] ss:$16 sps:$4 sm:$0xff]   ;;  %v5258_v24 = vld [vmem:[%s9146_s5 + $0x8c] ss:$16 sps:$4 sm:$0xff]   ;;  %v5261_v22 = vld [vmem:[%s9146_s5 + $0x88] ss:$16 sps:$4 sm:$0xff]  }
 0x6dd   :  { %v3697_v19 = vsel %vm9932_vm2, %v5203_v28, %v5168_v4  ;;  %v3696_v27 = vsel %vm9933_vm12, %v5202_v11, %v5167_v42  ;;  %4662 = vmatprep.subr.bf16.mxu0 %v3754_v14  ;;  %4162 = vmatprep.subr.bf16.mxu1 %v9893_v1  ;;  %v3747_v61 = vpack.c.bf16 %v3503_v56, %v3502_v35  ;;  %v5250_v14 = vld [vmem:[%s9146_s5 + $0x84] ss:$16 sps:$4 sm:$0xff]   ;;  %v5264_v9 = vld [vmem:[%s9146_s5 + $0xac] ss:$16 sps:$4 sm:$0xff]   ;;  %v5266_v28 = vld [vmem:[%s9146_s5 + $0xc0] ss:$16 sps:$4 sm:$0xff]  }
 0x6de   :  { %v3761_v30 = vpack.c.bf16 %v3697_v19, %v3696_v27  ;;  %v5206_v0 = vpop.permute.xlu0 %5205  ;;  %v5181_v16 = vpop.permute.xlu1 %5180  ;;  %v5267_v11 = vld [vmem:[%s9146_s5 + $0xa8] ss:$16 sps:$4 sm:$0xff]   ;;  %v4625_v4 = vcombine.high %v3793_v31, %v3793_v31  ;;  %v5269_v42 = vld [vmem:[%s9146_s5 + $0xcc] ss:$16 sps:$4 sm:$0xff]   ;;  %v5275_v35 = vld [vmem:[%s9150_s7] sm:$0xff]   ;;  %vm5333_vm15 = vmmov 0  }
 0x6df   :  { %v5208_v41 = vunpack.i.h.bf16 %v5206_v0  ;;  %v5207_v46 = vunpack.i.l.bf16 %v5206_v0  ;;  %v5183_v38 = vunpack.i.h.bf16 %v5181_v16  ;;  %v5182_v57 = vunpack.i.l.bf16 %v5181_v16  ;;  %v3794_v60 = vld [vmem:[%s9146_s5 + $0xe8] sm:$0xff] }
 0x6e0   :  { %4663 = vmatpush3.bf16.msra.mxu0 %v3746_v15  ;;  %4163 = vmatpush1.bf16.msra.mxu1 %v3761_v30  ;;  %v5272_v15 = vld [vmem:[%s9146_s5 + $0xc8] ss:$16 sps:$4 sm:$0xff]   ;;  %v4627_v19 = vcombine.high %v3794_v60, %v3794_v60  ;;  %v4626_v27 = vcombine.low %v3794_v60, %v3794_v60  ;;  %vm4562_vm2 = vcmask 15360   ;;  %vm4564_vm12 = vcmask 9216  }
 0x6e1   :  { %v3711_v8 = vsel %vm9936_vm8, %v5208_v41, %v5183_v38  ;;  %v3710_v50 = vsel %vm9937_vm9, %v5207_v46, %v5182_v57  ;;  %4664 = vmatprep.subr.bf16.mxu0 %v3755_v55  ;;  %4164 = vmatprep.subr.bf16.mxu1 %v9893_v1 }
 0x6e2   :  { %v3762_v36 = vpack.c.bf16 %v3711_v8, %v3710_v50  ;;  %v5211_v59 = vpop.permute.xlu0 %5210  ;;  %v5196_v54 = vpop.permute.xlu1 %5195 }
 0x6e3   :  { %v5213_v7 = vunpack.i.h.bf16 %v5211_v59  ;;  %v5212_v18 = vunpack.i.l.bf16 %v5211_v59  ;;  %v5198_v32 = vunpack.i.h.bf16 %v5196_v54  ;;  %v5197_v13 = vunpack.i.l.bf16 %v5196_v54 }
 0x6e4   :  { %4665 = vmatpush3.bf16.msra.mxu0 %v3747_v61  ;;  %4165 = vmatpush1.bf16.msra.mxu1 %v3762_v36 }
 0x6e5   :  { %v3725_v49 = vsel %vm9938_vm10, %v5213_v7, %v5198_v32  ;;  %v3724_v23 = vsel %vm9939_vm5, %v5212_v18, %v5197_v13  ;;  %4166 = vmatprep.subr.bf16.mxu1 %v9893_v1 }
 0x6e6   :  { %v3763_v40 = vpack.c.bf16 %v3725_v49, %v3724_v23  ;;  %v5216_v20 = vpop.permute.xlu0 %5215  ;;  %v5221_v25 = vpop.permute.xlu1 %5220 }
 0x6e7   :  { %v5218_v2 = vunpack.i.h.bf16 %v5216_v20  ;;  %v5217_v52 = vunpack.i.l.bf16 %v5216_v20  ;;  %v5223_v5 = vunpack.i.h.bf16 %v5221_v25  ;;  %v5222_v17 = vunpack.i.l.bf16 %v5221_v25  ;;  %4089 = vmatmul.mubr.bf16.vlgmr.msra.gmra.mrb[28].mxu0 %v5229_v21 }
 0x6e8   :  { %4167 = vmatpush1.bf16.msra.mxu1 %v3763_v40  ;;  %4096 = vmatprep.mubr.bf16.mxu0 %v5232_v53 }
 0x6e9   :  { %v3739_v12 = vsel %vm9940_vm6, %v5218_v2, %v5223_v5  ;;  %v3738_v29 = vsel %vm9941_vm13, %v5217_v52, %v5222_v17  ;;  %4168 = vmatprep.subr.bf16.mxu1 %v9893_v1  ;;  %v5242_v1 = vld [vmem:[%s9146_s5 + $0x40] ss:$16 sps:$4 sm:$0xff]  }
 0x6ea   :  { %v3764_v62 = vpack.c.bf16 %v3739_v12, %v3738_v29 }
 0x6ec   :  { %4169 = vmatpush1.bf16.msra.mxu1 %v3764_v62 }
 0x6ef   :  { %4097 = vmatmul.mubr.bf16.gmra.mrb[32].mxu0 %v5236_v51  ;;  %4185 = vmatmul.mubr.bf16.vlgmr.msra.gmra.mrb[36].mxu1 %v5237_v44 }
 0x6f0   :  { %4104 = vmatprep.mubr.bf16.mxu0 %v5238_v63  ;;  %4629 = vmatprep.mubr.msk.bf16.mxu1 %vm4031_vm1, %v5240_v47 }
 0x6f7   :  { %4105 = vmatmul.mubr.bf16.gmra.mrb[36].mxu0 %v5242_v1  ;;  %4193 = vmatmul.mubr.bf16.gmra.mrb[40].mxu1 %v5243_v45  ;;  %v3813_v46 = vpop.permute.xlu0 %3812  ;;  %v3818_v38 = vpop.permute.xlu1 %3817 }
 0x6f8   :  { %4112 = vmatprep.mubr.bf16.mxu0 %v5244_v43  ;;  %4630 = vmatprep.mubr.msk.bf16.mxu1 %vm4031_vm1, %v5246_v6 }
 0x6fb   :  { %v3823_v20 = vpop.permute.xlu0 %3822  ;;  %v3828_v25 = vpop.permute.xlu1 %3827 }
 0x6ff   :  { %4113 = vmatmul.mubr.bf16.gmra.mrb[40].mxu0 %v5248_v26  ;;  %4201 = vmatmul.mubr.bf16.gmra.mrb[44].mxu1 %v5249_v58 }
 0x700   :  { %4120 = vmatprep.mubr.bf16.mxu0 %v5250_v14  ;;  %4631 = vmatprep.mubr.msk.bf16.mxu1 %vm4031_vm1, %v5252_v3  ;;  %v3833_v14 = vpop.permute.xlu0 %3832  ;;  %v3838_v3 = vpop.permute.xlu1 %3837 }
 0x707   :  { %4121 = vmatmul.mubr.bf16.gmra.mrb[44].mxu0 %v5254_v39  ;;  %4209 = vmatmul.mubr.bf16.gmra.mrb[48].mxu1 %v5255_v37 }
 0x708   :  { %4128 = vmatprep.mubr.bf16.mxu0 %v5256_v34  ;;  %4632 = vmatprep.mubr.msk.bf16.mxu1 %vm4031_vm1, %v5258_v24 }
 0x70f   :  { %4129 = vmatmul.mubr.bf16.gmra.mrb[48].mxu0 %v5260_v10  ;;  %4217 = vmatmul.mubr.bf16.gmra.mrb[52].mxu1 %v5261_v22 }
 0x710   :  { %4136 = vmatprep.mubr.bf16.mxu0 %v5262_v48  ;;  %4633 = vmatprep.mubr.msk.bf16.mxu1 %vm4031_vm1, %v5264_v9 }
 0x717   :  { %4137 = vmatmul.mubr.bf16.gmra.mrb[52].mxu0 %v5266_v28  ;;  %4225 = vmatmul.mubr.bf16.gmra.mrb[56].mxu1 %v5267_v11 }
 0x718   :  { %4144 = vmatprep.mubr.bf16.mxu0 %v4625_v4  ;;  %4634 = vmatprep.mubr.msk.bf16.mxu1 %vm4031_vm1, %v5269_v42 }
 0x71f   :  { %4145 = vmatmul.mubr.bf16.gmra.mrb[56].mxu0 %v4624_v33  ;;  %4233 = vmatmul.mubr.bf16.gmra.mrb[60].mxu1 %v5272_v15 }
 0x720   :  { %4635 = vmatprep.mubr.msk.bf16.mxu1 %vm4031_vm1, %v4627_v19  ;;  %4751 = vmatprep.mubr.msk.bf16.mxu0 %vm4376_vm11, %v5275_v35  ;;  %v3848_v35 = vpop.permute.xlu1 %3847  ;;  %vm9942_vm1 = vcmask 1043456  }
 0x721   :  { %vm9943_vm7 = vmmov %vm9942_vm1 }
 0x727   :  { %4241 = vmatmul.mubr.bf16.gmra.mrb[64].mxu1 %v4626_v27  ;;  %v3843_v27 = vpop.permute.xlu0 %3842 }
 0x7ba   :  { %v4666_v56 = vpop.f32.mrb[28].mxu0 }
 0x7bb   :  { %v4667_v30 = vpop.f32.mrb[29].mxu0 }
 0x7bc   :  { %v4668_v0 = vadd.f32 %v4667_v30, %v4666_v56  ;;  %v4669_v16 = vpop.f32.mrb[30].mxu0 }
 0x7bd   :  { %v4670_v55 = vpop.f32.mrb[31].mxu0 }
 0x7be   :  { %v4671_v41 = vadd.f32 %v4670_v55, %v4669_v16  ;;  %v4091_v57 = vadd.f32 %v4668_v0, %v3813_v46 }
 0x7c0   :  { %v4094_v54 = vadd.f32 %v4671_v41, %v3818_v38 }
 0x7c2   :  { %v4672_v8 = vpop.f32.mrb[32].mxu0  ;;  %v4186_v50 = vpop.f32.mrb[36].mxu1 }
 0x7c3   :  { %v4187_v61 = vadd.f32 %v4186_v50, %v4091_v57  ;;  %v4673_v36 = vpop.f32.mrb[33].mxu0  ;;  %v4188_v59 = vpop.f32.mrb[37].mxu1 }
 0x7c4   :  { %v4674_v7 = vadd.f32 %v4673_v36, %v4672_v8  ;;  %v4675_v18 = vpop.f32.mrb[34].mxu0  ;;  %v4189_v32 = vpop.f32.mrb[38].mxu1 }
 0x7c5   :  { %v4190_v13 = vadd.f32 %v4189_v32, %v4094_v54  ;;  %v4676_v21 = vpop.f32.mrb[35].mxu0  ;;  %v4191_v53 = vpop.f32.mrb[39].mxu1  ;;  %v4248_v23 = vmax.f32 %v4187_v61, 0.0 }
 0x7c6   :  { %v4677_v49 = vadd.f32 %v4676_v21, %v4675_v18  ;;  %v4099_v52 = vadd.f32 %v4674_v7, %v3823_v20  ;;  %v3853_v32 = vpop.permute.xlu0 %3852 }
 0x7c7   :  { %v4249_v40 = vmax.f32 %v4190_v13, 0.0  ;;  %v3858_v13 = vpop.permute.xlu1 %3857 }
 0x7c8   :  { %v4102_v51 = vadd.f32 %v4677_v49, %v3828_v25 }
 0x7c9   :  { %v4263_v2 = vpack.c.bf16 %v4249_v40, %v4248_v23 }
 0x7ca   :  { %v4678_v5 = vpop.f32.mrb[36].mxu0  ;;  %v4194_v17 = vpop.f32.mrb[40].mxu1 }
 0x7cb   :  { %v4195_v12 = vadd.f32 %v4194_v17, %v4099_v52  ;;  %v4679_v29 = vpop.f32.mrb[37].mxu0  ;;  %v4196_v62 = vpop.f32.mrb[41].mxu1  ;;  %4735 = vmatprep.subr.bf16.mxu0 %v4263_v2 }
 0x7cc   :  { %v4680_v44 = vadd.f32 %v4679_v29, %v4678_v5  ;;  %v4681_v63 = vpop.f32.mrb[38].mxu0  ;;  %v4197_v47 = vpop.f32.mrb[42].mxu1  ;;  %4736 = vmatpush3.bf16.msra.mxu0 %v4263_v2 }
 0x7cd   :  { %v4198_v1 = vadd.f32 %v4197_v47, %v4102_v51  ;;  %v4682_v45 = vpop.f32.mrb[39].mxu0  ;;  %v4199_v43 = vpop.f32.mrb[43].mxu1  ;;  %v4250_v26 = vmax.f32 %v4195_v12, 0.0 }
 0x7ce   :  { %v4683_v6 = vadd.f32 %v4682_v45, %v4681_v63  ;;  %v4107_v37 = vadd.f32 %v4680_v44, %v3833_v14  ;;  %v3863_v47 = vpop.permute.xlu0 %3862 }
 0x7cf   :  { %v4251_v58 = vmax.f32 %v4198_v1, 0.0  ;;  %v3868_v1 = vpop.permute.xlu1 %3867 }
 0x7d0   :  { %v4110_v9 = vadd.f32 %v4683_v6, %v3838_v3 }
 0x7d1   :  { %v4264_v39 = vpack.c.bf16 %v4251_v58, %v4250_v26 }
 0x7d2   :  { %v4684_v34 = vpop.f32.mrb[40].mxu0  ;;  %v4202_v24 = vpop.f32.mrb[44].mxu1 }
 0x7d3   :  { %v4203_v10 = vadd.f32 %v4202_v24, %v4107_v37  ;;  %v4685_v22 = vpop.f32.mrb[41].mxu0  ;;  %v4204_v48 = vpop.f32.mrb[45].mxu1  ;;  %4737 = vmatprep.subr.bf16.mxu0 %v4264_v39 }
 0x7d4   :  { %v4686_v31 = vadd.f32 %v4685_v22, %v4684_v34  ;;  %v4687_v28 = vpop.f32.mrb[42].mxu0  ;;  %v4205_v11 = vpop.f32.mrb[46].mxu1  ;;  %4738 = vmatpush3.bf16.msra.mxu0 %v4264_v39 }
 0x7d5   :  { %v4206_v4 = vadd.f32 %v4205_v11, %v4110_v9  ;;  %v4688_v42 = vpop.f32.mrb[43].mxu0  ;;  %v4207_v60 = vpop.f32.mrb[47].mxu1  ;;  %v4252_v15 = vmax.f32 %v4203_v10, 0.0 }
 0x7d6   :  { %v4689_v33 = vadd.f32 %v4688_v42, %v4687_v28  ;;  %v4115_v30 = vadd.f32 %v4686_v31, %v3843_v27  ;;  %v3873_v11 = vpop.permute.xlu0 %3872 }
 0x7d7   :  { %v4253_v19 = vmax.f32 %v4206_v4, 0.0  ;;  %v3878_v4 = vpop.permute.xlu1 %3877 }
 0x7d8   :  { %v4118_v38 = vadd.f32 %v4689_v33, %v3848_v35 }
 0x7d9   :  { %v4265_v56 = vpack.c.bf16 %v4253_v19, %v4252_v15 }
 0x7da   :  { %v4690_v0 = vpop.f32.mrb[44].mxu0  ;;  %v4210_v16 = vpop.f32.mrb[48].mxu1 }
 0x7db   :  { %v4211_v55 = vadd.f32 %v4210_v16, %v4115_v30  ;;  %v4691_v41 = vpop.f32.mrb[45].mxu0  ;;  %v4212_v46 = vpop.f32.mrb[49].mxu1  ;;  %4739 = vmatprep.subr.bf16.mxu0 %v4265_v56 }
 0x7dc   :  { %v4692_v57 = vadd.f32 %v4691_v41, %v4690_v0  ;;  %v4693_v8 = vpop.f32.mrb[46].mxu0  ;;  %v4213_v50 = vpop.f32.mrb[50].mxu1  ;;  %4740 = vmatpush3.bf16.msra.mxu0 %v4265_v56 }
 0x7dd   :  { %v4214_v61 = vadd.f32 %v4213_v50, %v4118_v38  ;;  %v4694_v36 = vpop.f32.mrb[47].mxu0  ;;  %v4215_v59 = vpop.f32.mrb[51].mxu1  ;;  %v4254_v7 = vmax.f32 %v4211_v55, 0.0 }
 0x7de   :  { %v4695_v54 = vadd.f32 %v4694_v36, %v4693_v8  ;;  %v4123_v53 = vadd.f32 %v4692_v57, %v3853_v32  ;;  %v3883_v8 = vpop.permute.xlu0 %3882 }
 0x7df   :  { %v4255_v18 = vmax.f32 %v4214_v61, 0.0 }
 0x7e0   :  { %v4126_v2 = vadd.f32 %v4695_v54, %v3858_v13 }
 0x7e1   :  { %v4266_v21 = vpack.c.bf16 %v4255_v18, %v4254_v7 }
 0x7e2   :  { %v4696_v49 = vpop.f32.mrb[48].mxu0  ;;  %v4218_v23 = vpop.f32.mrb[52].mxu1 }
 0x7e3   :  { %v4219_v40 = vadd.f32 %v4218_v23, %v4123_v53  ;;  %v4697_v20 = vpop.f32.mrb[49].mxu0  ;;  %v4220_v25 = vpop.f32.mrb[53].mxu1  ;;  %4741 = vmatprep.subr.bf16.mxu0 %v4266_v21  ;;  %v5276_v53 = vld [vmem:[%s9150_s7 + $0x8] sm:$0xff]   ;;  %v5278_v23 = vld [vmem:[%s9150_s7 + $0x18] sm:$0xff]  }
 0x7e4   :  { %v4698_v52 = vadd.f32 %v4697_v20, %v4696_v49  ;;  %v4699_v5 = vpop.f32.mrb[50].mxu0  ;;  %v4221_v17 = vpop.f32.mrb[54].mxu1  ;;  %4742 = vmatpush3.bf16.msra.mxu0 %v4266_v21  ;;  %v5277_v49 = vld [vmem:[%s9150_s7 + $0x10] sm:$0xff]   ;;  %v5280_v20 = vld [vmem:[%s9150_s7 + $0x28] ss:$0 sps:$4 sm:$0x33]  }
 0x7e5   :  { %v4222_v12 = vadd.f32 %v4221_v17, %v4126_v2  ;;  %v4700_v29 = vpop.f32.mrb[51].mxu0  ;;  %v4223_v62 = vpop.f32.mrb[55].mxu1  ;;  %v4256_v44 = vmax.f32 %v4219_v40, 0.0  ;;  %v5279_v40 = vld [vmem:[%s9150_s7 + $0x20] sm:$0xff]   ;;  %v5332_v25 = vmov 0.0  }
 0x7e6   :  { %v4701_v51 = vadd.f32 %v4700_v29, %v4699_v5  ;;  %v4131_v43 = vadd.f32 %v4698_v52, %v3863_v47  ;;  %4763 = vmatprep.subr.bf16.mxu1 %v5332_v25  ;;  %4775 = vmatprep.mubr.msk.bf16.mxu1 %vm5333_vm15, %v5332_v25  ;;  %v4296_v2 = vpop.permute.xlu1 %4295  ;;  %v4301_v52 = vpop.permute.xlu0 %4300 }
 0x7e7   :  { %v4257_v63 = vmax.f32 %v4222_v12, 0.0 }
 0x7e8   :  { %v4134_v39 = vadd.f32 %v4701_v51, %v3868_v1 }
 0x7e9   :  { %v4267_v45 = vpack.c.bf16 %v4257_v63, %v4256_v44 }
 0x7ea   :  { %v4702_v6 = vpop.f32.mrb[52].mxu0  ;;  %v4226_v26 = vpop.f32.mrb[56].mxu1 }
 0x7eb   :  { %v4227_v58 = vadd.f32 %v4226_v26, %v4131_v43  ;;  %v4703_v14 = vpop.f32.mrb[53].mxu0  ;;  %v4228_v3 = vpop.f32.mrb[57].mxu1  ;;  %4743 = vmatprep.subr.bf16.mxu0 %v4267_v45 }
 0x7ec   :  { %v4704_v37 = vadd.f32 %v4703_v14, %v4702_v6  ;;  %v4705_v34 = vpop.f32.mrb[54].mxu0  ;;  %v4229_v24 = vpop.f32.mrb[58].mxu1  ;;  %4744 = vmatpush3.bf16.msra.mxu0 %v4267_v45 }
 0x7ed   :  { %v4230_v10 = vadd.f32 %v4229_v24, %v4134_v39  ;;  %v4706_v22 = vpop.f32.mrb[55].mxu0  ;;  %v4231_v48 = vpop.f32.mrb[59].mxu1  ;;  %v4258_v31 = vmax.f32 %v4227_v58, 0.0 }
 0x7ee   :  { %v4707_v9 = vadd.f32 %v4706_v22, %v4705_v34  ;;  %v4139_v60 = vadd.f32 %v4704_v37, %v3873_v11  ;;  %v4306_v5 = vpop.permute.xlu1 %4305  ;;  %v4311_v17 = vpop.permute.xlu0 %4310 }
 0x7ef   :  { %v4259_v28 = vmax.f32 %v4230_v10, 0.0 }
 0x7f0   :  { %v4142_v56 = vadd.f32 %v4707_v9, %v3878_v4 }
 0x7f1   :  { %v4268_v42 = vpack.c.bf16 %v4259_v28, %v4258_v31 }
 0x7f2   :  { %v4708_v33 = vpop.f32.mrb[56].mxu0  ;;  %v4234_v15 = vpop.f32.mrb[60].mxu1 }
 0x7f3   :  { %v4235_v19 = vadd.f32 %v4234_v15, %v4139_v60  ;;  %v4709_v27 = vpop.f32.mrb[57].mxu0  ;;  %v4236_v35 = vpop.f32.mrb[61].mxu1  ;;  %4745 = vmatprep.subr.bf16.mxu0 %v4268_v42 }
 0x7f4   :  { %v4710_v30 = vadd.f32 %v4709_v27, %v4708_v33  ;;  %v4711_v0 = vpop.f32.mrb[58].mxu0  ;;  %v4237_v16 = vpop.f32.mrb[62].mxu1  ;;  %4746 = vmatpush3.bf16.msra.mxu0 %v4268_v42 }
 0x7f5   :  { %v4238_v55 = vadd.f32 %v4237_v16, %v4142_v56  ;;  %v4712_v41 = vpop.f32.mrb[59].mxu0  ;;  %v4239_v46 = vpop.f32.mrb[63].mxu1  ;;  %v4260_v38 = vmax.f32 %v4235_v19, 0.0 }
 0x7f6   :  { %v4147_v61 = vadd.f32 %v4710_v30, %v3883_v8  ;;  %v4316_v12 = vpop.permute.xlu1 %4315  ;;  %v4321_v47 = vpop.permute.xlu0 %4320 }
 0x7f7   :  { %v4261_v57 = vmax.f32 %v4238_v55, 0.0 }
 0x7f9   :  { %v4269_v50 = vpack.c.bf16 %v4261_v57, %v4260_v38 }
 0x7fa   :  { %v4242_v36 = vpop.f32.mrb[64].mxu1  ;;  %v4326_v43 = vpop.permute.xlu1 %4325 }
 0x7fb   :  { %v4243_v59 = vadd.f32 %v4242_v36, %v4147_v61  ;;  %v4244_v54 = vpop.f32.mrb[65].mxu1  ;;  %4747 = vmatprep.subr.bf16.mxu0 %v4269_v50  ;;  %v4331_v24 = vpop.permute.xlu0 %4330 }
 0x7fc   :  { %v4245_v7 = vpop.f32.mrb[66].mxu1  ;;  %4748 = vmatpush3.bf16.msra.mxu0 %v4269_v50  ;;  %v5281_v54 = vld [vmem:[%s9151_s9] sm:$0x1f]  }
 0x7fd   :  { %v4262_v18 = vmax.f32 %v4243_v59, 0.0  ;;  %v4246_v32 = vpop.f32.mrb[67].mxu1 }
 0x7fe   :  { %v4336_v48 = vpop.permute.xlu1 %4335 }
 0x7ff   :  { %v4270_v13 = vpack.c.bf16 %v4262_v18, %v4262_v18  ;;  %v4341_v41 = vpop.permute.xlu0 %4340 }
 0x801   :  { %4779 = vmatprep.subr.msk.bf16.mxu0 %vm9942_vm1, %v4270_v13  ;;  %v4396_v21 = vsel %vm9943_vm7, %v4270_v13, 0 }
 0x802   :  { %4750 = vmatpush3.bf16.msra.mxu0 %v4396_v21  ;;  %v4346_v27 = vpop.permute.xlu1 %4345 }
 0x803   :  { %v4502_v7 = vpop.permute.xlu0 %4501 }
 0x805   :  { %4752 = vmatmul.mubr.msk.bf16.vlgmr.msra.gmra.mrb[60].mxu0 %vm4376_vm11, %v5276_v53 }
 0x806   :  { %4755 = vmatprep.mubr.msk.bf16.mxu0 %vm4376_vm11, %v5277_v49  ;;  %v4507_v21 = vpop.permute.xlu1 %4506 }
 0x80d   :  { %4756 = vmatmul.mubr.msk.bf16.gmra.mrb[64].mxu0 %vm4376_vm11, %v5278_v23 }
 0x80e   :  { %4759 = vmatprep.mubr.msk.bf16.mxu0 %vm4376_vm11, %v5279_v40 }
 0x815   :  { %4760 = vmatmul.mubr.msk.bf16.gmra.mrb[68].mxu0 %vm4376_vm11, %v5280_v20 }
 0x8d8   :  { %v4753_v29 = vpop.f32.mrb[60].mxu0 }
 0x8d9   :  { %v4441_v62 = vadd.f32 %v4753_v29, %v4306_v5  ;;  %v4432_v51 = vpop.f32.mrb[61].mxu0 }
 0x8da   :  { %v4433_v44 = vadd.f32 %v4432_v51, %v4296_v2  ;;  %v4754_v63 = vpop.f32.mrb[62].mxu0 }
 0x8db   :  { %v4444_v1 = vadd.f32 %v4754_v63, %v4311_v17  ;;  %v4435_v45 = vpop.f32.mrb[63].mxu0  ;;  %v4480_v26 = vmax.f32 %v4441_v62, 0.0 }
 0x8dc   :  { %v4436_v6 = vadd.f32 %v4435_v45, %v4301_v52  ;;  %v4478_v14 = vmax.f32 %v4433_v44, 0.0 }
 0x8dd   :  { %v4481_v58 = vmax.f32 %v4444_v1, 0.0 }
 0x8de   :  { %v4479_v3 = vmax.f32 %v4436_v6, 0.0 }
 0x8df   :  { %v4490_v39 = vpack.c.bf16 %v4481_v58, %v4480_v26 }
 0x8e0   :  { %v4489_v37 = vpack.c.bf16 %v4479_v3, %v4478_v14  ;;  %v4757_v34 = vpop.f32.mrb[64].mxu0 }
 0x8e1   :  { %v4457_v10 = vadd.f32 %v4757_v34, %v4326_v43  ;;  %v4448_v22 = vpop.f32.mrb[65].mxu0 }
 0x8e2   :  { %v4449_v9 = vadd.f32 %v4448_v22, %v4316_v12  ;;  %v4758_v31 = vpop.f32.mrb[66].mxu0  ;;  %4764 = vmatpush3.bf16.msra.mxu1 %v4489_v37 }
 0x8e3   :  { %v4460_v28 = vadd.f32 %v4758_v31, %v4331_v24  ;;  %v4451_v11 = vpop.f32.mrb[67].mxu0  ;;  %4765 = vmatprep.subr.bf16.mxu1 %v5332_v25  ;;  %v4484_v42 = vmax.f32 %v4457_v10, 0.0 }
 0x8e4   :  { %v4452_v4 = vadd.f32 %v4451_v11, %v4321_v47  ;;  %v4482_v33 = vmax.f32 %v4449_v9, 0.0 }
 0x8e5   :  { %v4485_v60 = vmax.f32 %v4460_v28, 0.0 }
 0x8e6   :  { %v4483_v15 = vmax.f32 %v4452_v4, 0.0  ;;  %4766 = vmatpush3.bf16.msra.mxu1 %v4490_v39 }
 0x8e7   :  { %v4492_v19 = vpack.c.bf16 %v4485_v60, %v4484_v42  ;;  %4767 = vmatprep.subr.bf16.mxu1 %v5332_v25 }
 0x8e8   :  { %v4491_v35 = vpack.c.bf16 %v4483_v15, %v4482_v33  ;;  %v4761_v56 = vpop.f32.mrb[68].mxu0 }
 0x8e9   :  { %v4473_v30 = vadd.f32 %v4761_v56, %v4346_v27  ;;  %v4464_v0 = vpop.f32.mrb[69].mxu0 }
 0x8ea   :  { %v4465_v16 = vadd.f32 %v4464_v0, %v4336_v48  ;;  %v4762_v55 = vpop.f32.mrb[70].mxu0  ;;  %4768 = vmatpush3.bf16.msra.mxu1 %v4491_v35 }
 0x8eb   :  { %v4467_v46 = vpop.f32.mrb[71].mxu0  ;;  %4769 = vmatprep.subr.bf16.mxu1 %v5332_v25  ;;  %v4488_v57 = vmax.f32 %v4473_v30, 0.0 }
 0x8ec   :  { %v4468_v38 = vadd.f32 %v4467_v46, %v4341_v41  ;;  %v4486_v8 = vmax.f32 %v4465_v16, 0.0 }
 0x8ed   :  { %v4494_v36 = vpack.c.bf16 %v4488_v57, %v4488_v57 }
 0x8ee   :  { %v4487_v50 = vmax.f32 %v4468_v38, 0.0  ;;  %4770 = vmatpush3.bf16.msra.mxu1 %v4492_v19 }
 0x8ef   :  { %4771 = vmatprep.subr.bf16.mxu1 %v5332_v25  ;;  %v4519_v59 = vsel %vm9944_vm0, %v4494_v36, 0 }
 0x8f0   :  { %v4493_v61 = vpack.c.bf16 %v4487_v50, %v4486_v8 }
 0x8f2   :  { %4772 = vmatpush3.bf16.msra.mxu1 %v4493_v61 }
 0x8f3   :  { %4773 = vmatprep.subr.bf16.mxu1 %v5332_v25 }
 0x8f6   :  { %4774 = vmatpush3.bf16.msra.mxu1 %v4519_v59 }
 0x8f9   :  { %4776 = vmatmul.mubr.msk.bf16.vlgmr.msra.gmra.mrb[68].mxu1 %vm4514_vm14, %v5281_v54 }
 0x9cc   :  { %v4555_v18 = vpop.f32.mrb[68].mxu1 }
 0x9cd   :  { %v4556_v32 = vadd.f32 %v4555_v18, %v4502_v7  ;;  %v4777_v13 = vpop.f32.mrb[69].mxu1 }
 0x9ce   :  { %v4558_v53 = vpop.f32.mrb[70].mxu1 }
 0x9cf   :  { %4563 = vst.msk [vmem:[%s9152_s11] sm:$0xff] %vm4562_vm2, %v4556_v32  ;;  %v4559_v49 = vadd.f32 %v4558_v53, %v4507_v21  ;;  %v4778_v23 = vpop.f32.mrb[71].mxu1 }
 0x9d1   :  { %4565 = vst.msk [vmem:[%s9152_s11 + $0x8] sm:$0x3] %vm4564_vm12, %v4559_v49 }

</bundles_post_ra>
